<compile_context>
chip_gen: v7x
topology: tpu7x:2x2x1
jax: 0.10.0
libtpu: 0.0.40
codegen_flags: <defaults>
</compile_context>

<pallas_src>
import functools

import jax
import jax.numpy as jnp
from jax.experimental import pallas as pl
from jax.experimental.pallas import tpu as pltpu


_FULL_WEIGHT_BYTES = 8 * 1024 * 1024   # keep a weight block resident if it is <= 8 MB
_DEFAULT_BN = 2048                      # N tile for streamed (wide) weights
_DEFAULT_BM = 256                       # row tile


def _round_up(x, m):
    return ((x + m - 1) // m) * m


# ------------------------- Pallas kernels -------------------------

def _fused_linear_kernel(*refs, has_ln, has_bias, has_res, activation):
    """y = act(LN?(x) @ W + b?) + res?   --  one (bm, K) x (K, bn) tile per grid step."""
    i = 0
    x_ref = refs[i]; i += 1
    if has_ln:
        ln_w_ref, ln_b_ref = refs[i], refs[i + 1]; i += 2
    w_ref = refs[i]; i += 1
    if has_bias:
        b_ref = refs[i]; i += 1
    if has_res:
        r_ref = refs[i]; i += 1
    o_ref = refs[i]

    x = x_ref[...]
    if has_ln:
        # LayerNorm.forward casts to float32, normalizes, then returns in x.dtype
        xf = x.astype(jnp.float32)
        mean = jnp.mean(xf, axis=-1, keepdims=True)
        var = jnp.mean(jnp.square(xf - mean), axis=-1, keepdims=True)
        xf = (xf - mean) * jax.lax.rsqrt(var + 1e-5)
        x = (xf * ln_w_ref[...] + ln_b_ref[...]).astype(x.dtype)

    y = jnp.dot(x, w_ref[...], preferred_element_type=jnp.float32)
    if has_bias:
        y = y + b_ref[...].astype(jnp.float32)
    if activation == "gelu":
        # exact erf-based GELU, matching torch.nn.GELU(approximate='none')
        y = 0.5 * y * (1.0 + jax.lax.erf(y * 0.7071067811865476))
    if has_res:
        y = y + r_ref[...].astype(jnp.float32)
    o_ref[...] = y.astype(o_ref.dtype)


def _attend(q, k, v, *, n_head, causal):
    """q: (Tq, D), k/v: (Tk, D) for one batch, all heads. Scale already folded into
    the projection weights. Returns (Tq, D) f32."""
    Tq, D = q.shape
    Tk = k.shape[0]
    Dh = D // n_head
    if causal:
        row = jax.lax.broadcasted_iota(jnp.int32, (Tq, Tk), 0)
        col = jax.lax.broadcasted_iota(jnp.int32, (Tq, Tk), 1)
        neg = jnp.where(col > row, jnp.float32(-jnp.inf), jnp.float32(0.0))
    outs = []
    for h in range(n_head):
        sl = slice(h * Dh, (h + 1) * Dh)
        qh = q[:, sl]
        kh = k[:, sl]
        vh = v[:, sl]
        qk = jax.lax.dot_general(qh, kh, (((1,), (1,)), ((), ())),
                                 preferred_element_type=jnp.float32)      # (Tq, Tk)
        if causal:
            qk = qk + neg
        qk = qk - jnp.max(qk, axis=-1, keepdims=True)
        e = jnp.exp(qk)
        w = e / jnp.sum(e, axis=-1, keepdims=True)
        outs.append(jnp.dot(w.astype(vh.dtype), vh, preferred_element_type=jnp.float32))
    return jnp.concatenate(outs, axis=-1)                                 # (Tq, D), lane-dense


def _self_attn_kernel(qkv_ref, o_ref, *, n_head):
    D = o_ref.shape[-1]
    qkv = qkv_ref[0]                                                       # (T, 3D)
    out = _attend(qkv[:, :D], qkv[:, D:2 * D], qkv[:, 2 * D:3 * D],
                  n_head=n_head, causal=True)
    o_ref[0] = out.astype(o_ref.dtype)


def _cross_attn_kernel(q_ref, kv_ref, o_ref, *, n_head):
    D = o_ref.shape[-1]
    kv = kv_ref[0]                                                         # (Tk, 2D)
    out = _attend(q_ref[0], kv[:, :D], kv[:, D:2 * D], n_head=n_head, causal=False)
    o_ref[0] = out.astype(o_ref.dtype)


# ------------------------- pallas_call wrappers -------------------------

def fused_linear(x, w, b=None, *, ln=None, residual=None, activation=None,
                 out_dtype=None, bn=None, bm_max=_DEFAULT_BM):
    """x: (M, K); w: (K, N) kernel layout (pre-transposed); b: (N,) or None;
       ln: (gamma, beta) applied to x before the matmul; residual: (M, N) or None."""
    M, K = x.shape
    N = w.shape[1]
    out_dtype = out_dtype or x.dtype
    if w.dtype != x.dtype:
        w = w.astype(x.dtype)

    # row tiling
    m8 = _round_up(M, 8)
    bm = min(bm_max, m8)
    Mp = _round_up(m8, bm)

    # column tiling: keep the whole weight resident when small, stream it when wide
    if bn is None:
        bn = N if K * N * w.dtype.itemsize <= _FULL_WEIGHT_BYTES else _DEFAULT_BN
    if bn != N:
        bn = min(bn, _round_up(N, 128))
    Np = _round_up(N, bn) if bn != N else N

    xp = x if Mp == M else jnp.pad(x, ((0, Mp - M), (0, 0)))
    wp = w if Np == N else jnp.pad(w, ((0, 0), (0, Np - N)))

    operands = [xp]
    in_specs = [pl.BlockSpec((bm, K), lambda i, j: (i, 0))]
    if ln is not None:
        gamma, beta = ln
        operands += [gamma.reshape(1, K), beta.reshape(1, K)]
        in_specs += [pl.BlockSpec((1, K), lambda i, j: (0, 0)),
                     pl.BlockSpec((1, K), lambda i, j: (0, 0))]
    operands.append(wp)
    in_specs.append(pl.BlockSpec((K, bn), lambda i, j: (0, j)))
    if b is not None:
        bp = b if Np == N else jnp.pad(b, (0, Np - N))
        operands.append(bp.reshape(1, Np))
        in_specs.append(pl.BlockSpec((1, bn), lambda i, j: (0, j)))
    if residual is not None:
        rp = residual
        if Mp != M or Np != N:
            rp = jnp.pad(residual, ((0, Mp - M), (0, Np - N)))
        operands.append(rp)
        in_specs.append(pl.BlockSpec((bm, bn), lambda i, j: (i, j)))

    out = pl.pallas_call(
        functools.partial(_fused_linear_kernel, has_ln=ln is not None,
                          has_bias=b is not None, has_res=residual is not None,
                          activation=activation),
        out_shape=jax.ShapeDtypeStruct((Mp, Np), out_dtype),
        grid=(Mp // bm, Np // bn),
        in_specs=in_specs,
        out_specs=pl.BlockSpec((bm, bn), lambda i, j: (i, j)),
        compiler_params=pltpu.CompilerParams(
            dimension_semantics=("parallel", "parallel")),
    )(*operands)
    if Mp != M or Np != N:
        out = out[:M, :N]
    return out


def self_attention(qkv, n_head):
    """qkv: (B, T, 3D) fused projection -> (B, T, D), causal mask built in-kernel."""
    B, T, D3 = qkv.shape
    D = D3 // 3
    return pl.pallas_call(
        functools.partial(_self_attn_kernel, n_head=n_head),
        out_shape=jax.ShapeDtypeStruct((B, T, D), qkv.dtype),
        grid=(B,),
        in_specs=[pl.BlockSpec((1, T, D3), lambda b: (b, 0, 0))],
        out_specs=pl.BlockSpec((1, T, D), lambda b: (b, 0, 0)),
        compiler_params=pltpu.CompilerParams(dimension_semantics=("parallel",)),
    )(qkv)


def cross_attention(q, kv, n_head):
    """q: (B, Tq, D); kv: (B, Tk, 2D) fused K/V projection of xa -> (B, Tq, D)."""
    B, Tq, D = q.shape
    Tk = kv.shape[1]
    return pl.pallas_call(
        functools.partial(_cross_attn_kernel, n_head=n_head),
        out_shape=jax.ShapeDtypeStruct((B, Tq, D), q.dtype),
        grid=(B,),
        in_specs=[pl.BlockSpec((1, Tq, D), lambda b: (b, 0, 0)),
                  pl.BlockSpec((1, Tk, 2 * D), lambda b: (b, 0, 0))],
        out_specs=pl.BlockSpec((1, Tq, D), lambda b: (b, 0, 0)),
        compiler_params=pltpu.CompilerParams(dimension_semantics=("parallel",)),
    )(q, kv)


# ------------------------- model glue -------------------------

def soft_text_decoder_forward(tokens, xa, params, *, n_head, n_prompts):
    """tokens: (B, T) int32 ; xa: (B, S_audio, n_state) ; no kv_cache, eval mode."""
    B, T = tokens.shape
    emb = params["token_embedding"]                              # (V, D)
    V, D = emb.shape
    x = emb[tokens] + params["positional_embedding"][:T]         # offset = 0 (no kv_cache)
    prompts = jnp.broadcast_to(params["learned_embedding"][None], (B, n_prompts, D))
    x = jnp.concatenate([prompts, x], axis=1).astype(xa.dtype)
    Tctx = x.shape[1]
    Sa = xa.shape[1]

    x2 = x.reshape(B * Tctx, D)
    xa2 = xa.reshape(B * Sa, D)

    for blk in params["blocks"]:
        # --- self attention: LN fused into the QKV matmul, residual fused into out-proj
        qkv = fused_linear(x2, blk["qkv_w"], blk["qkv_b"],
                           ln=(blk["attn_ln_w"], blk["attn_ln_b"]))
        wv = self_attention(qkv.reshape(B, Tctx, 3 * D), n_head)
        x2 = fused_linear(wv.reshape(B * Tctx, D), blk["attn_out_w"], blk["attn_out_b"],
                          residual=x2)

        # --- cross attention: LN fused into Q matmul; K/V of xa fused into one matmul
        q = fused_linear(x2, blk["xq_w"], blk["xq_b"],
                         ln=(blk["cross_ln_w"], blk["cross_ln_b"]))
        kv = fused_linear(xa2, blk["xkv_w"], blk["xkv_b"])
        wv = cross_attention(q.reshape(B, Tctx, D), kv.reshape(B, Sa, 2 * D), n_head)
        x2 = fused_linear(wv.reshape(B * Tctx, D), blk["xout_w"], blk["xout_b"],
                          residual=x2)

        # --- MLP: LN + GELU fused into fc1, residual fused into fc2
        h = fused_linear(x2, blk["fc1_w"], blk["fc1_b"],
                         ln=(blk["mlp_ln_w"], blk["mlp_ln_b"]), activation="gelu")
        x2 = fused_linear(h, blk["fc2_w"], blk["fc2_b"], residual=x2)

    # final LN fused into the N-tiled vocab projection (weight streaming), no bias
    bn_logits = 256 if V <= 4096 else _DEFAULT_BN
    logits = fused_linear(x2, params["emb_T"], None,
                          ln=(params["ln_w"], params["ln_b"]),
                          out_dtype=jnp.float32, bn=bn_logits)
    return logits.reshape(B, Tctx, V)


# ------------------------- parameters -------------------------

def init_params(key, n_vocab, n_ctx, n_state, n_layer, n_prompts):
    """Deterministic parameters in the PyTorch module layout (Linear weight = (out, in))."""
    def make_block(k, D):
        ks = jax.random.split(k, 18)
        W = lambda i, o_, i_: 0.02 * jax.random.normal(ks[i], (o_, i_), jnp.float32)
        Bv = lambda i, o_: 0.02 * jax.random.normal(ks[i], (o_,), jnp.float32)
        return {
            "attn": {"q_w": W(0, D, D), "q_b": Bv(1, D), "k_w": W(2, D, D),
                     "v_w": W(3, D, D), "v_b": Bv(4, D),
                     "out_w": W(5, D, D), "out_b": Bv(6, D)},
            "attn_ln_w": jnp.ones((D,), jnp.float32), "attn_ln_b": jnp.zeros((D,), jnp.float32),
            "cross_attn": {"q_w": W(7, D, D), "q_b": Bv(8, D), "k_w": W(9, D, D),
                           "v_w": W(10, D, D), "v_b": Bv(11, D),
                           "out_w": W(12, D, D), "out_b": Bv(13, D)},
            "cross_attn_ln_w": jnp.ones((D,), jnp.float32),
            "cross_attn_ln_b": jnp.zeros((D,), jnp.float32),
            "fc1_w": W(14, 4 * D, D), "fc1_b": Bv(15, 4 * D),
            "fc2_w": W(16, D, 4 * D), "fc2_b": Bv(17, D),
            "mlp_ln_w": jnp.ones((D,), jnp.float32), "mlp_ln_b": jnp.zeros((D,), jnp.float32),
        }

    keys = jax.random.split(key, 3 + n_layer)
    return {
        "token_embedding": 0.02 * jax.random.normal(keys[0], (n_vocab, n_state), jnp.float32),
        "positional_embedding": 0.02 * jax.random.normal(keys[1], (n_ctx, n_state), jnp.float32),
        "learned_embedding": jax.random.normal(keys[2], (n_prompts, n_state), jnp.float32),
        "ln_w": jnp.ones((n_state,), jnp.float32),
        "ln_b": jnp.zeros((n_state,), jnp.float32),
        "blocks": [make_block(keys[3 + i], n_state) for i in range(n_layer)],
    }


def prepare_params(tp, n_head):
    """One-time (outside jit) conversion to kernel layout: weights transposed to (K, N),
    Q/K/V (and cross K/V) concatenated, the Dh^-0.25 attention scale folded into the
    q/k weight columns and q bias, and the embedding transposed once for the logits."""
    D = tp["token_embedding"].shape[1]
    s = float(D // n_head) ** (-0.25)
    zeros = jnp.zeros((D,), jnp.float32)
    blocks = []
    for b in tp["blocks"]:
        a, c = b["attn"], b["cross_attn"]
        blocks.append({
            "attn_ln_w": b["attn_ln_w"], "attn_ln_b": b["attn_ln_b"],
            "qkv_w": jnp.concatenate([a["q_w"] * s, a["k_w"] * s, a["v_w"]], axis=0).T,  # (D, 3D)
            "qkv_b": jnp.concatenate([a["q_b"] * s, zeros, a["v_b"]], axis=0),           # key: no bias
            "attn_out_w": a["out_w"].T, "attn_out_b": a["out_b"],
            "cross_ln_w": b["cross_attn_ln_w"], "cross_ln_b": b["cross_attn_ln_b"],
            "xq_w": (c["q_w"] * s).T, "xq_b": c["q_b"] * s,
            "xkv_w": jnp.concatenate([c["k_w"] * s, c["v_w"]], axis=0).T,                # (D, 2D)
            "xkv_b": jnp.concatenate([zeros, c["v_b"]], axis=0),
            "xout_w": c["out_w"].T, "xout_b": c["out_b"],
            "mlp_ln_w": b["mlp_ln_w"], "mlp_ln_b": b["mlp_ln_b"],
            "fc1_w": b["fc1_w"].T, "fc1_b": b["fc1_b"],
            "fc2_w": b["fc2_w"].T, "fc2_b": b["fc2_b"],
        })
    return {
        "token_embedding": tp["token_embedding"],
        "emb_T": tp["token_embedding"].T,         # (D, V), transposed once, not per forward
        "positional_embedding": tp["positional_embedding"],
        "learned_embedding": tp["learned_embedding"],
        "ln_w": tp["ln_w"], "ln_b": tp["ln_b"],
        "blocks": blocks,
    }


# ------------------------- pure-JAX reference (for correctness check) -------------------------

def _reference_forward(tokens, xa, tp, n_head, n_prompts):
    emb = tp["token_embedding"]
    D = emb.shape[1]
    B, T = tokens.shape
    x = emb[tokens] + tp["positional_embedding"][:T]
    x = jnp.concatenate(
        [jnp.broadcast_to(tp["learned_embedding"][None], (B, n_prompts, D)), x], axis=1)
    x = x.astype(xa.dtype)
    Tctx = x.shape[1]
    mask = jnp.where(jnp.triu(jnp.ones((Tctx, Tctx), bool), 1), -jnp.inf, 0.0)

    def ln(v, w, b):
        vf = v.astype(jnp.float32)
        m = vf.mean(-1, keepdims=True)
        var = ((vf - m) ** 2).mean(-1, keepdims=True)
        return ((vf - m) * jax.lax.rsqrt(var + 1e-5) * w + b).astype(v.dtype)

    def mha(xq, xkv, p, msk):
        q = xq @ p["q_w"].T + p["q_b"]
        k = xkv @ p["k_w"].T
        v = xkv @ p["v_w"].T + p["v_b"]
        Bq, Tq, _ = q.shape
        Tk = k.shape[1]
        Dh = D // n_head
        s = Dh ** (-0.25)
        qh = q.reshape(Bq, Tq, n_head, Dh).transpose(0, 2, 1, 3) * s
        kh = k.reshape(Bq, Tk, n_head, Dh).transpose(0, 2, 3, 1) * s
        vh = v.reshape(Bq, Tk, n_head, Dh).transpose(0, 2, 1, 3)
        qk = qh @ kh
        if msk is not None:
            qk = qk + msk
        w = jax.nn.softmax(qk.astype(jnp.float32), axis=-1).astype(q.dtype)
        o = (w @ vh).transpose(0, 2, 1, 3).reshape(Bq, Tq, D)
        return o @ p["out_w"].T + p["out_b"]

    for blk in tp["blocks"]:
        h = ln(x, blk["attn_ln_w"], blk["attn_ln_b"])
        x = x + mha(h, h, blk["attn"], mask)
        h = ln(x, blk["cross_attn_ln_w"], blk["cross_attn_ln_b"])
        x = x + mha(h, xa, blk["cross_attn"], None)
        h = ln(x, blk["mlp_ln_w"], blk["mlp_ln_b"])
        h = jax.nn.gelu(h @ blk["fc1_w"].T + blk["fc1_b"], approximate=False)
        x = x + (h @ blk["fc2_w"].T + blk["fc2_b"])
    x = ln(x, tp["ln_w"], tp["ln_b"])
    return (x @ emb.T).astype(jnp.float32)


# ------------------------- main -------------------------

if __name__ == "__main__":
    n_vocab, n_ctx, n_state, n_head, n_layer, n_prompts = 512, 8, 128, 4, 2, 8
    B, T, S_audio = 2, 8, 16

    root = jax.random.PRNGKey(0)
    k_params, k_tok, k_audio = jax.random.split(root, 3)
    params_pt = init_params(k_params, n_vocab, n_ctx, n_state, n_layer, n_prompts)
    params = prepare_params(params_pt, n_head)   # eager, once, outside jit

    tokens = jax.random.randint(k_tok, (B, T), 0, n_vocab, dtype=jnp.int32)
    xa = jax.random.normal(k_audio, (B, S_audio, n_state), jnp.float32)

    fwd = jax.jit(functools.partial(soft_text_decoder_forward,
                                    n_head=n_head, n_prompts=n_prompts))
    logits = fwd(tokens, xa, params)
    jax.block_until_ready(logits)

    assert logits.shape == (B, T + n_prompts, n_vocab)
    assert logits.dtype == jnp.float32

    ref = _reference_forward(tokens, xa, params_pt, n_head, n_prompts)
    max_err = float(jnp.max(jnp.abs(logits - ref)))
    assert bool(jnp.allclose(logits, ref, atol=2e-3, rtol=2e-3)), f"max_err={max_err}"

    print("KERNEL_OK")
</pallas_src>

<mosaic_0001>
module attributes {stable_mosaic.version = 11 : i64} {
  func.func @_fused_linear_kernel(%arg0: i32, %arg1: i32, %arg2: memref<32x128xf32, #tpu.memory_space<vmem>>, %arg3: memref<128x128xf32, #tpu.memory_space<vmem>>, %arg4: memref<1x128xf32, #tpu.memory_space<vmem>>, %arg5: memref<32x128xf32, #tpu.memory_space<vmem>>, %arg6: memref<32x128xf32, #tpu.memory_space<vmem>>) attributes {dimension_semantics = [#tpu.dimension_semantics<parallel>, #tpu.dimension_semantics<parallel>], iteration_bounds = array<i64: 1, 1>, scalar_prefetch = 0 : i64, scratch_operands = 0 : i64, tpu.core_type = #tpu.core_type<tc>, window_params = [{transform_indices = @transform_0, window_bounds = array<i64: 32, 128>}, {transform_indices = @transform_1, window_bounds = array<i64: 128, 128>}, {transform_indices = @transform_2, window_bounds = array<i64: 1, 128>}, {transform_indices = @transform_3, window_bounds = array<i64: 32, 128>}, {transform_indices = @transform_4, window_bounds = array<i64: 32, 128>}]} {
    %c0 = arith.constant 0 : index
    %c0_0 = arith.constant 0 : index
    %0 = vector.load %arg2[%c0, %c0_0] : memref<32x128xf32, #tpu.memory_space<vmem>>, vector<32x128xf32>
    %c0_1 = arith.constant 0 : index
    %c0_2 = arith.constant 0 : index
    %1 = vector.load %arg3[%c0_1, %c0_2] : memref<128x128xf32, #tpu.memory_space<vmem>>, vector<128x128xf32>
    %cst = arith.constant dense<0.000000e+00> : vector<32x128xf32>
    %2 = tpu.matmul %0, %1, %cst {dimension_numbers = #tpu.dot_dimension_numbers<[1], [0], [0], [1], [0, 0, 1, 1], [], []>} : vector<32x128xf32>, vector<128x128xf32>, vector<32x128xf32> -> vector<32x128xf32>
    %c0_3 = arith.constant 0 : index
    %c0_4 = arith.constant 0 : index
    %3 = vector.load %arg4[%c0_3, %c0_4] : memref<1x128xf32, #tpu.memory_space<vmem>>, vector<1x128xf32>
    %4 = vector.broadcast %3 : vector<1x128xf32> to vector<32x128xf32>
    %5 = arith.addf %2, %4 : vector<32x128xf32>
    %c0_5 = arith.constant 0 : index
    %c0_6 = arith.constant 0 : index
    %6 = vector.load %arg5[%c0_5, %c0_6] : memref<32x128xf32, #tpu.memory_space<vmem>>, vector<32x128xf32>
    %7 = arith.addf %5, %6 : vector<32x128xf32>
    %c0_7 = arith.constant 0 : index
    %c0_8 = arith.constant 0 : index
    %8 = vector.load %arg6[%c0_7, %c0_8] : memref<32x128xf32, #tpu.memory_space<vmem>>, vector<32x128xf32>
    tpu.vector_store %arg6[%c0_7, %c0_8], %7 {strides = array<i32>} : memref<32x128xf32, #tpu.memory_space<vmem>>, vector<32x128xf32>,
    return
  }
  func.func @transform_0(%arg0: i32, %arg1: i32) -> (i32, i32) {
    %c0_i32 = arith.constant 0 : i32
    %c0_i32_0 = arith.constant 0 : i32
    return %arg0, %c0_i32 : i32, i32
  }
  func.func @transform_1(%arg0: i32, %arg1: i32) -> (i32, i32) {
    %c0_i32 = arith.constant 0 : i32
    %c0_i32_0 = arith.constant 0 : i32
    return %c0_i32, %arg1 : i32, i32
  }
  func.func @transform_2(%arg0: i32, %arg1: i32) -> (i32, i32) {
    %c0_i32 = arith.constant 0 : i32
    %c0_i32_0 = arith.constant 0 : i32
    return %c0_i32, %arg1 : i32, i32
  }
  func.func @transform_3(%arg0: i32, %arg1: i32) -> (i32, i32) {
    %c0_i32 = arith.constant 0 : i32
    return %arg0, %arg1 : i32, i32
  }
  func.func @transform_4(%arg0: i32, %arg1: i32) -> (i32, i32) {
    %c0_i32 = arith.constant 0 : i32
    return %arg0, %arg1 : i32, i32
  }
}

module attributes {stable_mosaic.version = 11 : i64} {
  func.func @_self_attn_kernel(%arg0: i32, %arg1: memref<1x16x384xf32, #tpu.memory_space<vmem>>, %arg2: memref<1x16x128xf32, #tpu.memory_space<vmem>>) attributes {dimension_semantics = [#tpu.dimension_semantics<parallel>], iteration_bounds = array<i64: 2>, scalar_prefetch = 0 : i64, scratch_operands = 0 : i64, tpu.core_type = #tpu.core_type<tc>, window_params = [{transform_indices = @transform_0, window_bounds = array<i64: 1, 16, 384>}, {transform_indices = @transform_1, window_bounds = array<i64: 1, 16, 128>}]} {
    %c0 = arith.constant 0 : index
    %c0_0 = arith.constant 0 : index
    %c0_1 = arith.constant 0 : index
    %0 = vector.load %arg1[%c0, %c0_0, %c0_1] : memref<1x16x384xf32, #tpu.memory_space<vmem>>, vector<1x16x384xf32>
    %1 = vector.shape_cast %0 : vector<1x16x384xf32> to vector<16x384xf32>
    %2 = vector.extract_strided_slice %1 {offsets = [0, 0], sizes = [16, 128], strides = [1, 1]} : vector<16x384xf32> to vector<16x128xf32>
    %3 = vector.extract_strided_slice %1 {offsets = [0, 128], sizes = [16, 128], strides = [1, 1]} : vector<16x384xf32> to vector<16x128xf32>
    %4 = vector.extract_strided_slice %1 {offsets = [0, 256], sizes = [16, 128], strides = [1, 1]} : vector<16x384xf32> to vector<16x128xf32>
    %5 = tpu.iota {dimensions = array<i32: 0>} : vector<16x16xi32>
    %6 = tpu.iota {dimensions = array<i32: 1>} : vector<16x16xi32>
    %7 = arith.cmpi sgt, %6, %5 : vector<16x16xi32>
    %cst = arith.constant 0xFF800000 : f32
    %cst_2 = arith.constant 0.000000e+00 : f32
    %8 = vector.broadcast %cst : f32 to vector<16x16xf32>
    %9 = vector.broadcast %cst_2 : f32 to vector<16x16xf32>
    %10 = arith.select %7, %8, %9 : vector<16x16xi1>, vector<16x16xf32>
    %11 = vector.extract_strided_slice %2 {offsets = [0, 0], sizes = [16, 32], strides = [1, 1]} : vector<16x128xf32> to vector<16x32xf32>
    %12 = vector.extract_strided_slice %3 {offsets = [0, 0], sizes = [16, 32], strides = [1, 1]} : vector<16x128xf32> to vector<16x32xf32>
    %13 = vector.extract_strided_slice %4 {offsets = [0, 0], sizes = [16, 32], strides = [1, 1]} : vector<16x128xf32> to vector<16x32xf32>
    %cst_3 = arith.constant dense<0.000000e+00> : vector<16x16xf32>
    %14 = tpu.matmul %11, %12, %cst_3 {dimension_numbers = #tpu.dot_dimension_numbers<[1], [1], [0], [0], [0, 0, 1, 0], [], []>} : vector<16x32xf32>, vector<16x32xf32>, vector<16x16xf32> -> vector<16x16xf32>
    %15 = arith.addf %14, %10 : vector<16x16xf32>
    %cst_4 = arith.constant dense<0xFF800000> : vector<16xf32>
    %16 = vector.multi_reduction <maximumf>, %15, %cst_4 [1] : vector<16x16xf32> to vector<16xf32>
    %17 = vector.shape_cast %16 : vector<16xf32> to vector<16x1xf32>
    %18 = vector.broadcast %17 : vector<16x1xf32> to vector<16x16xf32>
    %19 = arith.subf %15, %18 : vector<16x16xf32>
    %20 = math.exp %19 : vector<16x16xf32>
    %cst_5 = arith.constant dense<0.000000e+00> : vector<16xf32>
    %21 = vector.multi_reduction <add>, %20, %cst_5 [1] : vector<16x16xf32> to vector<16xf32>
    %22 = vector.shape_cast %21 : vector<16xf32> to vector<16x1xf32>
    %23 = vector.broadcast %22 : vector<16x1xf32> to vector<16x16xf32>
    %24 = arith.divf %20, %23 : vector<16x16xf32>
    %cst_6 = arith.constant dense<0.000000e+00> : vector<16x32xf32>
    %25 = tpu.matmul %24, %13, %cst_6 {dimension_numbers = #tpu.dot_dimension_numbers<[1], [0], [0], [1], [0, 0, 1, 1], [], []>} : vector<16x16xf32>, vector<16x32xf32>, vector<16x32xf32> -> vector<16x32xf32>
    %26 = vector.extract_strided_slice %2 {offsets = [0, 32], sizes = [16, 32], strides = [1, 1]} : vector<16x128xf32> to vector<16x32xf32>
    %27 = vector.extract_strided_slice %3 {offsets = [0, 32], sizes = [16, 32], strides = [1, 1]} : vector<16x128xf32> to vector<16x32xf32>
    %28 = vector.extract_strided_slice %4 {offsets = [0, 32], sizes = [16, 32], strides = [1, 1]} : vector<16x128xf32> to vector<16x32xf32>
    %cst_7 = arith.constant dense<0.000000e+00> : vector<16x16xf32>
    %29 = tpu.matmul %26, %27, %cst_7 {dimension_numbers = #tpu.dot_dimension_numbers<[1], [1], [0], [0], [0, 0, 1, 0], [], []>} : vector<16x32xf32>, vector<16x32xf32>, vector<16x16xf32> -> vector<16x16xf32>
    %30 = arith.addf %29, %10 : vector<16x16xf32>
    %cst_8 = arith.constant dense<0xFF800000> : vector<16xf32>
    %31 = vector.multi_reduction <maximumf>, %30, %cst_8 [1] : vector<16x16xf32> to vector<16xf32>
    %32 = vector.shape_cast %31 : vector<16xf32> to vector<16x1xf32>
    %33 = vector.broadcast %32 : vector<16x1xf32> to vector<16x16xf32>
    %34 = arith.subf %30, %33 : vector<16x16xf32>
    %35 = math.exp %34 : vector<16x16xf32>
    %cst_9 = arith.constant dense<0.000000e+00> : vector<16xf32>
    %36 = vector.multi_reduction <add>, %35, %cst_9 [1] : vector<16x16xf32> to vector<16xf32>
    %37 = vector.shape_cast %36 : vector<16xf32> to vector<16x1xf32>
    %38 = vector.broadcast %37 : vector<16x1xf32> to vector<16x16xf32>
    %39 = arith.divf %35, %38 : vector<16x16xf32>
    %cst_10 = arith.constant dense<0.000000e+00> : vector<16x32xf32>
    %40 = tpu.matmul %39, %28, %cst_10 {dimension_numbers = #tpu.dot_dimension_numbers<[1], [0], [0], [1], [0, 0, 1, 1], [], []>} : vector<16x16xf32>, vector<16x32xf32>, vector<16x32xf32> -> vector<16x32xf32>
    %41 = vector.extract_strided_slice %2 {offsets = [0, 64], sizes = [16, 32], strides = [1, 1]} : vector<16x128xf32> to vector<16x32xf32>
    %42 = vector.extract_strided_slice %3 {offsets = [0, 64], sizes = [16, 32], strides = [1, 1]} : vector<16x128xf32> to vector<16x32xf32>
    %43 = vector.extract_strided_slice %4 {offsets = [0, 64], sizes = [16, 32], strides = [1, 1]} : vector<16x128xf32> to vector<16x32xf32>
    %cst_11 = arith.constant dense<0.000000e+00> : vector<16x16xf32>
    %44 = tpu.matmul %41, %42, %cst_11 {dimension_numbers = #tpu.dot_dimension_numbers<[1], [1], [0], [0], [0, 0, 1, 0], [], []>} : vector<16x32xf32>, vector<16x32xf32>, vector<16x16xf32> -> vector<16x16xf32>
    %45 = arith.addf %44, %10 : vector<16x16xf32>
    %cst_12 = arith.constant dense<0xFF800000> : vector<16xf32>
    %46 = vector.multi_reduction <maximumf>, %45, %cst_12 [1] : vector<16x16xf32> to vector<16xf32>
    %47 = vector.shape_cast %46 : vector<16xf32> to vector<16x1xf32>
    %48 = vector.broadcast %47 : vector<16x1xf32> to vector<16x16xf32>
    %49 = arith.subf %45, %48 : vector<16x16xf32>
    %50 = math.exp %49 : vector<16x16xf32>
    %cst_13 = arith.constant dense<0.000000e+00> : vector<16xf32>
    %51 = vector.multi_reduction <add>, %50, %cst_13 [1] : vector<16x16xf32> to vector<16xf32>
    %52 = vector.shape_cast %51 : vector<16xf32> to vector<16x1xf32>
    %53 = vector.broadcast %52 : vector<16x1xf32> to vector<16x16xf32>
    %54 = arith.divf %50, %53 : vector<16x16xf32>
    %cst_14 = arith.constant dense<0.000000e+00> : vector<16x32xf32>
    %55 = tpu.matmul %54, %43, %cst_14 {dimension_numbers = #tpu.dot_dimension_numbers<[1], [0], [0], [1], [0, 0, 1, 1], [], []>} : vector<16x16xf32>, vector<16x32xf32>, vector<16x32xf32> -> vector<16x32xf32>
    %56 = vector.extract_strided_slice %2 {offsets = [0, 96], sizes = [16, 32], strides = [1, 1]} : vector<16x128xf32> to vector<16x32xf32>
    %57 = vector.extract_strided_slice %3 {offsets = [0, 96], sizes = [16, 32], strides = [1, 1]} : vector<16x128xf32> to vector<16x32xf32>
    %58 = vector.extract_strided_slice %4 {offsets = [0, 96], sizes = [16, 32], strides = [1, 1]} : vector<16x128xf32> to vector<16x32xf32>
    %cst_15 = arith.constant dense<0.000000e+00> : vector<16x16xf32>
    %59 = tpu.matmul %56, %57, %cst_15 {dimension_numbers = #tpu.dot_dimension_numbers<[1], [1], [0], [0], [0, 0, 1, 0], [], []>} : vector<16x32xf32>, vector<16x32xf32>, vector<16x16xf32> -> vector<16x16xf32>
    %60 = arith.addf %59, %10 : vector<16x16xf32>
    %cst_16 = arith.constant dense<0xFF800000> : vector<16xf32>
    %61 = vector.multi_reduction <maximumf>, %60, %cst_16 [1] : vector<16x16xf32> to vector<16xf32>
    %62 = vector.shape_cast %61 : vector<16xf32> to vector<16x1xf32>
    %63 = vector.broadcast %62 : vector<16x1xf32> to vector<16x16xf32>
    %64 = arith.subf %60, %63 : vector<16x16xf32>
    %65 = math.exp %64 : vector<16x16xf32>
    %cst_17 = arith.constant dense<0.000000e+00> : vector<16xf32>
    %66 = vector.multi_reduction <add>, %65, %cst_17 [1] : vector<16x16xf32> to vector<16xf32>
    %67 = vector.shape_cast %66 : vector<16xf32> to vector<16x1xf32>
    %68 = vector.broadcast %67 : vector<16x1xf32> to vector<16x16xf32>
    %69 = arith.divf %65, %68 : vector<16x16xf32>
    %cst_18 = arith.constant dense<0.000000e+00> : vector<16x32xf32>
    %70 = tpu.matmul %69, %58, %cst_18 {dimension_numbers = #tpu.dot_dimension_numbers<[1], [0], [0], [1], [0, 0, 1, 1], [], []>} : vector<16x16xf32>, vector<16x32xf32>, vector<16x32xf32> -> vector<16x32xf32>
    %71 = tpu.concatenate %25, %40, %55, %70 in 1 : vector<16x32xf32>, vector<16x32xf32>, vector<16x32xf32>, vector<16x32xf32> -> vector<16x128xf32>
    %c0_19 = arith.constant 0 : index
    %c0_20 = arith.constant 0 : index
    %c0_21 = arith.constant 0 : index
    %72 = vector.load %arg2[%c0_19, %c0_20, %c0_21] : memref<1x16x128xf32, #tpu.memory_space<vmem>>, vector<1x16x128xf32>
    %73 = vector.shape_cast %72 : vector<1x16x128xf32> to vector<16x128xf32>
    %74 = vector.shape_cast %71 : vector<16x128xf32> to vector<1x16x128xf32>
    tpu.vector_store %arg2[%c0_19, %c0_20, %c0_21], %74 {strides = array<i32>} : memref<1x16x128xf32, #tpu.memory_space<vmem>>, vector<1x16x128xf32>,
    return
  }
  func.func @transform_0(%arg0: i32) -> (i32, i32, i32) {
    %c0_i32 = arith.constant 0 : i32
    %c0_i32_0 = arith.constant 0 : i32
    %c0_i32_1 = arith.constant 0 : i32
    return %arg0, %c0_i32, %c0_i32_0 : i32, i32, i32
  }
  func.func @transform_1(%arg0: i32) -> (i32, i32, i32) {
    %c0_i32 = arith.constant 0 : i32
    %c0_i32_0 = arith.constant 0 : i32
    %c0_i32_1 = arith.constant 0 : i32
    return %arg0, %c0_i32, %c0_i32_0 : i32, i32, i32
  }
}

module attributes {stable_mosaic.version = 11 : i64} {
  func.func @_fused_linear_kernel(%arg0: i32, %arg1: i32, %arg2: memref<32x128xf32, #tpu.memory_space<vmem>>, %arg3: memref<1x128xf32, #tpu.memory_space<vmem>>, %arg4: memref<1x128xf32, #tpu.memory_space<vmem>>, %arg5: memref<128x128xf32, #tpu.memory_space<vmem>>, %arg6: memref<1x128xf32, #tpu.memory_space<vmem>>, %arg7: memref<32x128xf32, #tpu.memory_space<vmem>>) attributes {dimension_semantics = [#tpu.dimension_semantics<parallel>, #tpu.dimension_semantics<parallel>], iteration_bounds = array<i64: 1, 1>, scalar_prefetch = 0 : i64, scratch_operands = 0 : i64, tpu.core_type = #tpu.core_type<tc>, window_params = [{transform_indices = @transform_0, window_bounds = array<i64: 32, 128>}, {pipeline_mode = #tpu.pipeline_mode<synchronous>, transform_indices = @transform_1, window_bounds = array<i64: 1, 128>}, {pipeline_mode = #tpu.pipeline_mode<synchronous>, transform_indices = @transform_2, window_bounds = array<i64: 1, 128>}, {transform_indices = @transform_3, window_bounds = array<i64: 128, 128>}, {transform_indices = @transform_4, window_bounds = array<i64: 1, 128>}, {transform_indices = @transform_5, window_bounds = array<i64: 32, 128>}]} {
    %c0 = arith.constant 0 : index
    %c0_0 = arith.constant 0 : index
    %0 = vector.load %arg2[%c0, %c0_0] : memref<32x128xf32, #tpu.memory_space<vmem>>, vector<32x128xf32>
    %cst = arith.constant dense<0.000000e+00> : vector<32xf32>
    %1 = vector.multi_reduction <add>, %0, %cst [1] : vector<32x128xf32> to vector<32xf32>
    %2 = vector.shape_cast %1 : vector<32xf32> to vector<32x1xf32>
    %cst_1 = arith.constant 1.280000e+02 : f32
    %3 = vector.broadcast %cst_1 : f32 to vector<32x1xf32>
    %4 = arith.divf %2, %3 : vector<32x1xf32>
    %5 = vector.broadcast %4 : vector<32x1xf32> to vector<32x128xf32>
    %6 = arith.subf %0, %5 : vector<32x128xf32>
    %7 = arith.mulf %6, %6 : vector<32x128xf32>
    %cst_2 = arith.constant dense<0.000000e+00> : vector<32xf32>
    %8 = vector.multi_reduction <add>, %7, %cst_2 [1] : vector<32x128xf32> to vector<32xf32>
    %9 = vector.shape_cast %8 : vector<32xf32> to vector<32x1xf32>
    %cst_3 = arith.constant 1.280000e+02 : f32
    %10 = vector.broadcast %cst_3 : f32 to vector<32x1xf32>
    %11 = arith.divf %9, %10 : vector<32x1xf32>
    %12 = vector.broadcast %4 : vector<32x1xf32> to vector<32x128xf32>
    %13 = arith.subf %0, %12 : vector<32x128xf32>
    %cst_4 = arith.constant 9.99999974E-6 : f32
    %14 = vector.broadcast %cst_4 : f32 to vector<32x1xf32>
    %15 = arith.addf %11, %14 : vector<32x1xf32>
    %16 = math.rsqrt %15 : vector<32x1xf32>
    %17 = vector.broadcast %16 : vector<32x1xf32> to vector<32x128xf32>
    %18 = arith.mulf %13, %17 : vector<32x128xf32>
    %c0_5 = arith.constant 0 : index
    %c0_6 = arith.constant 0 : index
    %19 = vector.load %arg3[%c0_5, %c0_6] : memref<1x128xf32, #tpu.memory_space<vmem>>, vector<1x128xf32>
    %20 = vector.broadcast %19 : vector<1x128xf32> to vector<32x128xf32>
    %21 = arith.mulf %18, %20 : vector<32x128xf32>
    %c0_7 = arith.constant 0 : index
    %c0_8 = arith.constant 0 : index
    %22 = vector.load %arg4[%c0_7, %c0_8] : memref<1x128xf32, #tpu.memory_space<vmem>>, vector<1x128xf32>
    %23 = vector.broadcast %22 : vector<1x128xf32> to vector<32x128xf32>
    %24 = arith.addf %21, %23 : vector<32x128xf32>
    %c0_9 = arith.constant 0 : index
    %c0_10 = arith.constant 0 : index
    %25 = vector.load %arg5[%c0_9, %c0_10] : memref<128x128xf32, #tpu.memory_space<vmem>>, vector<128x128xf32>
    %cst_11 = arith.constant dense<0.000000e+00> : vector<32x128xf32>
    %26 = tpu.matmul %24, %25, %cst_11 {dimension_numbers = #tpu.dot_dimension_numbers<[1], [0], [0], [1], [0, 0, 1, 1], [], []>} : vector<32x128xf32>, vector<128x128xf32>, vector<32x128xf32> -> vector<32x128xf32>
    %c0_12 = arith.constant 0 : index
    %c0_13 = arith.constant 0 : index
    %27 = vector.load %arg6[%c0_12, %c0_13] : memref<1x128xf32, #tpu.memory_space<vmem>>, vector<1x128xf32>
    %28 = vector.broadcast %27 : vector<1x128xf32> to vector<32x128xf32>
    %29 = arith.addf %26, %28 : vector<32x128xf32>
    %c0_14 = arith.constant 0 : index
    %c0_15 = arith.constant 0 : index
    %30 = vector.load %arg7[%c0_14, %c0_15] : memref<32x128xf32, #tpu.memory_space<vmem>>, vector<32x128xf32>
    tpu.vector_store %arg7[%c0_14, %c0_15], %29 {strides = array<i32>} : memref<32x128xf32, #tpu.memory_space<vmem>>, vector<32x128xf32>,
    return
  }
  func.func @transform_0(%arg0: i32, %arg1: i32) -> (i32, i32) {
    %c0_i32 = arith.constant 0 : i32
    %c0_i32_0 = arith.constant 0 : i32
    return %arg0, %c0_i32 : i32, i32
  }
  func.func @transform_1(%arg0: i32, %arg1: i32) -> (i32, i32) {
    %c0_i32 = arith.constant 0 : i32
    %c0_i32_0 = arith.constant 0 : i32
    %c0_i32_1 = arith.constant 0 : i32
    return %c0_i32, %c0_i32_0 : i32, i32
  }
  func.func @transform_2(%arg0: i32, %arg1: i32) -> (i32, i32) {
    %c0_i32 = arith.constant 0 : i32
    %c0_i32_0 = arith.constant 0 : i32
    %c0_i32_1 = arith.constant 0 : i32
    return %c0_i32, %c0_i32_0 : i32, i32
  }
  func.func @transform_3(%arg0: i32, %arg1: i32) -> (i32, i32) {
    %c0_i32 = arith.constant 0 : i32
    %c0_i32_0 = arith.constant 0 : i32
    return %c0_i32, %arg1 : i32, i32
  }
  func.func @transform_4(%arg0: i32, %arg1: i32) -> (i32, i32) {
    %c0_i32 = arith.constant 0 : i32
    %c0_i32_0 = arith.constant 0 : i32
    return %c0_i32, %arg1 : i32, i32
  }
  func.func @transform_5(%arg0: i32, %arg1: i32) -> (i32, i32) {
    %c0_i32 = arith.constant 0 : i32
    return %arg0, %arg1 : i32, i32
  }
}

module attributes {stable_mosaic.version = 11 : i64} {
  func.func @_fused_linear_kernel(%arg0: i32, %arg1: i32, %arg2: memref<32x128xf32, #tpu.memory_space<vmem>>, %arg3: memref<1x128xf32, #tpu.memory_space<vmem>>, %arg4: memref<1x128xf32, #tpu.memory_space<vmem>>, %arg5: memref<128x384xf32, #tpu.memory_space<vmem>>, %arg6: memref<1x384xf32, #tpu.memory_space<vmem>>, %arg7: memref<32x384xf32, #tpu.memory_space<vmem>>) attributes {dimension_semantics = [#tpu.dimension_semantics<parallel>, #tpu.dimension_semantics<parallel>], iteration_bounds = array<i64: 1, 1>, scalar_prefetch = 0 : i64, scratch_operands = 0 : i64, tpu.core_type = #tpu.core_type<tc>, window_params = [{transform_indices = @transform_0, window_bounds = array<i64: 32, 128>}, {pipeline_mode = #tpu.pipeline_mode<synchronous>, transform_indices = @transform_1, window_bounds = array<i64: 1, 128>}, {pipeline_mode = #tpu.pipeline_mode<synchronous>, transform_indices = @transform_2, window_bounds = array<i64: 1, 128>}, {transform_indices = @transform_3, window_bounds = array<i64: 128, 384>}, {transform_indices = @transform_4, window_bounds = array<i64: 1, 384>}, {transform_indices = @transform_5, window_bounds = array<i64: 32, 384>}]} {
    %c0 = arith.constant 0 : index
    %c0_0 = arith.constant 0 : index
    %0 = vector.load %arg2[%c0, %c0_0] : memref<32x128xf32, #tpu.memory_space<vmem>>, vector<32x128xf32>
    %cst = arith.constant dense<0.000000e+00> : vector<32xf32>
    %1 = vector.multi_reduction <add>, %0, %cst [1] : vector<32x128xf32> to vector<32xf32>
    %2 = vector.shape_cast %1 : vector<32xf32> to vector<32x1xf32>
    %cst_1 = arith.constant 1.280000e+02 : f32
    %3 = vector.broadcast %cst_1 : f32 to vector<32x1xf32>
    %4 = arith.divf %2, %3 : vector<32x1xf32>
    %5 = vector.broadcast %4 : vector<32x1xf32> to vector<32x128xf32>
    %6 = arith.subf %0, %5 : vector<32x128xf32>
    %7 = arith.mulf %6, %6 : vector<32x128xf32>
    %cst_2 = arith.constant dense<0.000000e+00> : vector<32xf32>
    %8 = vector.multi_reduction <add>, %7, %cst_2 [1] : vector<32x128xf32> to vector<32xf32>
    %9 = vector.shape_cast %8 : vector<32xf32> to vector<32x1xf32>
    %cst_3 = arith.constant 1.280000e+02 : f32
    %10 = vector.broadcast %cst_3 : f32 to vector<32x1xf32>
    %11 = arith.divf %9, %10 : vector<32x1xf32>
    %12 = vector.broadcast %4 : vector<32x1xf32> to vector<32x128xf32>
    %13 = arith.subf %0, %12 : vector<32x128xf32>
    %cst_4 = arith.constant 9.99999974E-6 : f32
    %14 = vector.broadcast %cst_4 : f32 to vector<32x1xf32>
    %15 = arith.addf %11, %14 : vector<32x1xf32>
    %16 = math.rsqrt %15 : vector<32x1xf32>
    %17 = vector.broadcast %16 : vector<32x1xf32> to vector<32x128xf32>
    %18 = arith.mulf %13, %17 : vector<32x128xf32>
    %c0_5 = arith.constant 0 : index
    %c0_6 = arith.constant 0 : index
    %19 = vector.load %arg3[%c0_5, %c0_6] : memref<1x128xf32, #tpu.memory_space<vmem>>, vector<1x128xf32>
    %20 = vector.broadcast %19 : vector<1x128xf32> to vector<32x128xf32>
    %21 = arith.mulf %18, %20 : vector<32x128xf32>
    %c0_7 = arith.constant 0 : index
    %c0_8 = arith.constant 0 : index
    %22 = vector.load %arg4[%c0_7, %c0_8] : memref<1x128xf32, #tpu.memory_space<vmem>>, vector<1x128xf32>
    %23 = vector.broadcast %22 : vector<1x128xf32> to vector<32x128xf32>
    %24 = arith.addf %21, %23 : vector<32x128xf32>
    %c0_9 = arith.constant 0 : index
    %c0_10 = arith.constant 0 : index
    %25 = vector.load %arg5[%c0_9, %c0_10] : memref<128x384xf32, #tpu.memory_space<vmem>>, vector<128x384xf32>
    %cst_11 = arith.constant dense<0.000000e+00> : vector<32x384xf32>
    %26 = tpu.matmul %24, %25, %cst_11 {dimension_numbers = #tpu.dot_dimension_numbers<[1], [0], [0], [1], [0, 0, 1, 1], [], []>} : vector<32x128xf32>, vector<128x384xf32>, vector<32x384xf32> -> vector<32x384xf32>
    %c0_12 = arith.constant 0 : index
    %c0_13 = arith.constant 0 : index
    %27 = vector.load %arg6[%c0_12, %c0_13] : memref<1x384xf32, #tpu.memory_space<vmem>>, vector<1x384xf32>
    %28 = vector.broadcast %27 : vector<1x384xf32> to vector<32x384xf32>
    %29 = arith.addf %26, %28 : vector<32x384xf32>
    %c0_14 = arith.constant 0 : index
    %c0_15 = arith.constant 0 : index
    %30 = vector.load %arg7[%c0_14, %c0_15] : memref<32x384xf32, #tpu.memory_space<vmem>>, vector<32x384xf32>
    tpu.vector_store %arg7[%c0_14, %c0_15], %29 {strides = array<i32>} : memref<32x384xf32, #tpu.memory_space<vmem>>, vector<32x384xf32>,
    return
  }
  func.func @transform_0(%arg0: i32, %arg1: i32) -> (i32, i32) {
    %c0_i32 = arith.constant 0 : i32
    %c0_i32_0 = arith.constant 0 : i32
    return %arg0, %c0_i32 : i32, i32
  }
  func.func @transform_1(%arg0: i32, %arg1: i32) -> (i32, i32) {
    %c0_i32 = arith.constant 0 : i32
    %c0_i32_0 = arith.constant 0 : i32
    %c0_i32_1 = arith.constant 0 : i32
    return %c0_i32, %c0_i32_0 : i32, i32
  }
  func.func @transform_2(%arg0: i32, %arg1: i32) -> (i32, i32) {
    %c0_i32 = arith.constant 0 : i32
    %c0_i32_0 = arith.constant 0 : i32
    %c0_i32_1 = arith.constant 0 : i32
    return %c0_i32, %c0_i32_0 : i32, i32
  }
  func.func @transform_3(%arg0: i32, %arg1: i32) -> (i32, i32) {
    %c0_i32 = arith.constant 0 : i32
    %c0_i32_0 = arith.constant 0 : i32
    return %c0_i32, %arg1 : i32, i32
  }
  func.func @transform_4(%arg0: i32, %arg1: i32) -> (i32, i32) {
    %c0_i32 = arith.constant 0 : i32
    %c0_i32_0 = arith.constant 0 : i32
    return %c0_i32, %arg1 : i32, i32
  }
  func.func @transform_5(%arg0: i32, %arg1: i32) -> (i32, i32) {
    %c0_i32 = arith.constant 0 : i32
    return %arg0, %arg1 : i32, i32
  }
}

module attributes {stable_mosaic.version = 11 : i64} {
  func.func @_fused_linear_kernel(%arg0: i32, %arg1: i32, %arg2: memref<32x128xf32, #tpu.memory_space<vmem>>, %arg3: memref<128x256xf32, #tpu.memory_space<vmem>>, %arg4: memref<1x256xf32, #tpu.memory_space<vmem>>, %arg5: memref<32x256xf32, #tpu.memory_space<vmem>>) attributes {dimension_semantics = [#tpu.dimension_semantics<parallel>, #tpu.dimension_semantics<parallel>], iteration_bounds = array<i64: 1, 1>, scalar_prefetch = 0 : i64, scratch_operands = 0 : i64, tpu.core_type = #tpu.core_type<tc>, window_params = [{transform_indices = @transform_0, window_bounds = array<i64: 32, 128>}, {transform_indices = @transform_1, window_bounds = array<i64: 128, 256>}, {transform_indices = @transform_2, window_bounds = array<i64: 1, 256>}, {transform_indices = @transform_3, window_bounds = array<i64: 32, 256>}]} {
    %c0 = arith.constant 0 : index
    %c0_0 = arith.constant 0 : index
    %0 = vector.load %arg2[%c0, %c0_0] : memref<32x128xf32, #tpu.memory_space<vmem>>, vector<32x128xf32>
    %c0_1 = arith.constant 0 : index
    %c0_2 = arith.constant 0 : index
    %1 = vector.load %arg3[%c0_1, %c0_2] : memref<128x256xf32, #tpu.memory_space<vmem>>, vector<128x256xf32>
    %cst = arith.constant dense<0.000000e+00> : vector<32x256xf32>
    %2 = tpu.matmul %0, %1, %cst {dimension_numbers = #tpu.dot_dimension_numbers<[1], [0], [0], [1], [0, 0, 1, 1], [], []>} : vector<32x128xf32>, vector<128x256xf32>, vector<32x256xf32> -> vector<32x256xf32>
    %c0_3 = arith.constant 0 : index
    %c0_4 = arith.constant 0 : index
    %3 = vector.load %arg4[%c0_3, %c0_4] : memref<1x256xf32, #tpu.memory_space<vmem>>, vector<1x256xf32>
    %4 = vector.broadcast %3 : vector<1x256xf32> to vector<32x256xf32>
    %5 = arith.addf %2, %4 : vector<32x256xf32>
    %c0_5 = arith.constant 0 : index
    %c0_6 = arith.constant 0 : index
    %6 = vector.load %arg5[%c0_5, %c0_6] : memref<32x256xf32, #tpu.memory_space<vmem>>, vector<32x256xf32>
    tpu.vector_store %arg5[%c0_5, %c0_6], %5 {strides = array<i32>} : memref<32x256xf32, #tpu.memory_space<vmem>>, vector<32x256xf32>,
    return
  }
  func.func @transform_0(%arg0: i32, %arg1: i32) -> (i32, i32) {
    %c0_i32 = arith.constant 0 : i32
    %c0_i32_0 = arith.constant 0 : i32
    return %arg0, %c0_i32 : i32, i32
  }
  func.func @transform_1(%arg0: i32, %arg1: i32) -> (i32, i32) {
    %c0_i32 = arith.constant 0 : i32
    %c0_i32_0 = arith.constant 0 : i32
    return %c0_i32, %arg1 : i32, i32
  }
  func.func @transform_2(%arg0: i32, %arg1: i32) -> (i32, i32) {
    %c0_i32 = arith.constant 0 : i32
    %c0_i32_0 = arith.constant 0 : i32
    return %c0_i32, %arg1 : i32, i32
  }
  func.func @transform_3(%arg0: i32, %arg1: i32) -> (i32, i32) {
    %c0_i32 = arith.constant 0 : i32
    return %arg0, %arg1 : i32, i32
  }
}

module attributes {stable_mosaic.version = 11 : i64} {
  func.func @_cross_attn_kernel(%arg0: i32, %arg1: memref<1x16x128xf32, #tpu.memory_space<vmem>>, %arg2: memref<1x16x256xf32, #tpu.memory_space<vmem>>, %arg3: memref<1x16x128xf32, #tpu.memory_space<vmem>>) attributes {dimension_semantics = [#tpu.dimension_semantics<parallel>], iteration_bounds = array<i64: 2>, scalar_prefetch = 0 : i64, scratch_operands = 0 : i64, tpu.core_type = #tpu.core_type<tc>, window_params = [{transform_indices = @transform_0, window_bounds = array<i64: 1, 16, 128>}, {transform_indices = @transform_1, window_bounds = array<i64: 1, 16, 256>}, {transform_indices = @transform_2, window_bounds = array<i64: 1, 16, 128>}]} {
    %c0 = arith.constant 0 : index
    %c0_0 = arith.constant 0 : index
    %c0_1 = arith.constant 0 : index
    %0 = vector.load %arg2[%c0, %c0_0, %c0_1] : memref<1x16x256xf32, #tpu.memory_space<vmem>>, vector<1x16x256xf32>
    %1 = vector.shape_cast %0 : vector<1x16x256xf32> to vector<16x256xf32>
    %c0_2 = arith.constant 0 : index
    %c0_3 = arith.constant 0 : index
    %c0_4 = arith.constant 0 : index
    %2 = vector.load %arg1[%c0_2, %c0_3, %c0_4] : memref<1x16x128xf32, #tpu.memory_space<vmem>>, vector<1x16x128xf32>
    %3 = vector.shape_cast %2 : vector<1x16x128xf32> to vector<16x128xf32>
    %4 = vector.extract_strided_slice %1 {offsets = [0, 0], sizes = [16, 128], strides = [1, 1]} : vector<16x256xf32> to vector<16x128xf32>
    %5 = vector.extract_strided_slice %1 {offsets = [0, 128], sizes = [16, 128], strides = [1, 1]} : vector<16x256xf32> to vector<16x128xf32>
    %6 = vector.extract_strided_slice %3 {offsets = [0, 0], sizes = [16, 32], strides = [1, 1]} : vector<16x128xf32> to vector<16x32xf32>
    %7 = vector.extract_strided_slice %4 {offsets = [0, 0], sizes = [16, 32], strides = [1, 1]} : vector<16x128xf32> to vector<16x32xf32>
    %8 = vector.extract_strided_slice %5 {offsets = [0, 0], sizes = [16, 32], strides = [1, 1]} : vector<16x128xf32> to vector<16x32xf32>
    %cst = arith.constant dense<0.000000e+00> : vector<16x16xf32>
    %9 = tpu.matmul %6, %7, %cst {dimension_numbers = #tpu.dot_dimension_numbers<[1], [1], [0], [0], [0, 0, 1, 0], [], []>} : vector<16x32xf32>, vector<16x32xf32>, vector<16x16xf32> -> vector<16x16xf32>
    %cst_5 = arith.constant dense<0xFF800000> : vector<16xf32>
    %10 = vector.multi_reduction <maximumf>, %9, %cst_5 [1] : vector<16x16xf32> to vector<16xf32>
    %11 = vector.shape_cast %10 : vector<16xf32> to vector<16x1xf32>
    %12 = vector.broadcast %11 : vector<16x1xf32> to vector<16x16xf32>
    %13 = arith.subf %9, %12 : vector<16x16xf32>
    %14 = math.exp %13 : vector<16x16xf32>
    %cst_6 = arith.constant dense<0.000000e+00> : vector<16xf32>
    %15 = vector.multi_reduction <add>, %14, %cst_6 [1] : vector<16x16xf32> to vector<16xf32>
    %16 = vector.shape_cast %15 : vector<16xf32> to vector<16x1xf32>
    %17 = vector.broadcast %16 : vector<16x1xf32> to vector<16x16xf32>
    %18 = arith.divf %14, %17 : vector<16x16xf32>
    %cst_7 = arith.constant dense<0.000000e+00> : vector<16x32xf32>
    %19 = tpu.matmul %18, %8, %cst_7 {dimension_numbers = #tpu.dot_dimension_numbers<[1], [0], [0], [1], [0, 0, 1, 1], [], []>} : vector<16x16xf32>, vector<16x32xf32>, vector<16x32xf32> -> vector<16x32xf32>
    %20 = vector.extract_strided_slice %3 {offsets = [0, 32], sizes = [16, 32], strides = [1, 1]} : vector<16x128xf32> to vector<16x32xf32>
    %21 = vector.extract_strided_slice %4 {offsets = [0, 32], sizes = [16, 32], strides = [1, 1]} : vector<16x128xf32> to vector<16x32xf32>
    %22 = vector.extract_strided_slice %5 {offsets = [0, 32], sizes = [16, 32], strides = [1, 1]} : vector<16x128xf32> to vector<16x32xf32>
    %cst_8 = arith.constant dense<0.000000e+00> : vector<16x16xf32>
    %23 = tpu.matmul %20, %21, %cst_8 {dimension_numbers = #tpu.dot_dimension_numbers<[1], [1], [0], [0], [0, 0, 1, 0], [], []>} : vector<16x32xf32>, vector<16x32xf32>, vector<16x16xf32> -> vector<16x16xf32>
    %cst_9 = arith.constant dense<0xFF800000> : vector<16xf32>
    %24 = vector.multi_reduction <maximumf>, %23, %cst_9 [1] : vector<16x16xf32> to vector<16xf32>
    %25 = vector.shape_cast %24 : vector<16xf32> to vector<16x1xf32>
    %26 = vector.broadcast %25 : vector<16x1xf32> to vector<16x16xf32>
    %27 = arith.subf %23, %26 : vector<16x16xf32>
    %28 = math.exp %27 : vector<16x16xf32>
    %cst_10 = arith.constant dense<0.000000e+00> : vector<16xf32>
    %29 = vector.multi_reduction <add>, %28, %cst_10 [1] : vector<16x16xf32> to vector<16xf32>
    %30 = vector.shape_cast %29 : vector<16xf32> to vector<16x1xf32>
    %31 = vector.broadcast %30 : vector<16x1xf32> to vector<16x16xf32>
    %32 = arith.divf %28, %31 : vector<16x16xf32>
    %cst_11 = arith.constant dense<0.000000e+00> : vector<16x32xf32>
    %33 = tpu.matmul %32, %22, %cst_11 {dimension_numbers = #tpu.dot_dimension_numbers<[1], [0], [0], [1], [0, 0, 1, 1], [], []>} : vector<16x16xf32>, vector<16x32xf32>, vector<16x32xf32> -> vector<16x32xf32>
    %34 = vector.extract_strided_slice %3 {offsets = [0, 64], sizes = [16, 32], strides = [1, 1]} : vector<16x128xf32> to vector<16x32xf32>
    %35 = vector.extract_strided_slice %4 {offsets = [0, 64], sizes = [16, 32], strides = [1, 1]} : vector<16x128xf32> to vector<16x32xf32>
    %36 = vector.extract_strided_slice %5 {offsets = [0, 64], sizes = [16, 32], strides = [1, 1]} : vector<16x128xf32> to vector<16x32xf32>
    %cst_12 = arith.constant dense<0.000000e+00> : vector<16x16xf32>
    %37 = tpu.matmul %34, %35, %cst_12 {dimension_numbers = #tpu.dot_dimension_numbers<[1], [1], [0], [0], [0, 0, 1, 0], [], []>} : vector<16x32xf32>, vector<16x32xf32>, vector<16x16xf32> -> vector<16x16xf32>
    %cst_13 = arith.constant dense<0xFF800000> : vector<16xf32>
    %38 = vector.multi_reduction <maximumf>, %37, %cst_13 [1] : vector<16x16xf32> to vector<16xf32>
    %39 = vector.shape_cast %38 : vector<16xf32> to vector<16x1xf32>
    %40 = vector.broadcast %39 : vector<16x1xf32> to vector<16x16xf32>
    %41 = arith.subf %37, %40 : vector<16x16xf32>
    %42 = math.exp %41 : vector<16x16xf32>
    %cst_14 = arith.constant dense<0.000000e+00> : vector<16xf32>
    %43 = vector.multi_reduction <add>, %42, %cst_14 [1] : vector<16x16xf32> to vector<16xf32>
    %44 = vector.shape_cast %43 : vector<16xf32> to vector<16x1xf32>
    %45 = vector.broadcast %44 : vector<16x1xf32> to vector<16x16xf32>
    %46 = arith.divf %42, %45 : vector<16x16xf32>
    %cst_15 = arith.constant dense<0.000000e+00> : vector<16x32xf32>
    %47 = tpu.matmul %46, %36, %cst_15 {dimension_numbers = #tpu.dot_dimension_numbers<[1], [0], [0], [1], [0, 0, 1, 1], [], []>} : vector<16x16xf32>, vector<16x32xf32>, vector<16x32xf32> -> vector<16x32xf32>
    %48 = vector.extract_strided_slice %3 {offsets = [0, 96], sizes = [16, 32], strides = [1, 1]} : vector<16x128xf32> to vector<16x32xf32>
    %49 = vector.extract_strided_slice %4 {offsets = [0, 96], sizes = [16, 32], strides = [1, 1]} : vector<16x128xf32> to vector<16x32xf32>
    %50 = vector.extract_strided_slice %5 {offsets = [0, 96], sizes = [16, 32], strides = [1, 1]} : vector<16x128xf32> to vector<16x32xf32>
    %cst_16 = arith.constant dense<0.000000e+00> : vector<16x16xf32>
    %51 = tpu.matmul %48, %49, %cst_16 {dimension_numbers = #tpu.dot_dimension_numbers<[1], [1], [0], [0], [0, 0, 1, 0], [], []>} : vector<16x32xf32>, vector<16x32xf32>, vector<16x16xf32> -> vector<16x16xf32>
    %cst_17 = arith.constant dense<0xFF800000> : vector<16xf32>
    %52 = vector.multi_reduction <maximumf>, %51, %cst_17 [1] : vector<16x16xf32> to vector<16xf32>
    %53 = vector.shape_cast %52 : vector<16xf32> to vector<16x1xf32>
    %54 = vector.broadcast %53 : vector<16x1xf32> to vector<16x16xf32>
    %55 = arith.subf %51, %54 : vector<16x16xf32>
    %56 = math.exp %55 : vector<16x16xf32>
    %cst_18 = arith.constant dense<0.000000e+00> : vector<16xf32>
    %57 = vector.multi_reduction <add>, %56, %cst_18 [1] : vector<16x16xf32> to vector<16xf32>
    %58 = vector.shape_cast %57 : vector<16xf32> to vector<16x1xf32>
    %59 = vector.broadcast %58 : vector<16x1xf32> to vector<16x16xf32>
    %60 = arith.divf %56, %59 : vector<16x16xf32>
    %cst_19 = arith.constant dense<0.000000e+00> : vector<16x32xf32>
    %61 = tpu.matmul %60, %50, %cst_19 {dimension_numbers = #tpu.dot_dimension_numbers<[1], [0], [0], [1], [0, 0, 1, 1], [], []>} : vector<16x16xf32>, vector<16x32xf32>, vector<16x32xf32> -> vector<16x32xf32>
    %62 = tpu.concatenate %19, %33, %47, %61 in 1 : vector<16x32xf32>, vector<16x32xf32>, vector<16x32xf32>, vector<16x32xf32> -> vector<16x128xf32>
    %c0_20 = arith.constant 0 : index
    %c0_21 = arith.constant 0 : index
    %c0_22 = arith.constant 0 : index
    %63 = vector.load %arg3[%c0_20, %c0_21, %c0_22] : memref<1x16x128xf32, #tpu.memory_space<vmem>>, vector<1x16x128xf32>
    %64 = vector.shape_cast %63 : vector<1x16x128xf32> to vector<16x128xf32>
    %65 = vector.shape_cast %62 : vector<16x128xf32> to vector<1x16x128xf32>
    tpu.vector_store %arg3[%c0_20, %c0_21, %c0_22], %65 {strides = array<i32>} : memref<1x16x128xf32, #tpu.memory_space<vmem>>, vector<1x16x128xf32>,
    return
  }
  func.func @transform_0(%arg0: i32) -> (i32, i32, i32) {
    %c0_i32 = arith.constant 0 : i32
    %c0_i32_0 = arith.constant 0 : i32
    %c0_i32_1 = arith.constant 0 : i32
    return %arg0, %c0_i32, %c0_i32_0 : i32, i32, i32
  }
  func.func @transform_1(%arg0: i32) -> (i32, i32, i32) {
    %c0_i32 = arith.constant 0 : i32
    %c0_i32_0 = arith.constant 0 : i32
    %c0_i32_1 = arith.constant 0 : i32
    return %arg0, %c0_i32, %c0_i32_0 : i32, i32, i32
  }
  func.func @transform_2(%arg0: i32) -> (i32, i32, i32) {
    %c0_i32 = arith.constant 0 : i32
    %c0_i32_0 = arith.constant 0 : i32
    %c0_i32_1 = arith.constant 0 : i32
    return %arg0, %c0_i32, %c0_i32_0 : i32, i32, i32
  }
}

module attributes {stable_mosaic.version = 11 : i64} {
  func.func @_fused_linear_kernel(%arg0: i32, %arg1: i32, %arg2: memref<32x512xf32, #tpu.memory_space<vmem>>, %arg3: memref<512x128xf32, #tpu.memory_space<vmem>>, %arg4: memref<1x128xf32, #tpu.memory_space<vmem>>, %arg5: memref<32x128xf32, #tpu.memory_space<vmem>>, %arg6: memref<32x128xf32, #tpu.memory_space<vmem>>) attributes {dimension_semantics = [#tpu.dimension_semantics<parallel>, #tpu.dimension_semantics<parallel>], iteration_bounds = array<i64: 1, 1>, scalar_prefetch = 0 : i64, scratch_operands = 0 : i64, tpu.core_type = #tpu.core_type<tc>, window_params = [{transform_indices = @transform_0, window_bounds = array<i64: 32, 512>}, {transform_indices = @transform_1, window_bounds = array<i64: 512, 128>}, {transform_indices = @transform_2, window_bounds = array<i64: 1, 128>}, {transform_indices = @transform_3, window_bounds = array<i64: 32, 128>}, {transform_indices = @transform_4, window_bounds = array<i64: 32, 128>}]} {
    %c0 = arith.constant 0 : index
    %c0_0 = arith.constant 0 : index
    %0 = vector.load %arg2[%c0, %c0_0] : memref<32x512xf32, #tpu.memory_space<vmem>>, vector<32x512xf32>
    %c0_1 = arith.constant 0 : index
    %c0_2 = arith.constant 0 : index
    %1 = vector.load %arg3[%c0_1, %c0_2] : memref<512x128xf32, #tpu.memory_space<vmem>>, vector<512x128xf32>
    %cst = arith.constant dense<0.000000e+00> : vector<32x128xf32>
    %2 = tpu.matmul %0, %1, %cst {dimension_numbers = #tpu.dot_dimension_numbers<[1], [0], [0], [1], [0, 0, 1, 1], [], []>} : vector<32x512xf32>, vector<512x128xf32>, vector<32x128xf32> -> vector<32x128xf32>
    %c0_3 = arith.constant 0 : index
    %c0_4 = arith.constant 0 : index
    %3 = vector.load %arg4[%c0_3, %c0_4] : memref<1x128xf32, #tpu.memory_space<vmem>>, vector<1x128xf32>
    %4 = vector.broadcast %3 : vector<1x128xf32> to vector<32x128xf32>
    %5 = arith.addf %2, %4 : vector<32x128xf32>
    %c0_5 = arith.constant 0 : index
    %c0_6 = arith.constant 0 : index
    %6 = vector.load %arg5[%c0_5, %c0_6] : memref<32x128xf32, #tpu.memory_space<vmem>>, vector<32x128xf32>
    %7 = arith.addf %5, %6 : vector<32x128xf32>
    %c0_7 = arith.constant 0 : index
    %c0_8 = arith.constant 0 : index
    %8 = vector.load %arg6[%c0_7, %c0_8] : memref<32x128xf32, #tpu.memory_space<vmem>>, vector<32x128xf32>
    tpu.vector_store %arg6[%c0_7, %c0_8], %7 {strides = array<i32>} : memref<32x128xf32, #tpu.memory_space<vmem>>, vector<32x128xf32>,
    return
  }
  func.func @transform_0(%arg0: i32, %arg1: i32) -> (i32, i32) {
    %c0_i32 = arith.constant 0 : i32
    %c0_i32_0 = arith.constant 0 : i32
    return %arg0, %c0_i32 : i32, i32
  }
  func.func @transform_1(%arg0: i32, %arg1: i32) -> (i32, i32) {
    %c0_i32 = arith.constant 0 : i32
    %c0_i32_0 = arith.constant 0 : i32
    return %c0_i32, %arg1 : i32, i32
  }
  func.func @transform_2(%arg0: i32, %arg1: i32) -> (i32, i32) {
    %c0_i32 = arith.constant 0 : i32
    %c0_i32_0 = arith.constant 0 : i32
    return %c0_i32, %arg1 : i32, i32
  }
  func.func @transform_3(%arg0: i32, %arg1: i32) -> (i32, i32) {
    %c0_i32 = arith.constant 0 : i32
    return %arg0, %arg1 : i32, i32
  }
  func.func @transform_4(%arg0: i32, %arg1: i32) -> (i32, i32) {
    %c0_i32 = arith.constant 0 : i32
    return %arg0, %arg1 : i32, i32
  }
}

module attributes {stable_mosaic.version = 11 : i64} {
  func.func @_fused_linear_kernel(%arg0: i32, %arg1: i32, %arg2: memref<32x128xf32, #tpu.memory_space<vmem>>, %arg3: memref<1x128xf32, #tpu.memory_space<vmem>>, %arg4: memref<1x128xf32, #tpu.memory_space<vmem>>, %arg5: memref<128x512xf32, #tpu.memory_space<vmem>>, %arg6: memref<1x512xf32, #tpu.memory_space<vmem>>, %arg7: memref<32x512xf32, #tpu.memory_space<vmem>>) attributes {dimension_semantics = [#tpu.dimension_semantics<parallel>, #tpu.dimension_semantics<parallel>], iteration_bounds = array<i64: 1, 1>, scalar_prefetch = 0 : i64, scratch_operands = 0 : i64, tpu.core_type = #tpu.core_type<tc>, window_params = [{transform_indices = @transform_0, window_bounds = array<i64: 32, 128>}, {pipeline_mode = #tpu.pipeline_mode<synchronous>, transform_indices = @transform_1, window_bounds = array<i64: 1, 128>}, {pipeline_mode = #tpu.pipeline_mode<synchronous>, transform_indices = @transform_2, window_bounds = array<i64: 1, 128>}, {transform_indices = @transform_3, window_bounds = array<i64: 128, 512>}, {transform_indices = @transform_4, window_bounds = array<i64: 1, 512>}, {transform_indices = @transform_5, window_bounds = array<i64: 32, 512>}]} {
    %c0 = arith.constant 0 : index
    %c0_0 = arith.constant 0 : index
    %0 = vector.load %arg2[%c0, %c0_0] : memref<32x128xf32, #tpu.memory_space<vmem>>, vector<32x128xf32>
    %cst = arith.constant dense<0.000000e+00> : vector<32xf32>
    %1 = vector.multi_reduction <add>, %0, %cst [1] : vector<32x128xf32> to vector<32xf32>
    %2 = vector.shape_cast %1 : vector<32xf32> to vector<32x1xf32>
    %cst_1 = arith.constant 1.280000e+02 : f32
    %3 = vector.broadcast %cst_1 : f32 to vector<32x1xf32>
    %4 = arith.divf %2, %3 : vector<32x1xf32>
    %5 = vector.broadcast %4 : vector<32x1xf32> to vector<32x128xf32>
    %6 = arith.subf %0, %5 : vector<32x128xf32>
    %7 = arith.mulf %6, %6 : vector<32x128xf32>
    %cst_2 = arith.constant dense<0.000000e+00> : vector<32xf32>
    %8 = vector.multi_reduction <add>, %7, %cst_2 [1] : vector<32x128xf32> to vector<32xf32>
    %9 = vector.shape_cast %8 : vector<32xf32> to vector<32x1xf32>
    %cst_3 = arith.constant 1.280000e+02 : f32
    %10 = vector.broadcast %cst_3 : f32 to vector<32x1xf32>
    %11 = arith.divf %9, %10 : vector<32x1xf32>
    %12 = vector.broadcast %4 : vector<32x1xf32> to vector<32x128xf32>
    %13 = arith.subf %0, %12 : vector<32x128xf32>
    %cst_4 = arith.constant 9.99999974E-6 : f32
    %14 = vector.broadcast %cst_4 : f32 to vector<32x1xf32>
    %15 = arith.addf %11, %14 : vector<32x1xf32>
    %16 = math.rsqrt %15 : vector<32x1xf32>
    %17 = vector.broadcast %16 : vector<32x1xf32> to vector<32x128xf32>
    %18 = arith.mulf %13, %17 : vector<32x128xf32>
    %c0_5 = arith.constant 0 : index
    %c0_6 = arith.constant 0 : index
    %19 = vector.load %arg3[%c0_5, %c0_6] : memref<1x128xf32, #tpu.memory_space<vmem>>, vector<1x128xf32>
    %20 = vector.broadcast %19 : vector<1x128xf32> to vector<32x128xf32>
    %21 = arith.mulf %18, %20 : vector<32x128xf32>
    %c0_7 = arith.constant 0 : index
    %c0_8 = arith.constant 0 : index
    %22 = vector.load %arg4[%c0_7, %c0_8] : memref<1x128xf32, #tpu.memory_space<vmem>>, vector<1x128xf32>
    %23 = vector.broadcast %22 : vector<1x128xf32> to vector<32x128xf32>
    %24 = arith.addf %21, %23 : vector<32x128xf32>
    %c0_9 = arith.constant 0 : index
    %c0_10 = arith.constant 0 : index
    %25 = vector.load %arg5[%c0_9, %c0_10] : memref<128x512xf32, #tpu.memory_space<vmem>>, vector<128x512xf32>
    %cst_11 = arith.constant dense<0.000000e+00> : vector<32x512xf32>
    %26 = tpu.matmul %24, %25, %cst_11 {dimension_numbers = #tpu.dot_dimension_numbers<[1], [0], [0], [1], [0, 0, 1, 1], [], []>} : vector<32x128xf32>, vector<128x512xf32>, vector<32x512xf32> -> vector<32x512xf32>
    %c0_12 = arith.constant 0 : index
    %c0_13 = arith.constant 0 : index
    %27 = vector.load %arg6[%c0_12, %c0_13] : memref<1x512xf32, #tpu.memory_space<vmem>>, vector<1x512xf32>
    %28 = vector.broadcast %27 : vector<1x512xf32> to vector<32x512xf32>
    %29 = arith.addf %26, %28 : vector<32x512xf32>
    %cst_14 = arith.constant 5.000000e-01 : f32
    %30 = vector.broadcast %cst_14 : f32 to vector<32x512xf32>
    %31 = arith.mulf %30, %29 : vector<32x512xf32>
    %cst_15 = arith.constant 0.707106769 : f32
    %32 = vector.broadcast %cst_15 : f32 to vector<32x512xf32>
    %33 = arith.mulf %29, %32 : vector<32x512xf32>
    %34 = math.erf %33 : vector<32x512xf32>
    %cst_16 = arith.constant 1.000000e+00 : f32
    %35 = vector.broadcast %cst_16 : f32 to vector<32x512xf32>
    %36 = arith.addf %35, %34 : vector<32x512xf32>
    %37 = arith.mulf %31, %36 : vector<32x512xf32>
    %c0_17 = arith.constant 0 : index
    %c0_18 = arith.constant 0 : index
    %38 = vector.load %arg7[%c0_17, %c0_18] : memref<32x512xf32, #tpu.memory_space<vmem>>, vector<32x512xf32>
    tpu.vector_store %arg7[%c0_17, %c0_18], %37 {strides = array<i32>} : memref<32x512xf32, #tpu.memory_space<vmem>>, vector<32x512xf32>,
    return
  }
  func.func @transform_0(%arg0: i32, %arg1: i32) -> (i32, i32) {
    %c0_i32 = arith.constant 0 : i32
    %c0_i32_0 = arith.constant 0 : i32
    return %arg0, %c0_i32 : i32, i32
  }
  func.func @transform_1(%arg0: i32, %arg1: i32) -> (i32, i32) {
    %c0_i32 = arith.constant 0 : i32
    %c0_i32_0 = arith.constant 0 : i32
    %c0_i32_1 = arith.constant 0 : i32
    return %c0_i32, %c0_i32_0 : i32, i32
  }
  func.func @transform_2(%arg0: i32, %arg1: i32) -> (i32, i32) {
    %c0_i32 = arith.constant 0 : i32
    %c0_i32_0 = arith.constant 0 : i32
    %c0_i32_1 = arith.constant 0 : i32
    return %c0_i32, %c0_i32_0 : i32, i32
  }
  func.func @transform_3(%arg0: i32, %arg1: i32) -> (i32, i32) {
    %c0_i32 = arith.constant 0 : i32
    %c0_i32_0 = arith.constant 0 : i32
    return %c0_i32, %arg1 : i32, i32
  }
  func.func @transform_4(%arg0: i32, %arg1: i32) -> (i32, i32) {
    %c0_i32 = arith.constant 0 : i32
    %c0_i32_0 = arith.constant 0 : i32
    return %c0_i32, %arg1 : i32, i32
  }
  func.func @transform_5(%arg0: i32, %arg1: i32) -> (i32, i32) {
    %c0_i32 = arith.constant 0 : i32
    return %arg0, %arg1 : i32, i32
  }
}

module attributes {stable_mosaic.version = 11 : i64} {
  func.func @_fused_linear_kernel(%arg0: i32, %arg1: i32, %arg2: memref<32x128xf32, #tpu.memory_space<vmem>>, %arg3: memref<1x128xf32, #tpu.memory_space<vmem>>, %arg4: memref<1x128xf32, #tpu.memory_space<vmem>>, %arg5: memref<128x256xf32, #tpu.memory_space<vmem>>, %arg6: memref<32x256xf32, #tpu.memory_space<vmem>>) attributes {dimension_semantics = [#tpu.dimension_semantics<parallel>, #tpu.dimension_semantics<parallel>], iteration_bounds = array<i64: 1, 2>, scalar_prefetch = 0 : i64, scratch_operands = 0 : i64, tpu.core_type = #tpu.core_type<tc>, window_params = [{transform_indices = @transform_0, window_bounds = array<i64: 32, 128>}, {pipeline_mode = #tpu.pipeline_mode<synchronous>, transform_indices = @transform_1, window_bounds = array<i64: 1, 128>}, {pipeline_mode = #tpu.pipeline_mode<synchronous>, transform_indices = @transform_2, window_bounds = array<i64: 1, 128>}, {transform_indices = @transform_3, window_bounds = array<i64: 128, 256>}, {transform_indices = @transform_4, window_bounds = array<i64: 32, 256>}]} {
    %c0 = arith.constant 0 : index
    %c0_0 = arith.constant 0 : index
    %0 = vector.load %arg2[%c0, %c0_0] : memref<32x128xf32, #tpu.memory_space<vmem>>, vector<32x128xf32>
    %cst = arith.constant dense<0.000000e+00> : vector<32xf32>
    %1 = vector.multi_reduction <add>, %0, %cst [1] : vector<32x128xf32> to vector<32xf32>
    %2 = vector.shape_cast %1 : vector<32xf32> to vector<32x1xf32>
    %cst_1 = arith.constant 1.280000e+02 : f32
    %3 = vector.broadcast %cst_1 : f32 to vector<32x1xf32>
    %4 = arith.divf %2, %3 : vector<32x1xf32>
    %5 = vector.broadcast %4 : vector<32x1xf32> to vector<32x128xf32>
    %6 = arith.subf %0, %5 : vector<32x128xf32>
    %7 = arith.mulf %6, %6 : vector<32x128xf32>
    %cst_2 = arith.constant dense<0.000000e+00> : vector<32xf32>
    %8 = vector.multi_reduction <add>, %7, %cst_2 [1] : vector<32x128xf32> to vector<32xf32>
    %9 = vector.shape_cast %8 : vector<32xf32> to vector<32x1xf32>
    %cst_3 = arith.constant 1.280000e+02 : f32
    %10 = vector.broadcast %cst_3 : f32 to vector<32x1xf32>
    %11 = arith.divf %9, %10 : vector<32x1xf32>
    %12 = vector.broadcast %4 : vector<32x1xf32> to vector<32x128xf32>
    %13 = arith.subf %0, %12 : vector<32x128xf32>
    %cst_4 = arith.constant 9.99999974E-6 : f32
    %14 = vector.broadcast %cst_4 : f32 to vector<32x1xf32>
    %15 = arith.addf %11, %14 : vector<32x1xf32>
    %16 = math.rsqrt %15 : vector<32x1xf32>
    %17 = vector.broadcast %16 : vector<32x1xf32> to vector<32x128xf32>
    %18 = arith.mulf %13, %17 : vector<32x128xf32>
    %c0_5 = arith.constant 0 : index
    %c0_6 = arith.constant 0 : index
    %19 = vector.load %arg3[%c0_5, %c0_6] : memref<1x128xf32, #tpu.memory_space<vmem>>, vector<1x128xf32>
    %20 = vector.broadcast %19 : vector<1x128xf32> to vector<32x128xf32>
    %21 = arith.mulf %18, %20 : vector<32x128xf32>
    %c0_7 = arith.constant 0 : index
    %c0_8 = arith.constant 0 : index
    %22 = vector.load %arg4[%c0_7, %c0_8] : memref<1x128xf32, #tpu.memory_space<vmem>>, vector<1x128xf32>
    %23 = vector.broadcast %22 : vector<1x128xf32> to vector<32x128xf32>
    %24 = arith.addf %21, %23 : vector<32x128xf32>
    %c0_9 = arith.constant 0 : index
    %c0_10 = arith.constant 0 : index
    %25 = vector.load %arg5[%c0_9, %c0_10] : memref<128x256xf32, #tpu.memory_space<vmem>>, vector<128x256xf32>
    %cst_11 = arith.constant dense<0.000000e+00> : vector<32x256xf32>
    %26 = tpu.matmul %24, %25, %cst_11 {dimension_numbers = #tpu.dot_dimension_numbers<[1], [0], [0], [1], [0, 0, 1, 1], [], []>} : vector<32x128xf32>, vector<128x256xf32>, vector<32x256xf32> -> vector<32x256xf32>
    %c0_12 = arith.constant 0 : index
    %c0_13 = arith.constant 0 : index
    %27 = vector.load %arg6[%c0_12, %c0_13] : memref<32x256xf32, #tpu.memory_space<vmem>>, vector<32x256xf32>
    tpu.vector_store %arg6[%c0_12, %c0_13], %26 {strides = array<i32>} : memref<32x256xf32, #tpu.memory_space<vmem>>, vector<32x256xf32>,
    return
  }
  func.func @transform_0(%arg0: i32, %arg1: i32) -> (i32, i32) {
    %c0_i32 = arith.constant 0 : i32
    %c0_i32_0 = arith.constant 0 : i32
    return %arg0, %c0_i32 : i32, i32
  }
  func.func @transform_1(%arg0: i32, %arg1: i32) -> (i32, i32) {
    %c0_i32 = arith.constant 0 : i32
    %c0_i32_0 = arith.constant 0 : i32
    %c0_i32_1 = arith.constant 0 : i32
    return %c0_i32, %c0_i32_0 : i32, i32
  }
  func.func @transform_2(%arg0: i32, %arg1: i32) -> (i32, i32) {
    %c0_i32 = arith.constant 0 : i32
    %c0_i32_0 = arith.constant 0 : i32
    %c0_i32_1 = arith.constant 0 : i32
    return %c0_i32, %c0_i32_0 : i32, i32
  }
  func.func @transform_3(%arg0: i32, %arg1: i32) -> (i32, i32) {
    %c0_i32 = arith.constant 0 : i32
    %c0_i32_0 = arith.constant 0 : i32
    return %c0_i32, %arg1 : i32, i32
  }
  func.func @transform_4(%arg0: i32, %arg1: i32) -> (i32, i32) {
    %c0_i32 = arith.constant 0 : i32
    return %arg0, %arg1 : i32, i32
  }
}

</mosaic_0001>

<bundles_post_ra>
// kernel: soft_text_decoder_forward.21
= control target key start
LH: loop header
LB: loop body
LE: loop exit
PB: predicated region body
PF: predicated region fallthrough
CT: control target
= control target key end

     0   :  { %s364_s1 = inlined_call_operand.vmem [shape: f32[128,128], index: 1, kind: input, shape index: {}]   ;;  %s365_s0 = inlined_call_operand.vmem [shape: f32[32,128], index: 0, kind: input, shape index: {}]   ;;  %s366_s2 = inlined_call_operand.vmem [shape: f32[1,128], index: 2, kind: input, shape index: {}]   ;;  %s367_s3 = inlined_call_operand.vmem [shape: f32[32,128], index: 3, kind: input, shape index: {}]   ;;  %s368_s4 = inlined_call_operand.vmem [shape: f32[32,128], index: 4, kind: output, shape index: {}]  }
   0x1   :  { %v21_v0 = vld [vmem:[%s364_s1] sm:$0xff]  ;;  %v22_v1 = vld [vmem:[%s364_s1 + $0x8] sm:$0xff]  ;;  %v23_v2 = vld [vmem:[%s364_s1 + $0x10] sm:$0xff] }
   0x2   :  { %v204_v3 = vpack.c.bf16 %v22_v1, %v21_v0  ;;  %v24_v4 = vld [vmem:[%s364_s1 + $0x18] sm:$0xff]  ;;  %v25_v6 = vld [vmem:[%s364_s1 + $0x20] sm:$0xff]  ;;  %v26_v7 = vld [vmem:[%s364_s1 + $0x28] sm:$0xff] }
   0x3   :  { %v208_v5 = vpack.c.bf16 %v24_v4, %v23_v2  ;;  %v212_v8 = vpack.c.bf16 %v26_v7, %v25_v6  ;;  %v17_v9 = vld [vmem:[%s365_s0] sm:$0xff]  ;;  %v19_v10 = vld [vmem:[%s365_s0 + $0x10] sm:$0xff]  ;;  %v28_v12 = vld [vmem:[%s364_s1 + $0x38] sm:$0xff] }
   0x4   :  { %205 = vmatprep.subr.bf16.mxu0 %v204_v3  ;;  %236 = vmatprep.subr.bf16.mxu1 %v204_v3  ;;  %v27_v11 = vld [vmem:[%s364_s1 + $0x30] sm:$0xff]  ;;  %v29_v14 = vld [vmem:[%s364_s1 + $0x40] sm:$0xff]  ;;  %v30_v15 = vld [vmem:[%s364_s1 + $0x48] sm:$0xff] }
   0x5   :  { %207 = vmatpush3.bf16.msra.mxu0 %v204_v3  ;;  %244 = vmatpush3.bf16.msra.mxu1 %v204_v3  ;;  %v216_v13 = vpack.c.bf16 %v28_v12, %v27_v11  ;;  %v220_v16 = vpack.c.bf16 %v30_v15, %v29_v14  ;;  %v31_v17 = vld [vmem:[%s364_s1 + $0x50] sm:$0xff]  ;;  %v32_v18 = vld [vmem:[%s364_s1 + $0x58] sm:$0xff]  ;;  %v33_v20 = vld [vmem:[%s364_s1 + $0x60] sm:$0xff] }
   0x6   :  { %209 = vmatprep.subr.bf16.mxu0 %v208_v5  ;;  %237 = vmatprep.subr.bf16.mxu1 %v208_v5  ;;  %v224_v19 = vpack.c.bf16 %v32_v18, %v31_v17  ;;  %v34_v21 = vld [vmem:[%s364_s1 + $0x68] sm:$0xff]  ;;  %v35_v23 = vld [vmem:[%s364_s1 + $0x70] sm:$0xff]  ;;  %v36_v24 = vld [vmem:[%s364_s1 + $0x78] sm:$0xff] }
   0x7   :  { %198 = vmatprep.mubr.f32.mxu0 %v17_v9  ;;  %201 = vmatprep.mubr.f32.mxu1 %v19_v10  ;;  %v228_v22 = vpack.c.bf16 %v34_v21, %v33_v20  ;;  %v232_v25 = vpack.c.bf16 %v36_v24, %v35_v23  ;;  %v18_v26 = vld [vmem:[%s365_s0 + $0x8] sm:$0xff]  ;;  %v20_v27 = vld [vmem:[%s365_s0 + $0x18] sm:$0xff]  ;;  %v145_v28 = vld [vmem:[%s366_s2] ss:$0 sm:$0xff] }
   0x8   :  { %v130_v30 = vld [vmem:[%s367_s3 + $0x8] sm:$0xff]  ;;  %v132_v32 = vld [vmem:[%s367_s3 + $0x18] sm:$0xff]  ;;  %v129_v36 = vld [vmem:[%s367_s3] sm:$0xff] }
   0x9   :  { %211 = vmatpush3.bf16.msra.mxu0 %v208_v5  ;;  %245 = vmatpush3.bf16.msra.mxu1 %v208_v5  ;;  %v131_v38 = vld [vmem:[%s367_s3 + $0x10] sm:$0xff] }
   0xa   :  { %213 = vmatprep.subr.bf16.mxu0 %v212_v8  ;;  %238 = vmatprep.subr.bf16.mxu1 %v212_v8 }
   0xd   :  { %215 = vmatpush3.bf16.msra.mxu0 %v212_v8  ;;  %246 = vmatpush3.bf16.msra.mxu1 %v212_v8 }
   0xe   :  { %217 = vmatprep.subr.bf16.mxu0 %v216_v13  ;;  %239 = vmatprep.subr.bf16.mxu1 %v216_v13 }
  0x11   :  { %219 = vmatpush3.bf16.msra.mxu0 %v216_v13  ;;  %247 = vmatpush3.bf16.msra.mxu1 %v216_v13 }
  0x12   :  { %221 = vmatprep.subr.bf16.mxu0 %v220_v16  ;;  %240 = vmatprep.subr.bf16.mxu1 %v220_v16 }
  0x15   :  { %223 = vmatpush3.bf16.msra.mxu0 %v220_v16  ;;  %248 = vmatpush3.bf16.msra.mxu1 %v220_v16 }
  0x16   :  { %225 = vmatprep.subr.bf16.mxu0 %v224_v19  ;;  %241 = vmatprep.subr.bf16.mxu1 %v224_v19 }
  0x19   :  { %227 = vmatpush3.bf16.msra.mxu0 %v224_v19  ;;  %249 = vmatpush3.bf16.msra.mxu1 %v224_v19 }
  0x1a   :  { %229 = vmatprep.subr.bf16.mxu0 %v228_v22  ;;  %242 = vmatprep.subr.bf16.mxu1 %v228_v22 }
  0x1d   :  { %231 = vmatpush3.bf16.msra.mxu0 %v228_v22  ;;  %250 = vmatpush3.bf16.msra.mxu1 %v228_v22 }
  0x1e   :  { %233 = vmatprep.subr.bf16.mxu0 %v232_v25  ;;  %243 = vmatprep.subr.bf16.mxu1 %v232_v25 }
  0x21   :  { %235 = vmatpush3.bf16.msra.mxu0 %v232_v25  ;;  %251 = vmatpush3.bf16.msra.mxu1 %v232_v25 }
  0x24   :  { %199 = vmatmul.mubr.f32.vlgmr.msra.gmra.mrb[0].mxu0 %v18_v26  ;;  %202 = vmatmul.mubr.f32.vlgmr.msra.gmra.mrb[0].mxu1 %v20_v27 }
  0xf7   :  { %v200_v29 = vpop.f32.mrb[0].mxu0  ;;  %v203_v31 = vpop.f32.mrb[0].mxu1 }
  0xf8   :  { %v116_v33 = vadd.f32 %v200_v29, %v145_v28  ;;  %v126_v34 = vadd.f32 %v203_v31, %v145_v28  ;;  %v110_v35 = vpop.f32.mrb[1].mxu0  ;;  %v120_v37 = vpop.f32.mrb[1].mxu1 }
  0xf9   :  { %v111_v39 = vadd.f32 %v145_v28, %v110_v35  ;;  %v121_v40 = vadd.f32 %v145_v28, %v120_v37 }
  0xfa   :  { %v134_v41 = vadd.f32 %v130_v30, %v116_v33  ;;  %v136_v42 = vadd.f32 %v132_v32, %v126_v34 }
  0xfb   :  { %v133_v43 = vadd.f32 %v129_v36, %v111_v39  ;;  %v135_v44 = vadd.f32 %v131_v38, %v121_v40 }
  0xfc   :  { %138 = vst [vmem:[%s368_s4 + $0x8] sm:$0xff] %v134_v41  ;;  %140 = vst [vmem:[%s368_s4 + $0x18] sm:$0xff] %v136_v42 }
  0xfd   :  { %137 = vst [vmem:[%s368_s4] sm:$0xff] %v133_v43  ;;  %139 = vst [vmem:[%s368_s4 + $0x10] sm:$0xff] %v135_v44 }

// kernel: soft_text_decoder_forward.22
= control target key start
LH: loop header
LB: loop body
LE: loop exit
PB: predicated region body
PF: predicated region fallthrough
CT: control target
= control target key end

     0   :  { %s455_s0 = inlined_call_operand.vmem [shape: f32[32,128], index: 0, kind: input, shape index: {}]   ;;  %s456_s3 = inlined_call_operand.vmem [shape: f32[128,128], index: 3, kind: input, shape index: {}]   ;;  %s457_s1 = inlined_call_operand.vmem [shape: f32[1,128], index: 1, kind: input, shape index: {}]   ;;  %s458_s2 = inlined_call_operand.vmem [shape: f32[1,128], index: 2, kind: input, shape index: {}]   ;;  %s459_s4 = inlined_call_operand.vmem [shape: f32[1,128], index: 4, kind: input, shape index: {}]   ;;  %s460_s5 = inlined_call_operand.vmem [shape: f32[32,128], index: 5, kind: output, shape index: {}]  }
   0x1   :  { %v20_v0 = vld [vmem:[%s455_s0] sm:$0xff]  ;;  %v21_v1 = vld [vmem:[%s455_s0 + $0x8] sm:$0xff]  ;;  %v22_v2 = vld [vmem:[%s455_s0 + $0x10] sm:$0xff] }
   0x2   :  { %24 = vadd.xlane.f32.xlu0 %v20_v0  ;;  %26 = vadd.xlane.f32.xlu1 %v21_v1  ;;  %v23_v3 = vld [vmem:[%s455_s0 + $0x18] sm:$0xff]  ;;  %v91_v4 = vld [vmem:[%s456_s3] sm:$0xff]  ;;  %v92_v5 = vld [vmem:[%s456_s3 + $0x8] sm:$0xff] }
   0x3   :  { %v93_v6 = vld [vmem:[%s456_s3 + $0x10] sm:$0xff]  ;;  %v268_v7 = vpack.c.bf16 %v92_v5, %v91_v4  ;;  %v94_v8 = vld [vmem:[%s456_s3 + $0x18] sm:$0xff]  ;;  %v95_v26 = vld [vmem:[%s456_s3 + $0x20] sm:$0xff] }
   0x4   :  { %v272_v9 = vpack.c.bf16 %v94_v8, %v93_v6  ;;  %v96_v27 = vld [vmem:[%s456_s3 + $0x28] sm:$0xff]  ;;  %v97_v29 = vld [vmem:[%s456_s3 + $0x30] sm:$0xff]  ;;  %v98_v30 = vld [vmem:[%s456_s3 + $0x38] sm:$0xff] }
   0x5   :  { %269 = vmatprep.subr.bf16.mxu0 %v268_v7  ;;  %300 = vmatprep.subr.bf16.mxu1 %v268_v7  ;;  %v276_v28 = vpack.c.bf16 %v96_v27, %v95_v26  ;;  %v280_v31 = vpack.c.bf16 %v98_v30, %v97_v29  ;;  %v99_v32 = vld [vmem:[%s456_s3 + $0x40] sm:$0xff]  ;;  %v100_v33 = vld [vmem:[%s456_s3 + $0x48] sm:$0xff]  ;;  %v101_v35 = vld [vmem:[%s456_s3 + $0x50] sm:$0xff] }
   0x6   :  { %28 = vadd.xlane.f32.xlu0 %v22_v2  ;;  %30 = vadd.xlane.f32.xlu1 %v23_v3  ;;  %v284_v34 = vpack.c.bf16 %v100_v33, %v99_v32  ;;  %v102_v36 = vld [vmem:[%s456_s3 + $0x58] sm:$0xff]  ;;  %v103_v38 = vld [vmem:[%s456_s3 + $0x60] sm:$0xff]  ;;  %v104_v39 = vld [vmem:[%s456_s3 + $0x68] sm:$0xff] }
   0x7   :  { %271 = vmatpush3.bf16.msra.mxu0 %v268_v7  ;;  %308 = vmatpush3.bf16.msra.mxu1 %v268_v7  ;;  %v288_v37 = vpack.c.bf16 %v102_v36, %v101_v35  ;;  %v292_v40 = vpack.c.bf16 %v104_v39, %v103_v38  ;;  %v105_v41 = vld [vmem:[%s456_s3 + $0x70] sm:$0xff]  ;;  %v106_v42 = vld [vmem:[%s456_s3 + $0x78] sm:$0xff]  ;;  %v207_v57 = vld [vmem:[%s457_s1] ss:$0 sm:$0xff] }
   0x8   :  { %273 = vmatprep.subr.bf16.mxu0 %v272_v9  ;;  %301 = vmatprep.subr.bf16.mxu1 %v272_v9  ;;  %v296_v43 = vpack.c.bf16 %v106_v42, %v105_v41  ;;  %v208_v59 = vld [vmem:[%s458_s2] ss:$0 sm:$0xff] }
   0xb   :  { %275 = vmatpush3.bf16.msra.mxu0 %v272_v9  ;;  %309 = vmatpush3.bf16.msra.mxu1 %v272_v9 }
   0xc   :  { %277 = vmatprep.subr.bf16.mxu0 %v276_v28  ;;  %302 = vmatprep.subr.bf16.mxu1 %v276_v28 }
   0xf   :  { %279 = vmatpush3.bf16.msra.mxu0 %v276_v28  ;;  %310 = vmatpush3.bf16.msra.mxu1 %v276_v28 }
  0x10   :  { %281 = vmatprep.subr.bf16.mxu0 %v280_v31  ;;  %303 = vmatprep.subr.bf16.mxu1 %v280_v31 }
  0x13   :  { %283 = vmatpush3.bf16.msra.mxu0 %v280_v31  ;;  %311 = vmatpush3.bf16.msra.mxu1 %v280_v31 }
  0x14   :  { %285 = vmatprep.subr.bf16.mxu0 %v284_v34  ;;  %304 = vmatprep.subr.bf16.mxu1 %v284_v34 }
  0x17   :  { %287 = vmatpush3.bf16.msra.mxu0 %v284_v34  ;;  %312 = vmatpush3.bf16.msra.mxu1 %v284_v34 }
  0x18   :  { %289 = vmatprep.subr.bf16.mxu0 %v288_v37  ;;  %305 = vmatprep.subr.bf16.mxu1 %v288_v37 }
  0x1b   :  { %291 = vmatpush3.bf16.msra.mxu0 %v288_v37  ;;  %313 = vmatpush3.bf16.msra.mxu1 %v288_v37 }
  0x1c   :  { %293 = vmatprep.subr.bf16.mxu0 %v292_v40  ;;  %306 = vmatprep.subr.bf16.mxu1 %v292_v40 }
  0x1f   :  { %295 = vmatpush3.bf16.msra.mxu0 %v292_v40  ;;  %314 = vmatpush3.bf16.msra.mxu1 %v292_v40 }
  0x20   :  { %297 = vmatprep.subr.bf16.mxu0 %v296_v43  ;;  %307 = vmatprep.subr.bf16.mxu1 %v296_v43 }
  0x23   :  { %299 = vmatpush3.bf16.msra.mxu0 %v296_v43  ;;  %315 = vmatpush3.bf16.msra.mxu1 %v296_v43 }
  0x8f   :  { %v25_v10 = vpop.xlane.xlu0 %24  ;;  %v27_v11 = vpop.xlane.xlu1 %26 }
  0x90   :  { %v33_v12 = vmul.f32 0.0078125, %v25_v10  ;;  %v34_v13 = vmul.f32 0.0078125, %v27_v11  ;;  %v209_v10 = vld [vmem:[%s459_s4] ss:$0 sm:$0xff] }
  0x92   :  { %v378_v14 = vsub.f32 %v20_v0, %v33_v12  ;;  %v380_v15 = vsub.f32 %v21_v1, %v34_v13 }
  0x93   :  { %v29_v16 = vpop.xlane.xlu0 %28  ;;  %v31_v17 = vpop.xlane.xlu1 %30 }
  0x94   :  { %v35_v18 = vmul.f32 0.0078125, %v29_v16  ;;  %v41_v19 = vmul.f32 %v378_v14, %v378_v14  ;;  %v36_v20 = vmul.f32 0.0078125, %v31_v17  ;;  %v42_v23 = vmul.f32 %v380_v15, %v380_v15 }
  0x96   :  { %v384_v21 = vsub.f32 %v22_v2, %v35_v18  ;;  %45 = vadd.xlane.f32.xlu0 %v41_v19  ;;  %v386_v22 = vsub.f32 %v23_v3, %v36_v20 }
  0x98   :  { %v43_v24 = vmul.f32 %v384_v21, %v384_v21  ;;  %v44_v25 = vmul.f32 %v386_v22, %v386_v22 }
  0x9a   :  { %47 = vadd.xlane.f32.xlu0 %v42_v23  ;;  %49 = vadd.xlane.f32.xlu1 %v43_v24 }
  0x9e   :  { %51 = vadd.xlane.f32.xlu1 %v44_v25 }
 0x123   :  { %v46_v44 = vpop.xlane.xlu0 %45 }
 0x124   :  { %v53_v45 = vmul.f32 0.0078125, %v46_v44 }
 0x126   :  { %v57_v46 = vadd.f32 1e-05, %v53_v45 }
 0x127   :  { %v50_v47 = vpop.xlane.xlu1 %49  ;;  %v48_v48 = vpop.xlane.xlu0 %47 }
 0x128   :  { %316 = vrsqrt.f32 %v57_v46  ;;  %v55_v49 = vmul.f32 0.0078125, %v50_v47  ;;  %v54_v50 = vmul.f32 0.0078125, %v48_v48 }
 0x12a   :  { %v59_v51 = vadd.f32 1e-05, %v55_v49  ;;  %v58_v52 = vadd.f32 1e-05, %v54_v50 }
 0x12b   :  { %v52_v53 = vpop.xlane.xlu1 %51 }
 0x12c   :  { %318 = vrsqrt.f32 %v59_v51  ;;  %v56_v54 = vmul.f32 0.0078125, %v52_v53 }
 0x12d   :  { %320 = vrsqrt.f32 %v58_v52 }
 0x12e   :  { %v60_v55 = vadd.f32 1e-05, %v56_v54 }
 0x130   :  { %322 = vrsqrt.f32 %v60_v55 }
 0x132   :  { %v317_v56 = vpop.eup %316 }
 0x133   :  { %v65_v58 = vmul.f32 %v317_v56, %v378_v14 }
 0x135   :  { %v76_v60 = vmul.f32 %v207_v57, %v65_v58 }
 0x136   :  { %v319_v61 = vpop.eup %318 }
 0x137   :  { %v321_v62 = vpop.eup %320  ;;  %v87_v63 = vadd.f32 %v208_v59, %v76_v60  ;;  %v67_v0 = vmul.f32 %v319_v61, %v384_v21 }
 0x138   :  { %v66_v1 = vmul.f32 %v321_v62, %v380_v15 }
 0x139   :  { %262 = vmatprep.mubr.f32.mxu0 %v87_v63  ;;  %v78_v2 = vmul.f32 %v207_v57, %v67_v0 }
 0x13a   :  { %v323_v3 = vpop.eup %322  ;;  %v77_v4 = vmul.f32 %v207_v57, %v66_v1 }
 0x13b   :  { %v89_v5 = vadd.f32 %v208_v59, %v78_v2  ;;  %v68_v6 = vmul.f32 %v323_v3, %v386_v22 }
 0x13c   :  { %v88_v7 = vadd.f32 %v208_v59, %v77_v4 }
 0x13d   :  { %265 = vmatprep.mubr.f32.mxu1 %v89_v5  ;;  %v79_v8 = vmul.f32 %v207_v57, %v68_v6 }
 0x13e   :  { %263 = vmatmul.mubr.f32.vlgmr.msra.gmra.mrb[0].mxu0 %v88_v7 }
 0x13f   :  { %v90_v9 = vadd.f32 %v208_v59, %v79_v8 }
 0x141   :  { %266 = vmatmul.mubr.f32.vlgmr.msra.gmra.mrb[0].mxu1 %v90_v9 }
 0x211   :  { %v264_v11 = vpop.f32.mrb[0].mxu0 }
 0x212   :  { %v186_v12 = vadd.f32 %v264_v11, %v209_v10  ;;  %v180_v13 = vpop.f32.mrb[1].mxu0 }
 0x213   :  { %v181_v14 = vadd.f32 %v209_v10, %v180_v13 }
 0x214   :  { %200 = vst [vmem:[%s460_s5 + $0x8] sm:$0xff] %v186_v12  ;;  %v267_v15 = vpop.f32.mrb[0].mxu1 }
 0x215   :  { %199 = vst [vmem:[%s460_s5] sm:$0xff] %v181_v14  ;;  %v196_v16 = vadd.f32 %v267_v15, %v209_v10  ;;  %v190_v17 = vpop.f32.mrb[1].mxu1 }
 0x216   :  { %v191_v18 = vadd.f32 %v209_v10, %v190_v17 }
 0x217   :  { %202 = vst [vmem:[%s460_s5 + $0x18] sm:$0xff] %v196_v16 }
 0x218   :  { %201 = vst [vmem:[%s460_s5 + $0x10] sm:$0xff] %v191_v18 }

// kernel: soft_text_decoder_forward.19
= control target key start
LH: loop header
LB: loop body
LE: loop exit
PB: predicated region body
PF: predicated region fallthrough
CT: control target
= control target key end

     0   :  { %s735_s0 = inlined_call_operand.vmem [shape: f32[32,128], index: 0, kind: input, shape index: {}]   ;;  %s736_s3 = inlined_call_operand.vmem [shape: f32[128,384], index: 3, kind: input, shape index: {}]   ;;  %s737_s1 = inlined_call_operand.vmem [shape: f32[1,128], index: 1, kind: input, shape index: {}]   ;;  %s738_s2 = inlined_call_operand.vmem [shape: f32[1,128], index: 2, kind: input, shape index: {}]   ;;  %s739_s4 = inlined_call_operand.vmem [shape: f32[1,384], index: 4, kind: input, shape index: {}]   ;;  %s740_s5 = inlined_call_operand.vmem [shape: f32[32,384], index: 5, kind: output, shape index: {}]  }
   0x1   :  { %v20_v0 = vld [vmem:[%s735_s0] sm:$0xff]  ;;  %v22_v1 = vld [vmem:[%s735_s0 + $0x10] sm:$0xff]  ;;  %v21_v2 = vld [vmem:[%s735_s0 + $0x8] sm:$0xff] }
   0x2   :  { %24 = vadd.xlane.f32.xlu0 %v20_v0  ;;  %28 = vadd.xlane.f32.xlu1 %v22_v1  ;;  %v23_v3 = vld [vmem:[%s735_s0 + $0x18] sm:$0xff]  ;;  %v92_v4 = vld [vmem:[%s736_s3 + $0x8] sm:$0xff]  ;;  %v95_v5 = vld [vmem:[%s736_s3 + $0x20] sm:$0xff] }
   0x3   :  { %v91_v6 = vld [vmem:[%s736_s3] sm:$0xff]  ;;  %v406_v7 = vpack.c.bf16 %v95_v5, %v92_v4  ;;  %v94_v8 = vld [vmem:[%s736_s3 + $0x18] sm:$0xff]  ;;  %v101_v10 = vld [vmem:[%s736_s3 + $0x50] sm:$0xff] }
   0x4   :  { %v98_v9 = vld [vmem:[%s736_s3 + $0x38] sm:$0xff]  ;;  %v408_v11 = vpack.c.bf16 %v94_v8, %v91_v6  ;;  %v93_v13 = vld [vmem:[%s736_s3 + $0x10] sm:$0xff]  ;;  %v96_v14 = vld [vmem:[%s736_s3 + $0x28] sm:$0xff] }
   0x5   :  { %v410_v12 = vpack.c.bf16 %v101_v10, %v98_v9  ;;  %v97_v15 = vld [vmem:[%s736_s3 + $0x30] sm:$0xff]  ;;  %407 = vmatprep.subr.bf16.mxu0 %v406_v7  ;;  %v438_v16 = vpack.c.bf16 %v96_v14, %v93_v13  ;;  %v100_v17 = vld [vmem:[%s736_s3 + $0x48] sm:$0xff]  ;;  %v107_v19 = vld [vmem:[%s736_s3 + $0x80] sm:$0xff] }
   0x6   :  { %26 = vadd.xlane.f32.xlu0 %v21_v2  ;;  %30 = vadd.xlane.f32.xlu1 %v23_v3  ;;  %v104_v18 = vld [vmem:[%s736_s3 + $0x68] sm:$0xff]  ;;  %v412_v20 = vpack.c.bf16 %v100_v17, %v97_v15  ;;  %v99_v21 = vld [vmem:[%s736_s3 + $0x40] sm:$0xff]  ;;  %v102_v22 = vld [vmem:[%s736_s3 + $0x58] sm:$0xff] }
   0x7   :  { %409 = vmatpush1.bf16.msra.mxu0 %v408_v11  ;;  %439 = vmatprep.subr.bf16.mxu1 %v438_v16  ;;  %v414_v23 = vpack.c.bf16 %v107_v19, %v104_v18  ;;  %v442_v24 = vpack.c.bf16 %v102_v22, %v99_v21  ;;  %v103_v25 = vld [vmem:[%s736_s3 + $0x60] sm:$0xff]  ;;  %v106_v26 = vld [vmem:[%s736_s3 + $0x78] sm:$0xff]  ;;  %v113_v45 = vld [vmem:[%s736_s3 + $0xb0] sm:$0xff]  ;;  %v479_v19 = vmov 0.0  }
   0x8   :  { %411 = vmatprep.subr.bf16.mxu0 %v410_v12  ;;  %441 = vmatpush3.bf16.msra.mxu1 %v438_v16  ;;  %v416_v27 = vpack.c.bf16 %v106_v26, %v103_v25  ;;  %v110_v44 = vld [vmem:[%s736_s3 + $0x98] sm:$0xff]  ;;  %v105_v46 = vld [vmem:[%s736_s3 + $0x70] sm:$0xff]  ;;  %v108_v48 = vld [vmem:[%s736_s3 + $0x88] sm:$0xff] }
   0x9   :  { %443 = vmatprep.subr.bf16.mxu1 %v442_v24  ;;  %v418_v47 = vpack.c.bf16 %v113_v45, %v110_v44  ;;  %v109_v49 = vld [vmem:[%s736_s3 + $0x90] sm:$0xff]  ;;  %v112_v50 = vld [vmem:[%s736_s3 + $0xa8] sm:$0xff]  ;;  %v446_v51 = vpack.c.bf16 %v108_v48, %v105_v46  ;;  %v119_v54 = vld [vmem:[%s736_s3 + $0xe0] sm:$0xff]  ;;  %220 = vmatprep.mubr.f32.mxu0 %v479_v19 }
   0xa   :  { %v420_v52 = vpack.c.bf16 %v112_v50, %v109_v49  ;;  %v116_v53 = vld [vmem:[%s736_s3 + $0xc8] sm:$0xff]  ;;  %v111_v55 = vld [vmem:[%s736_s3 + $0xa0] sm:$0xff]  ;;  %v114_v57 = vld [vmem:[%s736_s3 + $0xb8] sm:$0xff] }
   0xb   :  { %413 = vmatpush1.bf16.msra.mxu0 %v412_v20  ;;  %v422_v56 = vpack.c.bf16 %v119_v54, %v116_v53  ;;  %v115_v58 = vld [vmem:[%s736_s3 + $0xc0] sm:$0xff]  ;;  %v118_v59 = vld [vmem:[%s736_s3 + $0xd8] sm:$0xff]  ;;  %v450_v60 = vpack.c.bf16 %v114_v57, %v111_v55  ;;  %v125_v63 = vld [vmem:[%s736_s3 + $0x110] sm:$0xff] }
   0xc   :  { %415 = vmatprep.subr.bf16.mxu0 %v414_v23  ;;  %445 = vmatpush3.bf16.msra.mxu1 %v442_v24  ;;  %v424_v61 = vpack.c.bf16 %v118_v59, %v115_v58  ;;  %v122_v62 = vld [vmem:[%s736_s3 + $0xf8] sm:$0xff]  ;;  %v124_v4 = vld [vmem:[%s736_s3 + $0x108] sm:$0xff]  ;;  %v131_v8 = vld [vmem:[%s736_s3 + $0x140] sm:$0xff] }
   0xd   :  { %447 = vmatprep.subr.bf16.mxu1 %v446_v51  ;;  %v128_v7 = vld [vmem:[%s736_s3 + $0x128] sm:$0xff]  ;;  %v123_v9 = vld [vmem:[%s736_s3 + $0x100] sm:$0xff]  ;;  %v126_v11 = vld [vmem:[%s736_s3 + $0x118] sm:$0xff] }
   0xe   :  { %v430_v10 = vpack.c.bf16 %v131_v8, %v128_v7  ;;  %v127_v12 = vld [vmem:[%s736_s3 + $0x120] sm:$0xff]  ;;  %v130_v13 = vld [vmem:[%s736_s3 + $0x138] sm:$0xff]  ;;  %v458_v14 = vpack.c.bf16 %v126_v11, %v123_v9  ;;  %v137_v17 = vld [vmem:[%s736_s3 + $0x170] sm:$0xff] }
   0xf   :  { %417 = vmatpush1.bf16.msra.mxu0 %v416_v27  ;;  %v432_v15 = vpack.c.bf16 %v130_v13, %v127_v12  ;;  %v134_v16 = vld [vmem:[%s736_s3 + $0x158] sm:$0xff]  ;;  %v129_v18 = vld [vmem:[%s736_s3 + $0x130] sm:$0xff]  ;;  %v132_v21 = vld [vmem:[%s736_s3 + $0x148] sm:$0xff] }
  0x10   :  { %419 = vmatprep.subr.bf16.mxu0 %v418_v47  ;;  %449 = vmatpush3.bf16.msra.mxu1 %v446_v51  ;;  %v434_v20 = vpack.c.bf16 %v137_v17, %v134_v16  ;;  %v133_v22 = vld [vmem:[%s736_s3 + $0x150] sm:$0xff]  ;;  %v136_v23 = vld [vmem:[%s736_s3 + $0x168] sm:$0xff]  ;;  %v462_v24 = vpack.c.bf16 %v132_v21, %v129_v18  ;;  %v135_v26 = vld [vmem:[%s736_s3 + $0x160] sm:$0xff] }
  0x11   :  { %451 = vmatprep.subr.bf16.mxu1 %v450_v60  ;;  %v436_v25 = vpack.c.bf16 %v136_v23, %v133_v22  ;;  %v138_v27 = vld [vmem:[%s736_s3 + $0x178] sm:$0xff]  ;;  %v346_v46 = vld [vmem:[%s737_s1] ss:$0 sm:$0xff] }
  0x12   :  { %v347_v48 = vld [vmem:[%s738_s2] ss:$0 sm:$0xff] }
  0x13   :  { %421 = vmatpush1.bf16.msra.mxu0 %v420_v52 }
  0x14   :  { %423 = vmatprep.subr.bf16.mxu0 %v422_v56  ;;  %453 = vmatpush3.bf16.msra.mxu1 %v450_v60 }
  0x17   :  { %425 = vmatpush1.bf16.msra.mxu0 %v424_v61 }
  0x8f   :  { %v25_v28 = vpop.xlane.xlu0 %24  ;;  %v29_v29 = vpop.xlane.xlu1 %28 }
  0x90   :  { %v33_v30 = vmul.f32 0.0078125, %v25_v28  ;;  %v35_v31 = vmul.f32 0.0078125, %v29_v29  ;;  %v466_v28 = vpack.c.bf16 %v138_v27, %v135_v26 }
  0x92   :  { %v570_v32 = vsub.f32 %v20_v0, %v33_v30  ;;  %v572_v33 = vsub.f32 %v22_v1, %v35_v31  ;;  %v117_v0 = vld [vmem:[%s736_s3 + $0xd0] sm:$0xff]  ;;  %v426_v1 = vpack.c.bf16 %v125_v63, %v122_v62 }
  0x93   :  { %v27_v34 = vpop.xlane.xlu0 %26  ;;  %v31_v35 = vpop.xlane.xlu1 %30 }
  0x94   :  { %v34_v36 = vmul.f32 0.0078125, %v27_v34  ;;  %v41_v37 = vmul.f32 %v570_v32, %v570_v32  ;;  %v36_v38 = vmul.f32 0.0078125, %v31_v35  ;;  %v43_v41 = vmul.f32 %v572_v33, %v572_v33  ;;  %427 = vmatprep.subr.bf16.mxu0 %v426_v1 }
  0x96   :  { %v576_v39 = vsub.f32 %v21_v2, %v34_v36  ;;  %45 = vadd.xlane.f32.xlu0 %v41_v37  ;;  %v578_v40 = vsub.f32 %v23_v3, %v36_v38  ;;  %v120_v2 = vld [vmem:[%s736_s3 + $0xe8] sm:$0xff]  ;;  %v121_v3 = vld [vmem:[%s736_s3 + $0xf0] sm:$0xff] }
  0x97   :  { %v454_v5 = vpack.c.bf16 %v120_v2, %v117_v0  ;;  %v428_v6 = vpack.c.bf16 %v124_v4, %v121_v3 }
  0x98   :  { %v42_v42 = vmul.f32 %v576_v39, %v576_v39  ;;  %v44_v43 = vmul.f32 %v578_v40, %v578_v40 }
  0x99   :  { %455 = vmatprep.subr.bf16.mxu1 %v454_v5  ;;  %429 = vmatpush1.bf16.msra.mxu0 %v428_v6 }
  0x9a   :  { %49 = vadd.xlane.f32.xlu0 %v43_v41  ;;  %47 = vadd.xlane.f32.xlu1 %v42_v42 }
  0x9b   :  { %457 = vmatpush3.bf16.msra.mxu1 %v454_v5  ;;  %431 = vmatprep.subr.bf16.mxu0 %v430_v10 }
  0x9c   :  { %459 = vmatprep.subr.bf16.mxu1 %v458_v14 }
  0x9d   :  { %433 = vmatpush1.bf16.msra.mxu0 %v432_v15 }
  0x9e   :  { %51 = vadd.xlane.f32.xlu1 %v44_v43  ;;  %435 = vmatprep.subr.bf16.mxu0 %v434_v20 }
  0x9f   :  { %461 = vmatpush3.bf16.msra.mxu1 %v458_v14 }
  0xa0   :  { %463 = vmatprep.subr.bf16.mxu1 %v462_v24 }
  0xa1   :  { %437 = vmatpush1.bf16.msra.mxu0 %v436_v25 }
  0xa3   :  { %465 = vmatpush3.bf16.msra.mxu1 %v462_v24 }
  0xa4   :  { %467 = vmatprep.subr.bf16.mxu1 %v466_v28 }
  0xa7   :  { %469 = vmatpush3.bf16.msra.mxu1 %v466_v28 }
 0x123   :  { %v46_v29 = vpop.xlane.xlu0 %45 }
 0x124   :  { %v53_v30 = vmul.f32 0.0078125, %v46_v29 }
 0x126   :  { %v57_v31 = vadd.f32 1e-05, %v53_v30 }
 0x127   :  { %v48_v34 = vpop.xlane.xlu1 %47  ;;  %v50_v35 = vpop.xlane.xlu0 %49 }
 0x128   :  { %471 = vrsqrt.f32 %v57_v31  ;;  %v54_v36 = vmul.f32 0.0078125, %v48_v34  ;;  %v55_v37 = vmul.f32 0.0078125, %v50_v35 }
 0x12a   :  { %v58_v38 = vadd.f32 1e-05, %v54_v36  ;;  %v59_v41 = vadd.f32 1e-05, %v55_v37 }
 0x12b   :  { %v52_v42 = vpop.xlane.xlu1 %51 }
 0x12c   :  { %473 = vrsqrt.f32 %v58_v38  ;;  %v56_v43 = vmul.f32 0.0078125, %v52_v42 }
 0x12d   :  { %475 = vrsqrt.f32 %v59_v41 }
 0x12e   :  { %v60_v44 = vadd.f32 1e-05, %v56_v43 }
 0x130   :  { %477 = vrsqrt.f32 %v60_v44 }
 0x132   :  { %v472_v45 = vpop.eup %471 }
 0x133   :  { %v65_v47 = vmul.f32 %v472_v45, %v570_v32 }
 0x135   :  { %v76_v49 = vmul.f32 %v346_v46, %v65_v47 }
 0x136   :  { %v474_v50 = vpop.eup %473 }
 0x137   :  { %v476_v51 = vpop.eup %475  ;;  %v87_v52 = vadd.f32 %v347_v48, %v76_v49  ;;  %v66_v53 = vmul.f32 %v474_v50, %v576_v39 }
 0x138   :  { %v67_v54 = vmul.f32 %v476_v51, %v572_v33  ;;  %v141_v33 = vlaneseq }
 0x139   :  { %221 = vmatmul.mubr.f32.vlgmr.msra.gmra.mrb[0].mxu0 %v87_v52  ;;  %400 = vmatprep.mubr.f32.mxu1 %v87_v52  ;;  %v77_v55 = vmul.f32 %v346_v46, %v66_v53 }
 0x13a   :  { %v478_v56 = vpop.eup %477  ;;  %226 = vmatprep.mubr.f32.mxu0 %v479_v19  ;;  %v78_v57 = vmul.f32 %v346_v46, %v67_v54  ;;  %v142_v61 = vshrl.u32 %v141_v33, 7 }
 0x13b   :  { %v88_v32 = vadd.f32 %v347_v48, %v77_v55  ;;  %v68_v58 = vmul.f32 %v478_v56, %v578_v40  ;;  %v139_v40 = vld [vmem:[%s739_s4] sm:$0x7] }
 0x13c   :  { %v89_v59 = vadd.f32 %v347_v48, %v78_v57  ;;  %v143_v62 = vsub.s32 0, %v142_v61  ;;  %v147_v63 = vsub.s32 1, %v142_v61  ;;  %v151_v1 = vsub.s32 2, %v142_v61 }
 0x13d   :  { %227 = vmatmul.mubr.f32.gmra.mrb[2].mxu0 %v88_v32  ;;  %401 = vmatmul.mubr.f32.vlgmr.msra.gmra.mrb[0].mxu1 %v88_v32  ;;  %v79_v60 = vmul.f32 %v346_v46, %v68_v58 }
 0x13e   :  { %403 = vmatprep.mubr.f32.mxu1 %v89_v59  ;;  %232 = vmatprep.mubr.f32.mxu0 %v479_v19  ;;  %v144_v0 = vrot.slane %v139_v40, %v143_v62  ;;  %v148_v2 = vrot.slane %v139_v40, %v147_v63  ;;  %v152_v6 = vrot.slane %v139_v40, %v151_v1 }
 0x13f   :  { %v90_v39 = vadd.f32 %v347_v48, %v79_v60 }
 0x141   :  { %233 = vmatmul.mubr.f32.gmra.mrb[4].mxu0 %v89_v59  ;;  %404 = vmatmul.mubr.f32.gmra.mrb[2].mxu1 %v90_v39 }
 0x142   :  { %238 = vmatprep.mubr.f32.mxu0 %v479_v19 }
 0x145   :  { %239 = vmatmul.mubr.f32.gmra.mrb[6].mxu0 %v90_v39 }
 0x20c   :  { %v222_v3 = vpop.f32.mrb[0].mxu0 }
 0x20d   :  { %v223_v4 = vadd.f32 %v222_v3, %v144_v0  ;;  %v224_v5 = vpop.f32.mrb[1].mxu0 }
 0x20e   :  { %v225_v7 = vadd.f32 %v224_v5, %v148_v2 }
 0x20f   :  { %330 = vst [vmem:[%s740_s5] sm:$0xff] %v223_v4 }
 0x210   :  { %331 = vst [vmem:[%s740_s5 + $0x8] sm:$0xff] %v225_v7  ;;  %v228_v8 = vpop.f32.mrb[2].mxu0  ;;  %v402_v9 = vpop.f32.mrb[0].mxu1 }
 0x211   :  { %v229_v10 = vadd.f32 %v228_v8, %v144_v0  ;;  %v317_v11 = vadd.f32 %v402_v9, %v152_v6  ;;  %v230_v12 = vpop.f32.mrb[3].mxu0  ;;  %v311_v13 = vpop.f32.mrb[1].mxu1 }
 0x212   :  { %v231_v14 = vadd.f32 %v230_v12, %v148_v2  ;;  %v312_v15 = vadd.f32 %v311_v13, %v152_v6 }
 0x213   :  { %333 = vst [vmem:[%s740_s5 + $0x18] sm:$0xff] %v229_v10  ;;  %335 = vst [vmem:[%s740_s5 + $0x28] sm:$0xff] %v317_v11 }
 0x214   :  { %334 = vst [vmem:[%s740_s5 + $0x20] sm:$0xff] %v231_v14  ;;  %332 = vst [vmem:[%s740_s5 + $0x10] sm:$0xff] %v312_v15  ;;  %v234_v16 = vpop.f32.mrb[4].mxu0  ;;  %v405_v17 = vpop.f32.mrb[2].mxu1 }
 0x215   :  { %v235_v18 = vadd.f32 %v234_v16, %v144_v0  ;;  %v327_v19 = vadd.f32 %v405_v17, %v152_v6  ;;  %v236_v20 = vpop.f32.mrb[5].mxu0  ;;  %v321_v21 = vpop.f32.mrb[3].mxu1 }
 0x216   :  { %v237_v22 = vadd.f32 %v236_v20, %v148_v2  ;;  %v322_v23 = vadd.f32 %v321_v21, %v152_v6 }
 0x217   :  { %336 = vst [vmem:[%s740_s5 + $0x30] sm:$0xff] %v235_v18  ;;  %341 = vst [vmem:[%s740_s5 + $0x58] sm:$0xff] %v327_v19 }
 0x218   :  { %337 = vst [vmem:[%s740_s5 + $0x38] sm:$0xff] %v237_v22  ;;  %338 = vst [vmem:[%s740_s5 + $0x40] sm:$0xff] %v322_v23  ;;  %v240_v24 = vpop.f32.mrb[6].mxu0 }
 0x219   :  { %v241_v25 = vadd.f32 %v240_v24, %v144_v0  ;;  %v242_v26 = vpop.f32.mrb[7].mxu0 }
 0x21a   :  { %v243_v27 = vadd.f32 %v242_v26, %v148_v2 }
 0x21b   :  { %339 = vst [vmem:[%s740_s5 + $0x48] sm:$0xff] %v241_v25 }
 0x21c   :  { %340 = vst [vmem:[%s740_s5 + $0x50] sm:$0xff] %v243_v27 }

// kernel: soft_text_decoder_forward.20
= control target key start
LH: loop header
LB: loop body
LE: loop exit
PB: predicated region body
PF: predicated region fallthrough
CT: control target
= control target key end

     0   :  { %s1275_s6 = smov 0   ;;  %s1424_s0 = inlined_call_operand.vmem [shape: f32[2,16,384], index: 0, kind: input, shape index: {}]   ;;  %s1425_s1 = inlined_call_operand.vmem [shape: f32[2,16,128], index: 1, kind: output, shape index: {}]  }
   0x1 LB: > { %s1015_s7 = sadd.s32 4294967295, %s1259_s6   ;;  %p1019_p0 = scmp.ge.s32.totalorder %s1259_s6, 1  ;;  %s1259_s6 = sphi %s1275_s6, %s11_s6  }
   0x2   : > { %p87_p1 = scmp.lt.s32.totalorder %s1259_s6, 3 }
   0x4   : > { %p88_p2 = pnand %p1019_p0, %p87_p1 }
   0x5   : > { %p107_p3 = scmp.lt.s32.totalorder (!%p88_p2), %s1015_s7, 1  ;;  %vm132_vm0 = vcmask (!%p88_p2), 261120   ;;  %s1261_s12 = smov (!%p88_p2), 96   ;;  %v123_v6 = vlaneseq (!%p88_p2)  ;;  %v1262_v10 = vmov (!%p88_p2), 0.0   ;;  %vm220_vm4 = vcmask (!%p88_p2), 130048  }
   0x6   : > { %91 = sbr.rel (%p88_p2) target bundleno = 2519 (0x9d7), region = 24  ;;  %vm1293_vm1 = vmpackc.low (!%p88_p2), %vm132_vm0, %vm132_vm0  ;;  %s1263_s13 = smov (!%p88_p2), 64   ;;  %vm952_vm5 = vcmask (!%p88_p2), 523264   ;;  %vm955_vm6 = vcmask (!%p88_p2), 785408  }
   0x7   : > { %v124_v7 = vshrl.u32 (!%p88_p2), %v123_v6, 7  ;;  %v127_v8 = vand.u32 (!%p88_p2), 127, %v123_v6  ;;  %s1264_s14 = smov (!%p88_p2), 32  }
   0x9   : > { %v125_v9 = vadd.s32 (!%p88_p2), 8, %v124_v7  ;;  %vm128_vm2 = vcmp.gt.s32.totalorder (!%p88_p2), %v127_v8, %v124_v7 }
   0xa   : > { %v1315_v11 = vsel (!%p88_p2), %vm128_vm2, -inf, %v1262_v10 }
   0xb   : > { %vm129_vm3 = vcmp.gt.s32.totalorder (!%p88_p2), %v127_v8, %v125_v9 }
   0xc   : > { %v1317_v13 = vsel (!%p88_p2), %vm129_vm3, -inf, %v1262_v10 }
   0xd   : > { %s1429_s7 = smov (!%p107_p3, %s1015_s7), 1 }
   0xe   : > { %s1178_s8 = smul.u32 48, %s1429_s7  ;;  %s1049_s15 = sshll.u32 %s1429_s7, 4 }
   0xf   : > { %s116_s18 = scalar_lea.vmem %s1425_s1, %s1049_s15 }
  0x10   : > { %s1289_s11 = scalar_lea.vmem %s1424_s0, %s1178_s8 }
  0x11   : > { %v118_v1 = vld [vmem:[%s1289_s11 + $0x8] sm:$0xff]  ;;  %v121_v2 = vld [vmem:[%s1289_s11 + $0x20] sm:$0xff]  ;;  %v1309_v5 = vld [vmem:[%s1289_s11 + $0x18] sm:$0xff] }
  0x12   : > { %v1300_v3 = vld [vmem:[%s1289_s11] sm:$0xff]  ;;  %v1138_v4 = vpack.c.bf16 %v121_v2, %v118_v1  ;;  %v1323_v19 = vpack.i.bf16 %v121_v2, %v118_v1  ;;  %v119_v30 = vld [vmem:[%s1289_s11 + $0x10] sm:$0xff]  ;;  %v122_v31 = vld [vmem:[%s1289_s11 + $0x28] sm:$0xff] }
  0x13   : > { %1086 = vmatprep.mubr.msk.f32.mxu0 %vm132_vm0, %v1300_v3  ;;  %324 = vrot.lane.b32.xlu1 %v1300_v3, %s1261_s12  ;;  %v1144_v33 = vpack.c.bf16 %v122_v31, %v119_v30  ;;  %v1349_v53 = vpack.i.bf16 %v122_v31, %v119_v30 }
  0x14   : > { %1140 = vmatprep.subr.msk.bf16.mxu0 %vm1293_vm1, %v1138_v4 }
  0x15   : > { %1143 = vmatpush3.bf16.xpose.msk.msra.mxu0 %vm1293_vm1, %v1138_v4  ;;  %1145 = vmatprep.subr.bf16.mxu1 %v1144_v33 }
  0x16   : > { %1147 = vmatpush3.bf16.msra.mxu1 %v1144_v33 }
  0x1c   : > { %1087 = vmatmul.mubr.msk.f32.vlgmr.msra.gmra.mrb[0].mxu0 %vm132_vm0, %v1309_v5 }
  0x85   : > { %v325_v37 = vpop.permute.xlu1 %324 }
  0xef   : > { %v1088_v12 = vpop.f32.mrb[0].mxu0 }
  0xf0   : > { %v211_v14 = vpop.f32.mrb[1].mxu0  ;;  %v217_v16 = vadd.f32 %v1088_v12, %v1317_v13 }
  0xf1   : > { %v212_v15 = vadd.f32 %v211_v14, %v1315_v11 }
  0xf2   : > { %v224_v18 = vsel %vm220_vm4, %v217_v16, -inf }
  0xf3   : > { %v221_v17 = vsel %vm220_vm4, %v212_v15, -inf }
  0xf4   : > { %222 = vmax.xlane.f32.xlu0 %v221_v17 }
  0xf8   : > { %225 = vmax.xlane.f32.xlu0 %v224_v18 }
 0x10e   : > { %1192 = vrot.lane.b32.xlu0 %v1323_v19, %s1261_s12 }
 0x181   : > { %v223_v20 = vpop.xlane.xlu0 %222 }
 0x182   : > { %v227_v21 = vsub.f32 %v212_v15, %v223_v20 }
 0x184   : > { %v229_v24 = vmul.f32 1.442695, %v227_v21 }
 0x185   : > { %v226_v22 = vpop.xlane.xlu0 %225 }
 0x186   : > { %v228_v23 = vsub.f32 %v217_v16, %v226_v22 }
 0x188   : > { %v231_v25 = vmul.f32 1.442695, %v228_v23 }
 0x189   : > { %v1193_v32 = vpop.permute.xlu0 %1192 }
 0x18a   : > { %1221 = vpow2.f32 %v231_v25  ;;  %v1195_v34 = vunpack.i.h.bf16 %v1193_v32  ;;  %v1194_v35 = vunpack.i.l.bf16 %v1193_v32 }
 0x18b   : > { %1223 = vpow2.f32 %v229_v24 }
 0x18c   : > { %v1148_v36 = vpack.c.bf16 %v1195_v34, %v1194_v35 }
 0x18e   : > { %1150 = vmatprep.subr.msk.bf16.mxu1 %vm1293_vm1, %v1148_v36 }
 0x194   : > { %v1222_v26 = vpop.eup %1221 }
 0x195   : > { %v236_v27 = vsel %vm220_vm4, %v1222_v26, 0.0  ;;  %v1224_v28 = vpop.eup %1223 }
 0x196   : > { %237 = vadd.xlane.f32.xlu1 %v236_v27  ;;  %v233_v29 = vsel %vm220_vm4, %v1224_v28, 0.0 }
 0x19a   : > { %234 = vadd.xlane.f32.xlu1 %v233_v29 }
 0x1ab   : > { %326 = vrot.lane.b32.xlu1 %v1309_v5, %s1261_s12 }
 0x223   : > { %v238_v38 = vpop.xlane.xlu1 %237 }
 0x224   : > { %1225 = vrcp.f32 %v238_v38 }
 0x227   : > { %v235_v39 = vpop.xlane.xlu1 %234 }
 0x228   : > { %1227 = vrcp.f32 %v235_v39 }
 0x22b   : > { %v327_v44 = vpop.permute.xlu1 %326 }
 0x22e   : > { %v1226_v40 = vpop.eup %1225 }
 0x22f   : > { %v242_v43 = vmul.f32 %v1226_v40, %v1222_v26 }
 0x232   : > { %v1228_v41 = vpop.eup %1227 }
 0x233   : > { %v240_v42 = vmul.f32 %v1228_v41, %v1224_v28 }
 0x235   : > { %1093 = vmatprep.mubr.msk.f32.mxu1 %vm220_vm4, %v240_v42 }
 0x236   : > { %1094 = vmatmul.mubr.msk.f32.vlgmr.msra.gmra.mrb[0].mxu1 %vm220_vm4, %v242_v43 }
 0x237   : > { %1153 = vmatpush3.bf16.xpose.msk.msra.mxu1 %vm1293_vm1, %v1148_v36  ;;  %1100 = vmatprep.mubr.msk.f32.mxu1 %vm132_vm0, %v325_v37 }
 0x23e   : > { %1101 = vmatmul.mubr.msk.f32.vlgmr.msra.gmra.mrb[2].mxu1 %vm132_vm0, %v327_v44 }
 0x309   : > { %v1341_v45 = vpop.f32.mrb[0].mxu1 }
 0x30a   : > { %v1343_v46 = vpop.f32.mrb[1].mxu1 }
 0x311   : > { %v1102_v47 = vpop.f32.mrb[2].mxu1 }
 0x312   : > { %v412_v48 = vadd.f32 %v1102_v47, %v1317_v13  ;;  %v406_v49 = vpop.f32.mrb[3].mxu1 }
 0x313   : > { %v407_v50 = vadd.f32 %v406_v49, %v1315_v11 }
 0x314   : > { %v418_v51 = vsel %vm220_vm4, %v412_v48, -inf }
 0x315   : > { %419 = vmax.xlane.f32.xlu0 %v418_v51  ;;  %v415_v52 = vsel %vm220_vm4, %v407_v50, -inf }
 0x316   : > { %416 = vmax.xlane.f32.xlu1 %v415_v52 }
 0x327   : > { %1197 = vrot.lane.b32.xlu1 %v1349_v53, %s1261_s12 }
 0x32b   : > { %526 = vrot.lane.b32.xlu1 %v1300_v3, %s1263_s13 }
 0x32f   : > { %528 = vrot.lane.b32.xlu1 %v1309_v5, %s1263_s13 }
 0x3a2   : > { %v420_v54 = vpop.xlane.xlu0 %419 }
 0x3a3   : > { %v422_v55 = vsub.f32 %v412_v48, %v420_v54  ;;  %v417_v56 = vpop.xlane.xlu1 %416 }
 0x3a4   : > { %v421_v57 = vsub.f32 %v407_v50, %v417_v56 }
 0x3a5   : > { %v425_v58 = vmul.f32 1.442695, %v422_v55 }
 0x3a6   : > { %v423_v59 = vmul.f32 1.442695, %v421_v57 }
 0x3a7   : > { %1229 = vpow2.f32 %v425_v58  ;;  %v1198_v1 = vpop.permute.xlu1 %1197 }
 0x3a8   : > { %1231 = vpow2.f32 %v423_v59  ;;  %v1200_v2 = vunpack.i.h.bf16 %v1198_v1  ;;  %v1199_v4 = vunpack.i.l.bf16 %v1198_v1 }
 0x3aa   : > { %v1154_v6 = vpack.c.bf16 %v1200_v2, %v1199_v4 }
 0x3ab   : > { %v527_v20 = vpop.permute.xlu1 %526 }
 0x3ac   : > { %1155 = vmatprep.subr.bf16.mxu0 %v1154_v6 }
 0x3ad   : > { %1157 = vmatpush3.bf16.msra.mxu0 %v1154_v6 }
 0x3af   : > { %v529_v21 = vpop.permute.xlu1 %528 }
 0x3b1   : > { %v1230_v60 = vpop.eup %1229 }
 0x3b2   : > { %v430_v61 = vsel %vm220_vm4, %v1230_v60, 0.0  ;;  %v1232_v62 = vpop.eup %1231 }
 0x3b3   : > { %431 = vadd.xlane.f32.xlu0 %v430_v61  ;;  %v427_v63 = vsel %vm220_vm4, %v1232_v62, 0.0 }
 0x3b7   : > { %428 = vadd.xlane.f32.xlu0 %v427_v63 }
 0x3cd   : > { %1202 = vrot.lane.b32.xlu0 %v1323_v19, %s1263_s13 }
 0x440   : > { %v432_v7 = vpop.xlane.xlu0 %431 }
 0x441   : > { %1233 = vrcp.f32 %v432_v7 }
 0x444   : > { %v429_v8 = vpop.xlane.xlu0 %428 }
 0x445   : > { %1235 = vrcp.f32 %v429_v8 }
 0x448   : > { %v1203_v9 = vpop.permute.xlu0 %1202 }
 0x449   : > { %v1205_v10 = vunpack.i.h.bf16 %v1203_v9  ;;  %v1204_v12 = vunpack.i.l.bf16 %v1203_v9 }
 0x44b   : > { %v1158_v14 = vpack.c.bf16 %v1205_v10, %v1204_v12  ;;  %v1234_v15 = vpop.eup %1233 }
 0x44c   : > { %v436_v18 = vmul.f32 %v1234_v15, %v1230_v60 }
 0x44d   : > { %1160 = vmatprep.subr.msk.bf16.mxu0 %vm1293_vm1, %v1158_v14 }
 0x44f   : > { %v1236_v16 = vpop.eup %1235 }
 0x450   : > { %v434_v17 = vmul.f32 %v1236_v16, %v1232_v62 }
 0x452   : > { %1107 = vmatprep.mubr.msk.f32.mxu0 %vm220_vm4, %v434_v17 }
 0x453   : > { %1108 = vmatmul.mubr.msk.f32.vlgmr.msra.gmra.mrb[2].mxu0 %vm220_vm4, %v436_v18 }
 0x454   : > { %1163 = vmatpush3.bf16.xpose.msk.msra.mxu0 %vm1293_vm1, %v1158_v14  ;;  %1114 = vmatprep.mubr.msk.f32.mxu0 %vm132_vm0, %v527_v20 }
 0x45b   : > { %1115 = vmatmul.mubr.msk.f32.vlgmr.msra.gmra.mrb[4].mxu0 %vm132_vm0, %v529_v21 }
 0x526   : > { %v1369_v22 = vpop.f32.mrb[2].mxu0 }
 0x527   : > { %v1371_v23 = vpop.f32.mrb[3].mxu0 }
 0x52e   : > { %v1116_v24 = vpop.f32.mrb[4].mxu0 }
 0x52f   : > { %v614_v25 = vadd.f32 %v1116_v24, %v1317_v13  ;;  %v608_v26 = vpop.f32.mrb[5].mxu0 }
 0x530   : > { %v609_v27 = vadd.f32 %v608_v26, %v1315_v11 }
 0x531   : > { %v620_v28 = vsel %vm220_vm4, %v614_v25, -inf }
 0x532   : > { %621 = vmax.xlane.f32.xlu0 %v620_v28  ;;  %v617_v29 = vsel %vm220_vm4, %v609_v27, -inf }
 0x533   : > { %618 = vmax.xlane.f32.xlu1 %v617_v29 }
 0x544   : > { %1207 = vrot.lane.b32.xlu1 %v1349_v53, %s1263_s13 }
 0x548   : > { %726 = vrot.lane.b32.xlu1 %v1300_v3, %s1264_s14 }
 0x54c   : > { %728 = vrot.lane.b32.xlu1 %v1309_v5, %s1264_s14 }
 0x5bf   : > { %v622_v30 = vpop.xlane.xlu0 %621 }
 0x5c0   : > { %v624_v31 = vsub.f32 %v614_v25, %v622_v30  ;;  %v619_v32 = vpop.xlane.xlu1 %618 }
 0x5c1   : > { %v623_v33 = vsub.f32 %v609_v27, %v619_v32 }
 0x5c2   : > { %v627_v34 = vmul.f32 1.442695, %v624_v31 }
 0x5c3   : > { %v625_v35 = vmul.f32 1.442695, %v623_v33 }
 0x5c4   : > { %1237 = vpow2.f32 %v627_v34  ;;  %v1208_v3 = vpop.permute.xlu1 %1207 }
 0x5c5   : > { %1239 = vpow2.f32 %v625_v35  ;;  %v1210_v40 = vunpack.i.h.bf16 %v1208_v3  ;;  %v1209_v41 = vunpack.i.l.bf16 %v1208_v3 }
 0x5c7   : > { %v1164_v5 = vpack.c.bf16 %v1210_v40, %v1209_v41 }
 0x5c8   : > { %v727_v55 = vpop.permute.xlu1 %726 }
 0x5c9   : > { %1165 = vmatprep.subr.bf16.mxu1 %v1164_v5 }
 0x5ca   : > { %1167 = vmatpush3.bf16.msra.mxu1 %v1164_v5 }
 0x5ce   : > { %v1238_v36 = vpop.eup %1237 }
 0x5cf   : > { %v632_v37 = vsel %vm220_vm4, %v1238_v36, 0.0  ;;  %v1240_v38 = vpop.eup %1239 }
 0x5d0   : > { %633 = vadd.xlane.f32.xlu0 %v632_v37  ;;  %v629_v39 = vsel %vm220_vm4, %v1240_v38, 0.0 }
 0x5d4   : > { %630 = vadd.xlane.f32.xlu0 %v629_v39 }
 0x5ea   : > { %1212 = vrot.lane.b32.xlu0 %v1323_v19, %s1264_s14  ;;  %v729_v19 = vpop.permute.xlu1 %728 }
 0x65d   : > { %v634_v42 = vpop.xlane.xlu0 %633 }
 0x65e   : > { %1241 = vrcp.f32 %v634_v42 }
 0x661   : > { %v631_v43 = vpop.xlane.xlu0 %630 }
 0x662   : > { %1243 = vrcp.f32 %v631_v43 }
 0x665   : > { %v1213_v44 = vpop.permute.xlu0 %1212 }
 0x666   : > { %v1215_v47 = vunpack.i.h.bf16 %v1213_v44  ;;  %v1214_v48 = vunpack.i.l.bf16 %v1213_v44 }
 0x668   : > { %v1168_v49 = vpack.c.bf16 %v1215_v47, %v1214_v48  ;;  %v1242_v50 = vpop.eup %1241 }
 0x669   : > { %v638_v54 = vmul.f32 %v1242_v50, %v1238_v36 }
 0x66a   : > { %1170 = vmatprep.subr.msk.bf16.mxu1 %vm1293_vm1, %v1168_v49 }
 0x66c   : > { %v1244_v51 = vpop.eup %1243 }
 0x66d   : > { %v636_v52 = vmul.f32 %v1244_v51, %v1240_v38 }
 0x66f   : > { %1121 = vmatprep.mubr.msk.f32.mxu1 %vm220_vm4, %v636_v52 }
 0x670   : > { %1122 = vmatmul.mubr.msk.f32.vlgmr.msra.gmra.mrb[4].mxu1 %vm220_vm4, %v638_v54 }
 0x671   : > { %1173 = vmatpush3.bf16.xpose.msk.msra.mxu1 %vm1293_vm1, %v1168_v49  ;;  %1128 = vmatprep.mubr.msk.f32.mxu1 %vm132_vm0, %v727_v55 }
 0x678   : > { %1129 = vmatmul.mubr.msk.f32.vlgmr.msra.gmra.mrb[6].mxu1 %vm132_vm0, %v729_v19 }
 0x743   : > { %v1123_v56 = vpop.f32.mrb[4].mxu1 }
 0x744   : > { %v717_v57 = vpop.f32.mrb[5].mxu1 }
 0x74b   : > { %v1130_v58 = vpop.f32.mrb[6].mxu1 }
 0x74c   : > { %v814_v59 = vadd.f32 %v1130_v58, %v1317_v13  ;;  %v808_v60 = vpop.f32.mrb[7].mxu1 }
 0x74d   : > { %v809_v61 = vadd.f32 %v808_v60, %v1315_v11 }
 0x74e   : > { %v820_v62 = vsel %vm220_vm4, %v814_v59, -inf }
 0x74f   : > { %821 = vmax.xlane.f32.xlu0 %v820_v62  ;;  %v817_v63 = vsel %vm220_vm4, %v809_v61, -inf }
 0x750   : > { %818 = vmax.xlane.f32.xlu1 %v817_v63 }
 0x761   : > { %1217 = vrot.lane.b32.xlu1 %v1349_v53, %s1264_s14 }
 0x765   : > { %930 = vrot.lane.b32.xlu1 %v1369_v22, %s1264_s14 }
 0x769   : > { %936 = vrot.lane.b32.xlu1 %v717_v57, %s1263_s13 }
 0x76d   : > { %938 = vrot.lane.b32.xlu1 %v1123_v56, %s1263_s13 }
 0x7dc   : > { %v822_v0 = vpop.xlane.xlu0 %821 }
 0x7dd   : > { %v824_v13 = vsub.f32 %v814_v59, %v822_v0  ;;  %v819_v1 = vpop.xlane.xlu1 %818 }
 0x7de   : > { %v823_v11 = vsub.f32 %v809_v61, %v819_v1 }
 0x7df   : > { %v827_v2 = vmul.f32 1.442695, %v824_v13 }
 0x7e0   : > { %v825_v4 = vmul.f32 1.442695, %v823_v11 }
 0x7e1   : > { %v1218_v6 = vpop.permute.xlu1 %1217 }
 0x7e2   : > { %1245 = vpow2.f32 %v825_v4  ;;  %v1220_v7 = vunpack.i.h.bf16 %v1218_v6  ;;  %v1219_v8 = vunpack.i.l.bf16 %v1218_v6 }
 0x7e3   : > { %1247 = vpow2.f32 %v827_v2 }
 0x7e4   : > { %v1174_v9 = vpack.c.bf16 %v1220_v7, %v1219_v8 }
 0x7e6   : > { %1175 = vmatprep.subr.bf16.mxu0 %v1174_v9 }
 0x7e7   : > { %1177 = vmatpush3.bf16.msra.mxu0 %v1174_v9 }
 0x7ec   : > { %v1246_v53 = vpop.eup %1245 }
 0x7ed   : > { %v829_v10 = vsel %vm220_vm4, %v1246_v53, 0.0  ;;  %v1248_v12 = vpop.eup %1247 }
 0x7ee   : > { %830 = vadd.xlane.f32.xlu0 %v829_v10  ;;  %v832_v14 = vsel %vm220_vm4, %v1248_v12, 0.0 }
 0x7f2   : > { %833 = vadd.xlane.f32.xlu0 %v832_v14 }
 0x808   : > { %928 = vrot.lane.b32.xlu0 %v1371_v23, %s1264_s14  ;;  %v931_v23 = vpop.permute.xlu1 %930 }
 0x809   : > { %v951_v29 = vsel %vm132_vm0, %v1341_v45, %v931_v23 }
 0x80c   : > { %v937_v25 = vpop.permute.xlu1 %936 }
 0x810   : > { %v939_v27 = vpop.permute.xlu1 %938 }
 0x811   : > { %v954_v30 = vsel %vm952_vm5, %v951_v29, %v939_v27 }
 0x87b   : > { %v831_v15 = vpop.xlane.xlu0 %830 }
 0x87c   : > { %1249 = vrcp.f32 %v831_v15 }
 0x87f   : > { %v834_v16 = vpop.xlane.xlu0 %833 }
 0x880   : > { %1251 = vrcp.f32 %v834_v16 }
 0x883   : > { %v929_v26 = vpop.permute.xlu0 %928 }
 0x884   : > { %v950_v28 = vsel %vm132_vm0, %v1343_v46, %v929_v26 }
 0x885   : > { %v953_v33 = vsel %vm952_vm5, %v950_v28, %v937_v25 }
 0x886   : > { %v1250_v17 = vpop.eup %1249 }
 0x887   : > { %v836_v18 = vmul.f32 %v1250_v17, %v1246_v53 }
 0x889   : > { %1135 = vmatprep.mubr.msk.f32.mxu0 %vm220_vm4, %v836_v18 }
 0x88a   : > { %v1252_v20 = vpop.eup %1251 }
 0x88b   : > { %v838_v21 = vmul.f32 %v1252_v20, %v1248_v12 }
 0x88d   : > { %1136 = vmatmul.mubr.msk.f32.vlgmr.msra.gmra.mrb[6].mxu0 %vm220_vm4, %v838_v21 }
 0x960   : > { %v1137_v22 = vpop.f32.mrb[6].mxu0 }
 0x961   : > { %946 = vrot.lane.b32.xlu1 %v1137_v22, %s1261_s12  ;;  %v917_v24 = vpop.f32.mrb[7].mxu0 }
 0x962   : > { %944 = vrot.lane.b32.xlu0 %v917_v24, %s1261_s12 }
 0x9d3   : > { %v947_v31 = vpop.permute.xlu1 %946 }
 0x9d4   : > { %v957_v32 = vsel %vm955_vm6, %v954_v30, %v947_v31  ;;  %v945_v34 = vpop.permute.xlu0 %944 }
 0x9d5   : > { %959 = vst [vmem:[%s116_s18 + $0x8] sm:$0xff] %v957_v32  ;;  %v956_v35 = vsel %vm955_vm6, %v953_v33, %v945_v34 }
 0x9d6   : > { %958 = vst [vmem:[%s116_s18] sm:$0xff] %v956_v35 }
 0x9d7 PF: > { %s11_s6 = sadd.s32 1, %s1259_s6  }
 0x9d8   : > { %p8_p4 = scmp.ge.s32.totalorder %s11_s6, 4  }
 0x9da   :  { %10 = sbr.rel (!%p8_p4) target bundleno = 1 (0x1), region = 54 }

// kernel: soft_text_decoder_forward.23
= control target key start
LH: loop header
LB: loop body
LE: loop exit
PB: predicated region body
PF: predicated region fallthrough
CT: control target
= control target key end

     0   :  { %v212_v3 = vmov 0.0   ;;  %v52_v53 = vlaneseq  ;;  %s372_s1 = inlined_call_operand.vmem [shape: f32[128,256], index: 1, kind: input, shape index: {}]   ;;  %s373_s0 = inlined_call_operand.vmem [shape: f32[32,128], index: 0, kind: input, shape index: {}]   ;;  %s374_s2 = inlined_call_operand.vmem [shape: f32[1,256], index: 2, kind: input, shape index: {}]   ;;  %s375_s3 = inlined_call_operand.vmem [shape: f32[32,256], index: 3, kind: output, shape index: {}]  }
   0x1   :  { %v19_v0 = vld [vmem:[%s372_s1 + $0x8] sm:$0xff]  ;;  %v21_v1 = vld [vmem:[%s372_s1 + $0x18] sm:$0xff]  ;;  %v18_v2 = vld [vmem:[%s372_s1] sm:$0xff]  ;;  %126 = vmatprep.mubr.f32.mxu0 %v212_v3  ;;  %138 = vmatprep.mubr.f32.mxu1 %v212_v3 }
   0x2   :  { %v163_v4 = vpack.c.bf16 %v21_v1, %v19_v0  ;;  %v20_v5 = vld [vmem:[%s372_s1 + $0x10] sm:$0xff]  ;;  %v23_v6 = vld [vmem:[%s372_s1 + $0x28] sm:$0xff]  ;;  %v25_v7 = vld [vmem:[%s372_s1 + $0x38] sm:$0xff]  ;;  %v53_v54 = vshrl.u32 %v52_v53, 7 }
   0x3   :  { %v165_v8 = vpack.c.bf16 %v20_v5, %v18_v2  ;;  %v167_v9 = vpack.c.bf16 %v25_v7, %v23_v6  ;;  %v22_v10 = vld [vmem:[%s372_s1 + $0x20] sm:$0xff]  ;;  %v24_v11 = vld [vmem:[%s372_s1 + $0x30] sm:$0xff]  ;;  %v27_v12 = vld [vmem:[%s372_s1 + $0x48] sm:$0xff] }
   0x4   :  { %164 = vmatprep.subr.bf16.mxu0 %v163_v4  ;;  %195 = vmatprep.subr.bf16.mxu1 %v163_v4  ;;  %v29_v13 = vld [vmem:[%s372_s1 + $0x58] sm:$0xff]  ;;  %v169_v14 = vpack.c.bf16 %v24_v11, %v22_v10  ;;  %v26_v16 = vld [vmem:[%s372_s1 + $0x40] sm:$0xff]  ;;  %v28_v17 = vld [vmem:[%s372_s1 + $0x50] sm:$0xff]  ;;  %v54_v55 = vsub.s32 0, %v53_v54  ;;  %v58_v57 = vsub.s32 1, %v53_v54 }
   0x5   :  { %166 = vmatpush1.bf16.msra.mxu0 %v165_v8  ;;  %203 = vmatpush1.bf16.msra.mxu1 %v165_v8  ;;  %v171_v15 = vpack.c.bf16 %v29_v13, %v27_v12  ;;  %v31_v18 = vld [vmem:[%s372_s1 + $0x68] sm:$0xff]  ;;  %v33_v19 = vld [vmem:[%s372_s1 + $0x78] sm:$0xff]  ;;  %v173_v20 = vpack.c.bf16 %v28_v17, %v26_v16  ;;  %v30_v22 = vld [vmem:[%s372_s1 + $0x60] sm:$0xff] }
   0x6   :  { %168 = vmatprep.subr.bf16.mxu0 %v167_v9  ;;  %196 = vmatprep.subr.bf16.mxu1 %v167_v9  ;;  %v175_v21 = vpack.c.bf16 %v33_v19, %v31_v18  ;;  %v32_v23 = vld [vmem:[%s372_s1 + $0x70] sm:$0xff]  ;;  %v35_v24 = vld [vmem:[%s372_s1 + $0x88] sm:$0xff]  ;;  %v37_v25 = vld [vmem:[%s372_s1 + $0x98] sm:$0xff] }
   0x7   :  { %v177_v26 = vpack.c.bf16 %v32_v23, %v30_v22  ;;  %v179_v27 = vpack.c.bf16 %v37_v25, %v35_v24  ;;  %v34_v28 = vld [vmem:[%s372_s1 + $0x80] sm:$0xff]  ;;  %v36_v29 = vld [vmem:[%s372_s1 + $0x90] sm:$0xff]  ;;  %v39_v30 = vld [vmem:[%s372_s1 + $0xa8] sm:$0xff] }
   0x8   :  { %v41_v31 = vld [vmem:[%s372_s1 + $0xb8] sm:$0xff]  ;;  %v181_v32 = vpack.c.bf16 %v36_v29, %v34_v28  ;;  %v38_v34 = vld [vmem:[%s372_s1 + $0xa0] sm:$0xff]  ;;  %v40_v35 = vld [vmem:[%s372_s1 + $0xb0] sm:$0xff] }
   0x9   :  { %170 = vmatpush1.bf16.msra.mxu0 %v169_v14  ;;  %204 = vmatpush1.bf16.msra.mxu1 %v169_v14  ;;  %v183_v33 = vpack.c.bf16 %v41_v31, %v39_v30  ;;  %v43_v36 = vld [vmem:[%s372_s1 + $0xc8] sm:$0xff]  ;;  %v45_v37 = vld [vmem:[%s372_s1 + $0xd8] sm:$0xff]  ;;  %v185_v38 = vpack.c.bf16 %v40_v35, %v38_v34  ;;  %v42_v40 = vld [vmem:[%s372_s1 + $0xc0] sm:$0xff] }
   0xa   :  { %172 = vmatprep.subr.bf16.mxu0 %v171_v15  ;;  %197 = vmatprep.subr.bf16.mxu1 %v171_v15  ;;  %v187_v39 = vpack.c.bf16 %v45_v37, %v43_v36  ;;  %v44_v41 = vld [vmem:[%s372_s1 + $0xd0] sm:$0xff]  ;;  %v47_v42 = vld [vmem:[%s372_s1 + $0xe8] sm:$0xff]  ;;  %v49_v43 = vld [vmem:[%s372_s1 + $0xf8] sm:$0xff] }
   0xb   :  { %v189_v44 = vpack.c.bf16 %v44_v41, %v42_v40  ;;  %v191_v45 = vpack.c.bf16 %v49_v43, %v47_v42  ;;  %v46_v46 = vld [vmem:[%s372_s1 + $0xe0] sm:$0xff]  ;;  %v48_v47 = vld [vmem:[%s372_s1 + $0xf0] sm:$0xff]  ;;  %v15_v51 = vld [vmem:[%s373_s0 + $0x8] sm:$0xff] }
   0xc   :  { %v193_v48 = vpack.c.bf16 %v48_v47, %v46_v46  ;;  %v14_v49 = vld [vmem:[%s373_s0] sm:$0xff]  ;;  %v16_v50 = vld [vmem:[%s373_s0 + $0x10] sm:$0xff]  ;;  %v17_v52 = vld [vmem:[%s373_s0 + $0x18] sm:$0xff] }
   0xd   :  { %174 = vmatpush1.bf16.msra.mxu0 %v173_v20  ;;  %205 = vmatpush1.bf16.msra.mxu1 %v173_v20  ;;  %v50_v56 = vld [vmem:[%s374_s2] sm:$0x3] }
   0xe   :  { %176 = vmatprep.subr.bf16.mxu0 %v175_v21  ;;  %198 = vmatprep.subr.bf16.mxu1 %v175_v21  ;;  %v55_v58 = vrot.slane %v50_v56, %v54_v55  ;;  %v59_v59 = vrot.slane %v50_v56, %v58_v57 }
  0x11   :  { %178 = vmatpush1.bf16.msra.mxu0 %v177_v26  ;;  %206 = vmatpush1.bf16.msra.mxu1 %v177_v26 }
  0x12   :  { %180 = vmatprep.subr.bf16.mxu0 %v179_v27  ;;  %199 = vmatprep.subr.bf16.mxu1 %v179_v27 }
  0x15   :  { %182 = vmatpush1.bf16.msra.mxu0 %v181_v32  ;;  %207 = vmatpush1.bf16.msra.mxu1 %v181_v32 }
  0x16   :  { %184 = vmatprep.subr.bf16.mxu0 %v183_v33  ;;  %200 = vmatprep.subr.bf16.mxu1 %v183_v33 }
  0x19   :  { %186 = vmatpush1.bf16.msra.mxu0 %v185_v38  ;;  %208 = vmatpush1.bf16.msra.mxu1 %v185_v38 }
  0x1a   :  { %188 = vmatprep.subr.bf16.mxu0 %v187_v39  ;;  %201 = vmatprep.subr.bf16.mxu1 %v187_v39 }
  0x1d   :  { %190 = vmatpush1.bf16.msra.mxu0 %v189_v44  ;;  %209 = vmatpush1.bf16.msra.mxu1 %v189_v44 }
  0x1e   :  { %192 = vmatprep.subr.bf16.mxu0 %v191_v45  ;;  %202 = vmatprep.subr.bf16.mxu1 %v191_v45 }
  0x21   :  { %194 = vmatpush1.bf16.msra.mxu0 %v193_v48  ;;  %210 = vmatpush1.bf16.msra.mxu1 %v193_v48 }
  0x24   :  { %127 = vmatmul.mubr.f32.vlgmr.msra.gmra.mrb[0].mxu0 %v14_v49  ;;  %139 = vmatmul.mubr.f32.vlgmr.msra.gmra.mrb[0].mxu1 %v16_v50 }
  0x25   :  { %132 = vmatprep.mubr.f32.mxu0 %v212_v3  ;;  %144 = vmatprep.mubr.f32.mxu1 %v212_v3 }
  0x28   :  { %133 = vmatmul.mubr.f32.gmra.mrb[2].mxu0 %v15_v51  ;;  %145 = vmatmul.mubr.f32.gmra.mrb[2].mxu1 %v17_v52 }
  0xf7   :  { %v128_v60 = vpop.f32.mrb[0].mxu0  ;;  %v140_v61 = vpop.f32.mrb[0].mxu1 }
  0xf8   :  { %v129_v62 = vadd.f32 %v128_v60, %v55_v58  ;;  %v141_v63 = vadd.f32 %v140_v61, %v55_v58  ;;  %v130_v0 = vpop.f32.mrb[1].mxu0  ;;  %v142_v1 = vpop.f32.mrb[1].mxu1 }
  0xf9   :  { %v131_v2 = vadd.f32 %v130_v0, %v59_v59  ;;  %v143_v3 = vadd.f32 %v142_v1, %v59_v59 }
  0xfa   :  { %151 = vst [vmem:[%s375_s3] sm:$0xff] %v129_v62  ;;  %155 = vst [vmem:[%s375_s3 + $0x20] sm:$0xff] %v141_v63 }
  0xfb   :  { %152 = vst [vmem:[%s375_s3 + $0x8] sm:$0xff] %v131_v2  ;;  %156 = vst [vmem:[%s375_s3 + $0x28] sm:$0xff] %v143_v3  ;;  %v134_v4 = vpop.f32.mrb[2].mxu0  ;;  %v146_v5 = vpop.f32.mrb[2].mxu1 }
  0xfc   :  { %v135_v6 = vadd.f32 %v134_v4, %v55_v58  ;;  %v147_v7 = vadd.f32 %v146_v5, %v55_v58  ;;  %v136_v8 = vpop.f32.mrb[3].mxu0  ;;  %v148_v9 = vpop.f32.mrb[3].mxu1 }
  0xfd   :  { %v137_v10 = vadd.f32 %v136_v8, %v59_v59  ;;  %v149_v11 = vadd.f32 %v148_v9, %v59_v59 }
  0xfe   :  { %153 = vst [vmem:[%s375_s3 + $0x10] sm:$0xff] %v135_v6  ;;  %157 = vst [vmem:[%s375_s3 + $0x30] sm:$0xff] %v147_v7 }
  0xff   :  { %154 = vst [vmem:[%s375_s3 + $0x18] sm:$0xff] %v137_v10  ;;  %158 = vst [vmem:[%s375_s3 + $0x38] sm:$0xff] %v149_v11 }

// kernel: soft_text_decoder_forward.24
= control target key start
LH: loop header
LB: loop body
LE: loop exit
PB: predicated region body
PF: predicated region fallthrough
CT: control target
= control target key end

     0   :  { %s1332_s9 = smov 0   ;;  %s1471_s0 = inlined_call_operand.vmem [shape: f32[2,16,128], index: 0, kind: input, shape index: {}]   ;;  %s1472_s1 = inlined_call_operand.vmem [shape: f32[2,16,256], index: 1, kind: input, shape index: {}]   ;;  %s1473_s2 = inlined_call_operand.vmem [shape: f32[2,16,128], index: 2, kind: output, shape index: {}]  }
   0x1 LB: > { %s1065_s10 = sadd.s32 4294967295, %s1312_s9   ;;  %p1069_p0 = scmp.ge.s32.totalorder %s1312_s9, 1  ;;  %s1312_s9 = sphi %s1332_s9, %s12_s9  }
   0x2   : > { %p122_p1 = scmp.lt.s32.totalorder %s1312_s9, 3 }
   0x4   : > { %p123_p2 = pnand %p1069_p0, %p122_p1 }
   0x5   : > { %p149_p3 = scmp.lt.s32.totalorder (!%p123_p2), %s1065_s10, 1  ;;  %vm170_vm0 = vcmask (!%p123_p2), 261120   ;;  %s1314_s19 = smov (!%p123_p2), 96   ;;  %vm258_vm2 = vcmask (!%p123_p2), 130048   ;;  %vm990_vm3 = vcmask (!%p123_p2), 523264   ;;  %vm993_vm4 = vcmask (!%p123_p2), 785408  }
   0x6   : > { %126 = sbr.rel (%p123_p2) target bundleno = 2510 (0x9ce), region = 28  ;;  %vm1351_vm1 = vmpackc.low (!%p123_p2), %vm170_vm0, %vm170_vm0  ;;  %s1315_s20 = smov (!%p123_p2), 64  }
   0x7   : > { %s1316_s21 = smov (!%p123_p2), 32  }
   0xd   : > { %s1477_s10 = smov (!%p149_p3, %s1065_s10), 1 }
   0xe   : > { %s1103_s11 = sshll.u32 %s1477_s10, 5  ;;  %s1102_s12 = sshll.u32 %s1477_s10, 4 }
   0xf   : > { %s1347_s15 = scalar_lea.vmem %s1472_s1, %s1103_s11  ;;  %s153_s18 = scalar_lea.vmem %s1471_s0, %s1102_s12 }
  0x10   : > { %v164_v1 = vld [vmem:[%s1347_s15] sm:$0xff]  ;;  %v166_v2 = vld [vmem:[%s1347_s15 + $0x10] sm:$0xff]  ;;  %v1370_v5 = vld [vmem:[%s153_s18 + $0x8] sm:$0xff]  ;;  %s163_s24 = scalar_lea.vmem %s1473_s2, %s1102_s12 }
  0x11   : > { %v1362_v3 = vld [vmem:[%s153_s18] sm:$0xff]  ;;  %v1193_v4 = vpack.c.bf16 %v166_v2, %v164_v1  ;;  %v1378_v10 = vpack.i.bf16 %v166_v2, %v164_v1  ;;  %v165_v21 = vld [vmem:[%s1347_s15 + $0x8] sm:$0xff]  ;;  %v167_v22 = vld [vmem:[%s1347_s15 + $0x18] sm:$0xff] }
  0x12   : > { %1141 = vmatprep.mubr.msk.f32.mxu0 %vm170_vm0, %v1362_v3  ;;  %362 = vrot.lane.b32.xlu1 %v1362_v3, %s1314_s19  ;;  %v1199_v24 = vpack.c.bf16 %v167_v22, %v165_v21  ;;  %v1402_v42 = vpack.i.bf16 %v167_v22, %v165_v21 }
  0x13   : > { %1195 = vmatprep.subr.msk.bf16.mxu0 %vm1351_vm1, %v1193_v4 }
  0x14   : > { %1198 = vmatpush3.bf16.xpose.msk.msra.mxu0 %vm1351_vm1, %v1193_v4  ;;  %1200 = vmatprep.subr.bf16.mxu1 %v1199_v24 }
  0x15   : > { %1202 = vmatpush3.bf16.msra.mxu1 %v1199_v24 }
  0x1b   : > { %1142 = vmatmul.mubr.msk.f32.vlgmr.msra.gmra.mrb[0].mxu0 %vm170_vm0, %v1370_v5 }
  0x84   : > { %v363_v28 = vpop.permute.xlu1 %362 }
  0xee   : > { %v1143_v6 = vpop.f32.mrb[0].mxu0 }
  0xef   : > { %v249_v7 = vpop.f32.mrb[1].mxu0  ;;  %v262_v9 = vsel %vm258_vm2, %v1143_v6, -inf }
  0xf0   : > { %v259_v8 = vsel %vm258_vm2, %v249_v7, -inf }
  0xf1   : > { %260 = vmax.xlane.f32.xlu0 %v259_v8 }
  0xf5   : > { %263 = vmax.xlane.f32.xlu0 %v262_v9 }
 0x10b   : > { %1245 = vrot.lane.b32.xlu0 %v1378_v10, %s1314_s19 }
 0x17e   : > { %v261_v11 = vpop.xlane.xlu0 %260 }
 0x17f   : > { %v265_v12 = vsub.f32 %v249_v7, %v261_v11 }
 0x181   : > { %v267_v15 = vmul.f32 1.442695, %v265_v12 }
 0x182   : > { %v264_v13 = vpop.xlane.xlu0 %263 }
 0x183   : > { %v266_v14 = vsub.f32 %v1143_v6, %v264_v13 }
 0x185   : > { %v269_v16 = vmul.f32 1.442695, %v266_v14 }
 0x186   : > { %v1246_v23 = vpop.permute.xlu0 %1245 }
 0x187   : > { %1274 = vpow2.f32 %v269_v16  ;;  %v1248_v25 = vunpack.i.h.bf16 %v1246_v23  ;;  %v1247_v26 = vunpack.i.l.bf16 %v1246_v23 }
 0x188   : > { %1276 = vpow2.f32 %v267_v15 }
 0x189   : > { %v1203_v27 = vpack.c.bf16 %v1248_v25, %v1247_v26 }
 0x18b   : > { %1205 = vmatprep.subr.msk.bf16.mxu1 %vm1351_vm1, %v1203_v27 }
 0x191   : > { %v1275_v17 = vpop.eup %1274 }
 0x192   : > { %v274_v18 = vsel %vm258_vm2, %v1275_v17, 0.0  ;;  %v1277_v19 = vpop.eup %1276 }
 0x193   : > { %275 = vadd.xlane.f32.xlu1 %v274_v18  ;;  %v271_v20 = vsel %vm258_vm2, %v1277_v19, 0.0 }
 0x197   : > { %272 = vadd.xlane.f32.xlu1 %v271_v20 }
 0x1a8   : > { %364 = vrot.lane.b32.xlu1 %v1370_v5, %s1314_s19 }
 0x220   : > { %v276_v29 = vpop.xlane.xlu1 %275 }
 0x221   : > { %1278 = vrcp.f32 %v276_v29 }
 0x224   : > { %v273_v30 = vpop.xlane.xlu1 %272 }
 0x225   : > { %1280 = vrcp.f32 %v273_v30 }
 0x228   : > { %v365_v35 = vpop.permute.xlu1 %364 }
 0x22b   : > { %v1279_v31 = vpop.eup %1278 }
 0x22c   : > { %v280_v34 = vmul.f32 %v1279_v31, %v1275_v17 }
 0x22f   : > { %v1281_v32 = vpop.eup %1280 }
 0x230   : > { %v278_v33 = vmul.f32 %v1281_v32, %v1277_v19 }
 0x232   : > { %1148 = vmatprep.mubr.msk.f32.mxu1 %vm258_vm2, %v278_v33 }
 0x233   : > { %1149 = vmatmul.mubr.msk.f32.vlgmr.msra.gmra.mrb[0].mxu1 %vm258_vm2, %v280_v34 }
 0x234   : > { %1208 = vmatpush3.bf16.xpose.msk.msra.mxu1 %vm1351_vm1, %v1203_v27  ;;  %1155 = vmatprep.mubr.msk.f32.mxu1 %vm170_vm0, %v363_v28 }
 0x23b   : > { %1156 = vmatmul.mubr.msk.f32.vlgmr.msra.gmra.mrb[2].mxu1 %vm170_vm0, %v365_v35 }
 0x306   : > { %v1396_v36 = vpop.f32.mrb[0].mxu1 }
 0x307   : > { %v1398_v37 = vpop.f32.mrb[1].mxu1 }
 0x30e   : > { %v1157_v38 = vpop.f32.mrb[2].mxu1 }
 0x30f   : > { %v444_v39 = vpop.f32.mrb[3].mxu1  ;;  %v456_v40 = vsel %vm258_vm2, %v1157_v38, -inf }
 0x310   : > { %457 = vmax.xlane.f32.xlu0 %v456_v40  ;;  %v453_v41 = vsel %vm258_vm2, %v444_v39, -inf }
 0x311   : > { %454 = vmax.xlane.f32.xlu1 %v453_v41 }
 0x322   : > { %1250 = vrot.lane.b32.xlu1 %v1402_v42, %s1314_s19 }
 0x326   : > { %564 = vrot.lane.b32.xlu1 %v1362_v3, %s1315_s20 }
 0x32a   : > { %566 = vrot.lane.b32.xlu1 %v1370_v5, %s1315_s20 }
 0x39d   : > { %v458_v43 = vpop.xlane.xlu0 %457 }
 0x39e   : > { %v460_v44 = vsub.f32 %v1157_v38, %v458_v43  ;;  %v455_v45 = vpop.xlane.xlu1 %454 }
 0x39f   : > { %v459_v46 = vsub.f32 %v444_v39, %v455_v45 }
 0x3a0   : > { %v463_v47 = vmul.f32 1.442695, %v460_v44 }
 0x3a1   : > { %v461_v48 = vmul.f32 1.442695, %v459_v46 }
 0x3a2   : > { %1282 = vpow2.f32 %v463_v47  ;;  %v1251_v53 = vpop.permute.xlu1 %1250 }
 0x3a3   : > { %1284 = vpow2.f32 %v461_v48  ;;  %v1253_v54 = vunpack.i.h.bf16 %v1251_v53  ;;  %v1252_v55 = vunpack.i.l.bf16 %v1251_v53 }
 0x3a5   : > { %v1209_v56 = vpack.c.bf16 %v1253_v54, %v1252_v55 }
 0x3a6   : > { %v565_v6 = vpop.permute.xlu1 %564 }
 0x3a7   : > { %1210 = vmatprep.subr.bf16.mxu0 %v1209_v56 }
 0x3a8   : > { %1212 = vmatpush3.bf16.msra.mxu0 %v1209_v56 }
 0x3aa   : > { %v567_v7 = vpop.permute.xlu1 %566 }
 0x3ac   : > { %v1283_v49 = vpop.eup %1282 }
 0x3ad   : > { %v468_v50 = vsel %vm258_vm2, %v1283_v49, 0.0  ;;  %v1285_v51 = vpop.eup %1284 }
 0x3ae   : > { %469 = vadd.xlane.f32.xlu0 %v468_v50  ;;  %v465_v52 = vsel %vm258_vm2, %v1285_v51, 0.0 }
 0x3b2   : > { %466 = vadd.xlane.f32.xlu0 %v465_v52 }
 0x3c8   : > { %1255 = vrot.lane.b32.xlu0 %v1378_v10, %s1315_s20 }
 0x43b   : > { %v470_v57 = vpop.xlane.xlu0 %469 }
 0x43c   : > { %1286 = vrcp.f32 %v470_v57 }
 0x43f   : > { %v467_v58 = vpop.xlane.xlu0 %466 }
 0x440   : > { %1288 = vrcp.f32 %v467_v58 }
 0x443   : > { %v1256_v59 = vpop.permute.xlu0 %1255 }
 0x444   : > { %v1258_v60 = vunpack.i.h.bf16 %v1256_v59  ;;  %v1257_v61 = vunpack.i.l.bf16 %v1256_v59 }
 0x446   : > { %v1213_v62 = vpack.c.bf16 %v1258_v60, %v1257_v61  ;;  %v1287_v63 = vpop.eup %1286 }
 0x447   : > { %v474_v4 = vmul.f32 %v1287_v63, %v1283_v49 }
 0x448   : > { %1215 = vmatprep.subr.msk.bf16.mxu0 %vm1351_vm1, %v1213_v62 }
 0x44a   : > { %v1289_v1 = vpop.eup %1288 }
 0x44b   : > { %v472_v2 = vmul.f32 %v1289_v1, %v1285_v51 }
 0x44d   : > { %1162 = vmatprep.mubr.msk.f32.mxu0 %vm258_vm2, %v472_v2 }
 0x44e   : > { %1163 = vmatmul.mubr.msk.f32.vlgmr.msra.gmra.mrb[2].mxu0 %vm258_vm2, %v474_v4 }
 0x44f   : > { %1218 = vmatpush3.bf16.xpose.msk.msra.mxu0 %vm1351_vm1, %v1213_v62  ;;  %1169 = vmatprep.mubr.msk.f32.mxu0 %vm170_vm0, %v565_v6 }
 0x456   : > { %1170 = vmatmul.mubr.msk.f32.vlgmr.msra.gmra.mrb[4].mxu0 %vm170_vm0, %v567_v7 }
 0x521   : > { %v1164_v8 = vpop.f32.mrb[2].mxu0 }
 0x522   : > { %v1422_v9 = vpop.f32.mrb[3].mxu0 }
 0x529   : > { %v1171_v11 = vpop.f32.mrb[4].mxu0 }
 0x52a   : > { %v646_v12 = vpop.f32.mrb[5].mxu0  ;;  %v658_v13 = vsel %vm258_vm2, %v1171_v11, -inf }
 0x52b   : > { %659 = vmax.xlane.f32.xlu0 %v658_v13  ;;  %v655_v14 = vsel %vm258_vm2, %v646_v12, -inf }
 0x52c   : > { %656 = vmax.xlane.f32.xlu1 %v655_v14 }
 0x53d   : > { %1260 = vrot.lane.b32.xlu1 %v1402_v42, %s1315_s20 }
 0x541   : > { %764 = vrot.lane.b32.xlu1 %v1362_v3, %s1316_s21 }
 0x545   : > { %766 = vrot.lane.b32.xlu1 %v1370_v5, %s1316_s21 }
 0x5b8   : > { %v660_v15 = vpop.xlane.xlu0 %659 }
 0x5b9   : > { %v662_v16 = vsub.f32 %v1171_v11, %v660_v15  ;;  %v657_v17 = vpop.xlane.xlu1 %656 }
 0x5ba   : > { %v661_v18 = vsub.f32 %v646_v12, %v657_v17 }
 0x5bb   : > { %v665_v19 = vmul.f32 1.442695, %v662_v16 }
 0x5bc   : > { %v663_v20 = vmul.f32 1.442695, %v661_v18 }
 0x5bd   : > { %1290 = vpow2.f32 %v665_v19  ;;  %v1261_v3 = vpop.permute.xlu1 %1260 }
 0x5be   : > { %1292 = vpow2.f32 %v663_v20  ;;  %v1263_v25 = vunpack.i.h.bf16 %v1261_v3  ;;  %v1262_v26 = vunpack.i.l.bf16 %v1261_v3 }
 0x5c0   : > { %v1219_v5 = vpack.c.bf16 %v1263_v25, %v1262_v26 }
 0x5c1   : > { %v765_v39 = vpop.permute.xlu1 %764 }
 0x5c2   : > { %1220 = vmatprep.subr.bf16.mxu1 %v1219_v5 }
 0x5c3   : > { %1222 = vmatpush3.bf16.msra.mxu1 %v1219_v5 }
 0x5c7   : > { %v1291_v21 = vpop.eup %1290 }
 0x5c8   : > { %v670_v22 = vsel %vm258_vm2, %v1291_v21, 0.0  ;;  %v1293_v23 = vpop.eup %1292 }
 0x5c9   : > { %671 = vadd.xlane.f32.xlu0 %v670_v22  ;;  %v667_v24 = vsel %vm258_vm2, %v1293_v23, 0.0 }
 0x5cd   : > { %668 = vadd.xlane.f32.xlu0 %v667_v24 }
 0x5e3   : > { %1265 = vrot.lane.b32.xlu0 %v1378_v10, %s1316_s21  ;;  %v767_v10 = vpop.permute.xlu1 %766 }
 0x656   : > { %v672_v27 = vpop.xlane.xlu0 %671 }
 0x657   : > { %1294 = vrcp.f32 %v672_v27 }
 0x65a   : > { %v669_v28 = vpop.xlane.xlu0 %668 }
 0x65b   : > { %1296 = vrcp.f32 %v669_v28 }
 0x65e   : > { %v1266_v29 = vpop.permute.xlu0 %1265 }
 0x65f   : > { %v1268_v30 = vunpack.i.h.bf16 %v1266_v29  ;;  %v1267_v31 = vunpack.i.l.bf16 %v1266_v29 }
 0x661   : > { %v1223_v32 = vpack.c.bf16 %v1268_v30, %v1267_v31  ;;  %v1295_v33 = vpop.eup %1294 }
 0x662   : > { %v676_v38 = vmul.f32 %v1295_v33, %v1291_v21 }
 0x663   : > { %1225 = vmatprep.subr.msk.bf16.mxu1 %vm1351_vm1, %v1223_v32 }
 0x665   : > { %v1297_v34 = vpop.eup %1296 }
 0x666   : > { %v674_v35 = vmul.f32 %v1297_v34, %v1293_v23 }
 0x668   : > { %1176 = vmatprep.mubr.msk.f32.mxu1 %vm258_vm2, %v674_v35 }
 0x669   : > { %1177 = vmatmul.mubr.msk.f32.vlgmr.msra.gmra.mrb[4].mxu1 %vm258_vm2, %v676_v38 }
 0x66a   : > { %1228 = vmatpush3.bf16.xpose.msk.msra.mxu1 %vm1351_vm1, %v1223_v32  ;;  %1183 = vmatprep.mubr.msk.f32.mxu1 %vm170_vm0, %v765_v39 }
 0x671   : > { %1184 = vmatmul.mubr.msk.f32.vlgmr.msra.gmra.mrb[6].mxu1 %vm170_vm0, %v767_v10 }
 0x73c   : > { %v1178_v40 = vpop.f32.mrb[4].mxu1 }
 0x73d   : > { %v755_v41 = vpop.f32.mrb[5].mxu1 }
 0x744   : > { %v1185_v43 = vpop.f32.mrb[6].mxu1 }
 0x745   : > { %v846_v44 = vpop.f32.mrb[7].mxu1  ;;  %v858_v45 = vsel %vm258_vm2, %v1185_v43, -inf }
 0x746   : > { %859 = vmax.xlane.f32.xlu0 %v858_v45  ;;  %v855_v46 = vsel %vm258_vm2, %v846_v44, -inf }
 0x747   : > { %856 = vmax.xlane.f32.xlu1 %v855_v46 }
 0x758   : > { %1270 = vrot.lane.b32.xlu1 %v1402_v42, %s1316_s21 }
 0x75c   : > { %968 = vrot.lane.b32.xlu1 %v1164_v8, %s1316_s21 }
 0x760   : > { %974 = vrot.lane.b32.xlu1 %v755_v41, %s1315_s20 }
 0x764   : > { %976 = vrot.lane.b32.xlu1 %v1178_v40, %s1315_s20 }
 0x7d3   : > { %v860_v0 = vpop.xlane.xlu0 %859 }
 0x7d4   : > { %v862_v47 = vsub.f32 %v1185_v43, %v860_v0  ;;  %v857_v48 = vpop.xlane.xlu1 %856 }
 0x7d5   : > { %v861_v49 = vsub.f32 %v846_v44, %v857_v48 }
 0x7d6   : > { %v865_v50 = vmul.f32 1.442695, %v862_v47 }
 0x7d7   : > { %v863_v51 = vmul.f32 1.442695, %v861_v49 }
 0x7d8   : > { %v1271_v52 = vpop.permute.xlu1 %1270 }
 0x7d9   : > { %1298 = vpow2.f32 %v863_v51  ;;  %v1273_v53 = vunpack.i.h.bf16 %v1271_v52  ;;  %v1272_v54 = vunpack.i.l.bf16 %v1271_v52 }
 0x7da   : > { %1300 = vpow2.f32 %v865_v50 }
 0x7db   : > { %v1229_v55 = vpack.c.bf16 %v1273_v53, %v1272_v54 }
 0x7dc   : > { %v969_v6 = vpop.permute.xlu1 %968 }
 0x7dd   : > { %1230 = vmatprep.subr.bf16.mxu0 %v1229_v55  ;;  %v989_v12 = vsel %vm170_vm0, %v1396_v36, %v969_v6 }
 0x7de   : > { %1232 = vmatpush3.bf16.msra.mxu0 %v1229_v55 }
 0x7e0   : > { %v975_v7 = vpop.permute.xlu1 %974 }
 0x7e3   : > { %v1299_v42 = vpop.eup %1298 }
 0x7e4   : > { %v867_v56 = vsel %vm258_vm2, %v1299_v42, 0.0  ;;  %v1301_v57 = vpop.eup %1300 }
 0x7e5   : > { %868 = vadd.xlane.f32.xlu0 %v867_v56  ;;  %v870_v58 = vsel %vm258_vm2, %v1301_v57, 0.0 }
 0x7e9   : > { %871 = vadd.xlane.f32.xlu0 %v870_v58 }
 0x7ff   : > { %966 = vrot.lane.b32.xlu0 %v1422_v9, %s1316_s21  ;;  %v977_v9 = vpop.permute.xlu1 %976 }
 0x800   : > { %v992_v13 = vsel %vm990_vm3, %v989_v12, %v977_v9 }
 0x872   : > { %v869_v59 = vpop.xlane.xlu0 %868 }
 0x873   : > { %1302 = vrcp.f32 %v869_v59 }
 0x876   : > { %v872_v60 = vpop.xlane.xlu0 %871 }
 0x877   : > { %1304 = vrcp.f32 %v872_v60 }
 0x87a   : > { %v967_v8 = vpop.permute.xlu0 %966 }
 0x87b   : > { %v988_v11 = vsel %vm170_vm0, %v1398_v37, %v967_v8 }
 0x87c   : > { %v991_v16 = vsel %vm990_vm3, %v988_v11, %v975_v7 }
 0x87d   : > { %v1303_v61 = vpop.eup %1302 }
 0x87e   : > { %v874_v62 = vmul.f32 %v1303_v61, %v1299_v42 }
 0x880   : > { %1190 = vmatprep.mubr.msk.f32.mxu0 %vm258_vm2, %v874_v62 }
 0x881   : > { %v1305_v63 = vpop.eup %1304 }
 0x882   : > { %v876_v1 = vmul.f32 %v1305_v63, %v1301_v57 }
 0x884   : > { %1191 = vmatmul.mubr.msk.f32.vlgmr.msra.gmra.mrb[6].mxu0 %vm258_vm2, %v876_v1 }
 0x957   : > { %v1192_v2 = vpop.f32.mrb[6].mxu0 }
 0x958   : > { %984 = vrot.lane.b32.xlu1 %v1192_v2, %s1314_s19  ;;  %v955_v4 = vpop.f32.mrb[7].mxu0 }
 0x959   : > { %982 = vrot.lane.b32.xlu0 %v955_v4, %s1314_s19 }
 0x9ca   : > { %v985_v14 = vpop.permute.xlu1 %984 }
 0x9cb   : > { %v995_v15 = vsel %vm993_vm4, %v992_v13, %v985_v14  ;;  %v983_v17 = vpop.permute.xlu0 %982 }
 0x9cc   : > { %997 = vst [vmem:[%s163_s24 + $0x8] sm:$0xff] %v995_v15  ;;  %v994_v18 = vsel %vm993_vm4, %v991_v16, %v983_v17 }
 0x9cd   : > { %996 = vst [vmem:[%s163_s24] sm:$0xff] %v994_v18 }
 0x9ce PF: > { %s12_s9 = sadd.s32 1, %s1312_s9  }
 0x9cf   : > { %p9_p4 = scmp.ge.s32.totalorder %s12_s9, 4  }
 0x9d1   :  { %11 = sbr.rel (!%p9_p4) target bundleno = 1 (0x1), region = 61 }

// kernel: soft_text_decoder_forward.27
= control target key start
LH: loop header
LB: loop body
LE: loop exit
PB: predicated region body
PF: predicated region fallthrough
CT: control target
= control target key end

     0   :  { %s735_s1 = inlined_call_operand.vmem [shape: f32[512,128], index: 1, kind: input, shape index: {}]   ;;  %s736_s0 = inlined_call_operand.vmem [shape: f32[32,512], index: 0, kind: input, shape index: {}]   ;;  %s737_s2 = inlined_call_operand.vmem [shape: f32[1,128], index: 2, kind: input, shape index: {}]   ;;  %s738_s3 = inlined_call_operand.vmem [shape: f32[32,128], index: 3, kind: input, shape index: {}]   ;;  %s739_s4 = inlined_call_operand.vmem [shape: f32[32,128], index: 4, kind: output, shape index: {}]  }
   0x1   :  { %v49_v0 = vld [vmem:[%s735_s1 + $0x80] sm:$0xff]  ;;  %v50_v1 = vld [vmem:[%s735_s1 + $0x88] sm:$0xff]  ;;  %v51_v11 = vld [vmem:[%s735_s1 + $0x90] sm:$0xff] }
   0x2   :  { %v33_v2 = vld [vmem:[%s735_s1] sm:$0xff]  ;;  %v379_v3 = vpack.c.bf16 %v50_v1, %v49_v0  ;;  %v34_v4 = vld [vmem:[%s735_s1 + $0x8] sm:$0xff]  ;;  %v52_v13 = vld [vmem:[%s735_s1 + $0x98] sm:$0xff] }
   0x3   :  { %v81_v5 = vld [vmem:[%s735_s1 + $0x180] sm:$0xff]  ;;  %v82_v6 = vld [vmem:[%s735_s1 + $0x188] sm:$0xff]  ;;  %v381_v7 = vpack.c.bf16 %v34_v4, %v33_v2  ;;  %v35_v14 = vld [vmem:[%s735_s1 + $0x10] sm:$0xff]  ;;  %v383_v16 = vpack.c.bf16 %v52_v13, %v51_v11 }
   0x4   :  { %v411_v8 = vpack.c.bf16 %v82_v6, %v81_v5  ;;  %v65_v9 = vld [vmem:[%s735_s1 + $0x100] sm:$0xff]  ;;  %v66_v10 = vld [vmem:[%s735_s1 + $0x108] sm:$0xff]  ;;  %380 = vmatprep.subr.bf16.mxu0 %v379_v3  ;;  %v36_v15 = vld [vmem:[%s735_s1 + $0x18] sm:$0xff] }
   0x5   :  { %v413_v12 = vpack.c.bf16 %v66_v10, %v65_v9  ;;  %382 = vmatpush3.bf16.msra.mxu0 %v381_v7  ;;  %v385_v17 = vpack.c.bf16 %v36_v15, %v35_v14  ;;  %v83_v18 = vld [vmem:[%s735_s1 + $0x190] sm:$0xff]  ;;  %v84_v19 = vld [vmem:[%s735_s1 + $0x198] sm:$0xff]  ;;  %v53_v23 = vld [vmem:[%s735_s1 + $0xa0] sm:$0xff] }
   0x6   :  { %412 = vmatprep.subr.bf16.mxu1 %v411_v8  ;;  %v67_v20 = vld [vmem:[%s735_s1 + $0x110] sm:$0xff]  ;;  %v415_v21 = vpack.c.bf16 %v84_v19, %v83_v18  ;;  %v68_v22 = vld [vmem:[%s735_s1 + $0x118] sm:$0xff]  ;;  %v54_v24 = vld [vmem:[%s735_s1 + $0xa8] sm:$0xff]  ;;  %384 = vmatprep.subr.bf16.mxu0 %v383_v16 }
   0x7   :  { %414 = vmatpush3.bf16.msra.mxu1 %v413_v12  ;;  %v417_v25 = vpack.c.bf16 %v68_v22, %v67_v20  ;;  %v387_v26 = vpack.c.bf16 %v54_v24, %v53_v23  ;;  %v37_v27 = vld [vmem:[%s735_s1 + $0x20] sm:$0xff]  ;;  %v38_v28 = vld [vmem:[%s735_s1 + $0x28] sm:$0xff]  ;;  %v55_v35 = vld [vmem:[%s735_s1 + $0xb0] sm:$0xff] }
   0x8   :  { %v85_v29 = vld [vmem:[%s735_s1 + $0x1a0] sm:$0xff]  ;;  %416 = vmatprep.subr.bf16.mxu1 %v415_v21  ;;  %v86_v30 = vld [vmem:[%s735_s1 + $0x1a8] sm:$0xff]  ;;  %v389_v33 = vpack.c.bf16 %v38_v28, %v37_v27  ;;  %v56_v36 = vld [vmem:[%s735_s1 + $0xb8] sm:$0xff] }
   0x9   :  { %v69_v31 = vld [vmem:[%s735_s1 + $0x120] sm:$0xff]  ;;  %v70_v32 = vld [vmem:[%s735_s1 + $0x128] sm:$0xff]  ;;  %386 = vmatpush3.bf16.msra.mxu0 %v385_v17  ;;  %v419_v34 = vpack.c.bf16 %v86_v30, %v85_v29  ;;  %v39_v37 = vld [vmem:[%s735_s1 + $0x30] sm:$0xff]  ;;  %v391_v39 = vpack.c.bf16 %v56_v36, %v55_v35 }
   0xa   :  { %388 = vmatprep.subr.bf16.mxu0 %v387_v26  ;;  %v421_v38 = vpack.c.bf16 %v70_v32, %v69_v31  ;;  %v40_v40 = vld [vmem:[%s735_s1 + $0x38] sm:$0xff]  ;;  %v87_v41 = vld [vmem:[%s735_s1 + $0x1b0] sm:$0xff]  ;;  %v57_v46 = vld [vmem:[%s735_s1 + $0xc0] sm:$0xff] }
   0xb   :  { %418 = vmatpush3.bf16.msra.mxu1 %v417_v25  ;;  %v88_v42 = vld [vmem:[%s735_s1 + $0x1b8] sm:$0xff]  ;;  %v71_v44 = vld [vmem:[%s735_s1 + $0x130] sm:$0xff]  ;;  %v58_v47 = vld [vmem:[%s735_s1 + $0xc8] sm:$0xff]  ;;  %v393_v48 = vpack.c.bf16 %v40_v40, %v39_v37 }
   0xc   :  { %420 = vmatprep.subr.bf16.mxu1 %v419_v34  ;;  %v423_v43 = vpack.c.bf16 %v88_v42, %v87_v41  ;;  %v72_v45 = vld [vmem:[%s735_s1 + $0x138] sm:$0xff]  ;;  %v89_v49 = vld [vmem:[%s735_s1 + $0x1c0] sm:$0xff]  ;;  %v90_v50 = vld [vmem:[%s735_s1 + $0x1c8] sm:$0xff]  ;;  %v395_v52 = vpack.c.bf16 %v58_v47, %v57_v46 }
   0xd   :  { %390 = vmatpush3.bf16.msra.mxu0 %v389_v33  ;;  %v425_v51 = vpack.c.bf16 %v72_v45, %v71_v44  ;;  %v41_v53 = vld [vmem:[%s735_s1 + $0x40] sm:$0xff]  ;;  %v42_v54 = vld [vmem:[%s735_s1 + $0x48] sm:$0xff]  ;;  %v427_v56 = vpack.c.bf16 %v90_v50, %v89_v49  ;;  %v59_v58 = vld [vmem:[%s735_s1 + $0xd0] sm:$0xff] }
   0xe   :  { %392 = vmatprep.subr.bf16.mxu0 %v391_v39  ;;  %v73_v55 = vld [vmem:[%s735_s1 + $0x140] sm:$0xff]  ;;  %v74_v57 = vld [vmem:[%s735_s1 + $0x148] sm:$0xff]  ;;  %v60_v59 = vld [vmem:[%s735_s1 + $0xd8] sm:$0xff]  ;;  %v397_v62 = vpack.c.bf16 %v42_v54, %v41_v53 }
   0xf   :  { %422 = vmatpush3.bf16.msra.mxu1 %v421_v38  ;;  %v91_v60 = vld [vmem:[%s735_s1 + $0x1d0] sm:$0xff]  ;;  %v92_v61 = vld [vmem:[%s735_s1 + $0x1d8] sm:$0xff]  ;;  %v429_v63 = vpack.c.bf16 %v74_v57, %v73_v55  ;;  %v399_v0 = vpack.c.bf16 %v60_v59, %v59_v58  ;;  %v61_v6 = vld [vmem:[%s735_s1 + $0xe0] sm:$0xff] }
  0x10   :  { %424 = vmatprep.subr.bf16.mxu1 %v423_v43  ;;  %v43_v1 = vld [vmem:[%s735_s1 + $0x50] sm:$0xff]  ;;  %v44_v2 = vld [vmem:[%s735_s1 + $0x58] sm:$0xff]  ;;  %v431_v4 = vpack.c.bf16 %v92_v61, %v91_v60  ;;  %v62_v7 = vld [vmem:[%s735_s1 + $0xe8] sm:$0xff] }
  0x11   :  { %394 = vmatpush3.bf16.msra.mxu0 %v393_v48  ;;  %v75_v3 = vld [vmem:[%s735_s1 + $0x150] sm:$0xff]  ;;  %v76_v5 = vld [vmem:[%s735_s1 + $0x158] sm:$0xff]  ;;  %v93_v8 = vld [vmem:[%s735_s1 + $0x1e0] sm:$0xff]  ;;  %v401_v10 = vpack.c.bf16 %v44_v2, %v43_v1  ;;  %v403_v14 = vpack.c.bf16 %v62_v7, %v61_v6 }
  0x12   :  { %396 = vmatprep.subr.bf16.mxu0 %v395_v52  ;;  %v94_v9 = vld [vmem:[%s735_s1 + $0x1e8] sm:$0xff]  ;;  %v45_v11 = vld [vmem:[%s735_s1 + $0x60] sm:$0xff]  ;;  %v433_v13 = vpack.c.bf16 %v76_v5, %v75_v3  ;;  %v63_v19 = vld [vmem:[%s735_s1 + $0xf0] sm:$0xff] }
  0x13   :  { %426 = vmatpush3.bf16.msra.mxu1 %v425_v51  ;;  %v46_v12 = vld [vmem:[%s735_s1 + $0x68] sm:$0xff]  ;;  %v77_v15 = vld [vmem:[%s735_s1 + $0x160] sm:$0xff]  ;;  %v435_v18 = vpack.c.bf16 %v94_v9, %v93_v8  ;;  %v64_v20 = vld [vmem:[%s735_s1 + $0xf8] sm:$0xff] }
  0x14   :  { %428 = vmatprep.subr.bf16.mxu1 %v427_v56  ;;  %v78_v16 = vld [vmem:[%s735_s1 + $0x168] sm:$0xff]  ;;  %v20_v21 = vld [vmem:[%s736_s0 + $0x18] sm:$0xff]  ;;  %v95_v22 = vld [vmem:[%s735_s1 + $0x1f0] sm:$0xff]  ;;  %v405_v24 = vpack.c.bf16 %v46_v12, %v45_v11  ;;  %v407_v26 = vpack.c.bf16 %v64_v20, %v63_v19 }
  0x15   :  { %398 = vmatpush3.bf16.msra.mxu0 %v397_v62  ;;  %v18_v17 = vld [vmem:[%s736_s0 + $0x8] sm:$0xff]  ;;  %v96_v23 = vld [vmem:[%s735_s1 + $0x1f8] sm:$0xff]  ;;  %253 = vmatprep.mubr.f32.mxu1 %v20_v21  ;;  %v437_v25 = vpack.c.bf16 %v78_v16, %v77_v15  ;;  %v47_v27 = vld [vmem:[%s735_s1 + $0x70] sm:$0xff] }
  0x16   :  { %400 = vmatprep.subr.bf16.mxu0 %v399_v0  ;;  %168 = vmatprep.mubr.f32.mxu0 %v18_v17  ;;  %v48_v28 = vld [vmem:[%s735_s1 + $0x78] sm:$0xff]  ;;  %v439_v29 = vpack.c.bf16 %v96_v23, %v95_v22  ;;  %v79_v30 = vld [vmem:[%s735_s1 + $0x170] sm:$0xff]  ;;  %v17_v34 = vld [vmem:[%s736_s0] sm:$0xff] }
  0x17   :  { %430 = vmatpush3.bf16.msra.mxu1 %v429_v63  ;;  %v80_v31 = vld [vmem:[%s735_s1 + $0x178] sm:$0xff]  ;;  %v409_v32 = vpack.c.bf16 %v48_v28, %v47_v27  ;;  %v19_v35 = vld [vmem:[%s736_s0 + $0x10] sm:$0xff]  ;;  %v22_v36 = vld [vmem:[%s736_s0 + $0x28] sm:$0xff] }
  0x18   :  { %432 = vmatprep.subr.bf16.mxu1 %v431_v4  ;;  %v441_v33 = vpack.c.bf16 %v80_v31, %v79_v30  ;;  %v24_v37 = vld [vmem:[%s736_s0 + $0x38] sm:$0xff]  ;;  %v21_v38 = vld [vmem:[%s736_s0 + $0x20] sm:$0xff]  ;;  %v23_v39 = vld [vmem:[%s736_s0 + $0x30] sm:$0xff] }
  0x19   :  { %402 = vmatpush3.bf16.msra.mxu0 %v401_v10  ;;  %v26_v40 = vld [vmem:[%s736_s0 + $0x48] sm:$0xff]  ;;  %v28_v41 = vld [vmem:[%s736_s0 + $0x58] sm:$0xff]  ;;  %v25_v42 = vld [vmem:[%s736_s0 + $0x40] sm:$0xff] }
  0x1a   :  { %404 = vmatprep.subr.bf16.mxu0 %v403_v14  ;;  %v27_v43 = vld [vmem:[%s736_s0 + $0x50] sm:$0xff]  ;;  %v30_v44 = vld [vmem:[%s736_s0 + $0x68] sm:$0xff]  ;;  %v32_v45 = vld [vmem:[%s736_s0 + $0x78] sm:$0xff] }
  0x1b   :  { %434 = vmatpush3.bf16.msra.mxu1 %v433_v13  ;;  %v29_v46 = vld [vmem:[%s736_s0 + $0x60] sm:$0xff]  ;;  %v31_v47 = vld [vmem:[%s736_s0 + $0x70] sm:$0xff]  ;;  %v275_v3 = vld [vmem:[%s738_s3 + $0x8] sm:$0xff] }
  0x1c   :  { %436 = vmatprep.subr.bf16.mxu1 %v435_v18  ;;  %v290_v49 = vld [vmem:[%s737_s2] ss:$0 sm:$0xff]  ;;  %v276_v13 = vld [vmem:[%s738_s3 + $0x10] sm:$0xff]  ;;  %v277_v22 = vld [vmem:[%s738_s3 + $0x18] sm:$0xff] }
  0x1d   :  { %406 = vmatpush3.bf16.msra.mxu0 %v405_v24  ;;  %v274_v57 = vld [vmem:[%s738_s3] sm:$0xff] }
  0x1e   :  { %408 = vmatprep.subr.bf16.mxu0 %v407_v26 }
  0x1f   :  { %438 = vmatpush3.bf16.msra.mxu1 %v437_v25 }
  0x20   :  { %440 = vmatprep.subr.bf16.mxu1 %v439_v29 }
  0x21   :  { %410 = vmatpush3.bf16.msra.mxu0 %v409_v32 }
  0x23   :  { %442 = vmatpush3.bf16.msra.mxu1 %v441_v33 }
  0x24   :  { %169 = vmatmul.mubr.f32.vlgmr.msra.gmra.mrb[0].mxu0 %v17_v34 }
  0x25   :  { %173 = vmatprep.mubr.f32.mxu0 %v22_v36 }
  0x26   :  { %254 = vmatmul.mubr.f32.vlgmr.msra.gmra.mrb[0].mxu1 %v19_v35 }
  0x27   :  { %258 = vmatprep.mubr.f32.mxu1 %v24_v37 }
  0x28   :  { %174 = vmatmul.mubr.f32.gmra.mrb[2].mxu0 %v21_v38 }
  0x29   :  { %178 = vmatprep.mubr.f32.mxu0 %v26_v40 }
  0x2a   :  { %259 = vmatmul.mubr.f32.gmra.mrb[2].mxu1 %v23_v39 }
  0x2b   :  { %263 = vmatprep.mubr.f32.mxu1 %v28_v41 }
  0x2c   :  { %179 = vmatmul.mubr.f32.gmra.mrb[4].mxu0 %v25_v42 }
  0x2d   :  { %183 = vmatprep.mubr.f32.mxu0 %v30_v44 }
  0x2e   :  { %264 = vmatmul.mubr.f32.gmra.mrb[4].mxu1 %v27_v43 }
  0x2f   :  { %268 = vmatprep.mubr.f32.mxu1 %v32_v45 }
  0x30   :  { %184 = vmatmul.mubr.f32.gmra.mrb[6].mxu0 %v29_v46 }
  0x32   :  { %269 = vmatmul.mubr.f32.gmra.mrb[6].mxu1 %v31_v47 }
  0xf7   :  { %v323_v48 = vpop.f32.mrb[0].mxu0 }
  0xf8   :  { %v324_v50 = vpop.f32.mrb[1].mxu0 }
  0xf9   :  { %v367_v51 = vpop.f32.mrb[0].mxu1  ;;  %v325_v52 = vadd.f32 %v324_v50, %v323_v48 }
  0xfa   :  { %v368_v53 = vpop.f32.mrb[1].mxu1 }
  0xfb   :  { %v369_v54 = vadd.f32 %v368_v53, %v367_v51  ;;  %v171_v55 = vadd.f32 %v325_v52, %v290_v49  ;;  %v326_v56 = vpop.f32.mrb[2].mxu0 }
  0xfc   :  { %v327_v58 = vpop.f32.mrb[3].mxu0 }
  0xfd   :  { %v370_v59 = vpop.f32.mrb[2].mxu1  ;;  %v256_v60 = vadd.f32 %v369_v54, %v171_v55  ;;  %v328_v61 = vadd.f32 %v327_v58, %v326_v56 }
  0xfe   :  { %v371_v62 = vpop.f32.mrb[3].mxu1 }
  0xff   :  { %v372_v63 = vadd.f32 %v371_v62, %v370_v59  ;;  %v278_v0 = vadd.f32 %v274_v57, %v256_v60  ;;  %v176_v1 = vadd.f32 %v328_v61, %v290_v49  ;;  %v329_v2 = vpop.f32.mrb[4].mxu0 }
 0x100   :  { %v330_v4 = vpop.f32.mrb[5].mxu0 }
 0x101   :  { %v373_v5 = vpop.f32.mrb[4].mxu1  ;;  %282 = vst [vmem:[%s739_s4] sm:$0xff] %v278_v0  ;;  %v261_v6 = vadd.f32 %v372_v63, %v176_v1  ;;  %v331_v7 = vadd.f32 %v330_v4, %v329_v2 }
 0x102   :  { %v374_v8 = vpop.f32.mrb[5].mxu1 }
 0x103   :  { %v375_v9 = vadd.f32 %v374_v8, %v373_v5  ;;  %v279_v10 = vadd.f32 %v275_v3, %v261_v6  ;;  %v181_v11 = vadd.f32 %v331_v7, %v290_v49  ;;  %v332_v12 = vpop.f32.mrb[6].mxu0 }
 0x104   :  { %v333_v14 = vpop.f32.mrb[7].mxu0 }
 0x105   :  { %v376_v15 = vpop.f32.mrb[6].mxu1  ;;  %283 = vst [vmem:[%s739_s4 + $0x8] sm:$0xff] %v279_v10  ;;  %v266_v16 = vadd.f32 %v375_v9, %v181_v11  ;;  %v334_v17 = vadd.f32 %v333_v14, %v332_v12 }
 0x106   :  { %v377_v18 = vpop.f32.mrb[7].mxu1 }
 0x107   :  { %v378_v19 = vadd.f32 %v377_v18, %v376_v15  ;;  %v280_v20 = vadd.f32 %v276_v13, %v266_v16  ;;  %v186_v21 = vadd.f32 %v334_v17, %v290_v49 }
 0x109   :  { %284 = vst [vmem:[%s739_s4 + $0x10] sm:$0xff] %v280_v20  ;;  %v271_v23 = vadd.f32 %v378_v19, %v186_v21 }
 0x10b   :  { %v281_v24 = vadd.f32 %v277_v22, %v271_v23 }
 0x10d   :  { %285 = vst [vmem:[%s739_s4 + $0x18] sm:$0xff] %v281_v24 }

// kernel: soft_text_decoder_forward.26
= control target key start
LH: loop header
LB: loop body
LE: loop exit
PB: predicated region body
PF: predicated region fallthrough
CT: control target
= control target key end

     0   :  { %s938_s0 = inlined_call_operand.vmem [shape: f32[32,128], index: 0, kind: input, shape index: {}]   ;;  %s939_s3 = inlined_call_operand.vmem [shape: f32[128,512], index: 3, kind: input, shape index: {}]   ;;  %s940_s1 = inlined_call_operand.vmem [shape: f32[1,128], index: 1, kind: input, shape index: {}]   ;;  %s941_s2 = inlined_call_operand.vmem [shape: f32[1,128], index: 2, kind: input, shape index: {}]   ;;  %s942_s4 = inlined_call_operand.vmem [shape: f32[1,512], index: 4, kind: input, shape index: {}]   ;;  %s943_s5 = inlined_call_operand.vmem [shape: f32[32,512], index: 5, kind: output, shape index: {}]  }
   0x1   :  { %v20_v0 = vld [vmem:[%s938_s0] sm:$0xff]  ;;  %v22_v1 = vld [vmem:[%s938_s0 + $0x10] sm:$0xff]  ;;  %v602_v2 = vld [vmem:[%s938_s0 + $0x8] sm:$0xff] }
   0x2   :  { %24 = vadd.xlane.f32.xlu0 %v20_v0  ;;  %28 = vadd.xlane.f32.xlu1 %v22_v1  ;;  %v607_v3 = vld [vmem:[%s938_s0 + $0x18] sm:$0xff]  ;;  %v92_v4 = vld [vmem:[%s939_s3 + $0x8] sm:$0xff]  ;;  %v91_v9 = vld [vmem:[%s939_s3] sm:$0xff] }
   0x3   :  { %v96_v5 = vld [vmem:[%s939_s3 + $0x28] sm:$0xff]  ;;  %v94_v6 = vld [vmem:[%s939_s3 + $0x18] sm:$0xff]  ;;  %v95_v10 = vld [vmem:[%s939_s3 + $0x20] sm:$0xff] }
   0x4   :  { %v457_v7 = vpack.c.bf16 %v96_v5, %v92_v4  ;;  %v98_v8 = vld [vmem:[%s939_s3 + $0x38] sm:$0xff]  ;;  %v459_v12 = vpack.c.bf16 %v95_v10, %v91_v9  ;;  %v93_v13 = vld [vmem:[%s939_s3 + $0x10] sm:$0xff]  ;;  %v100_v15 = vld [vmem:[%s939_s3 + $0x48] sm:$0xff] }
   0x5   :  { %v489_v11 = vpack.c.bf16 %v98_v8, %v94_v6  ;;  %v97_v14 = vld [vmem:[%s939_s3 + $0x30] sm:$0xff]  ;;  %v104_v17 = vld [vmem:[%s939_s3 + $0x68] sm:$0xff]  ;;  %v102_v18 = vld [vmem:[%s939_s3 + $0x58] sm:$0xff] }
   0x6   :  { %26 = vadd.xlane.f32.xlu0 %v602_v2  ;;  %30 = vadd.xlane.f32.xlu1 %v607_v3  ;;  %v491_v16 = vpack.c.bf16 %v97_v14, %v93_v13  ;;  %v106_v19 = vld [vmem:[%s939_s3 + $0x78] sm:$0xff]  ;;  %v461_v20 = vpack.c.bf16 %v104_v17, %v100_v15  ;;  %v99_v22 = vld [vmem:[%s939_s3 + $0x40] sm:$0xff]  ;;  %v101_v24 = vld [vmem:[%s939_s3 + $0x50] sm:$0xff] }
   0x7   :  { %458 = vmatprep.subr.bf16.mxu0 %v457_v7  ;;  %490 = vmatprep.subr.bf16.mxu1 %v489_v11  ;;  %v493_v21 = vpack.c.bf16 %v106_v19, %v102_v18  ;;  %v103_v23 = vld [vmem:[%s939_s3 + $0x60] sm:$0xff]  ;;  %v105_v26 = vld [vmem:[%s939_s3 + $0x70] sm:$0xff]  ;;  %v108_v27 = vld [vmem:[%s939_s3 + $0x88] sm:$0xff] }
   0x8   :  { %460 = vmatpush1.bf16.msra.mxu0 %v459_v12  ;;  %492 = vmatpush1.bf16.msra.mxu1 %v491_v16  ;;  %v463_v25 = vpack.c.bf16 %v103_v23, %v99_v22  ;;  %v112_v28 = vld [vmem:[%s939_s3 + $0xa8] sm:$0xff]  ;;  %v495_v29 = vpack.c.bf16 %v105_v26, %v101_v24  ;;  %v110_v31 = vld [vmem:[%s939_s3 + $0x98] sm:$0xff]  ;;  %v107_v33 = vld [vmem:[%s939_s3 + $0x80] sm:$0xff] }
   0x9   :  { %462 = vmatprep.subr.bf16.mxu0 %v461_v20  ;;  %494 = vmatprep.subr.bf16.mxu1 %v493_v21  ;;  %v465_v30 = vpack.c.bf16 %v112_v28, %v108_v27  ;;  %v114_v32 = vld [vmem:[%s939_s3 + $0xb8] sm:$0xff]  ;;  %v111_v35 = vld [vmem:[%s939_s3 + $0xa0] sm:$0xff]  ;;  %v109_v36 = vld [vmem:[%s939_s3 + $0x90] sm:$0xff] }
   0xa   :  { %v497_v34 = vpack.c.bf16 %v114_v32, %v110_v31  ;;  %v113_v37 = vld [vmem:[%s939_s3 + $0xb0] sm:$0xff]  ;;  %v467_v38 = vpack.c.bf16 %v111_v35, %v107_v33  ;;  %v116_v56 = vld [vmem:[%s939_s3 + $0xc8] sm:$0xff]  ;;  %v118_v58 = vld [vmem:[%s939_s3 + $0xd8] sm:$0xff] }
   0xb   :  { %v499_v39 = vpack.c.bf16 %v113_v37, %v109_v36  ;;  %v120_v57 = vld [vmem:[%s939_s3 + $0xe8] sm:$0xff]  ;;  %v122_v60 = vld [vmem:[%s939_s3 + $0xf8] sm:$0xff]  ;;  %v115_v61 = vld [vmem:[%s939_s3 + $0xc0] sm:$0xff] }
   0xc   :  { %464 = vmatpush1.bf16.msra.mxu0 %v463_v25  ;;  %496 = vmatpush1.bf16.msra.mxu1 %v495_v29  ;;  %v469_v59 = vpack.c.bf16 %v120_v57, %v116_v56  ;;  %v119_v62 = vld [vmem:[%s939_s3 + $0xe0] sm:$0xff]  ;;  %v501_v63 = vpack.c.bf16 %v122_v60, %v118_v58  ;;  %v124_v4 = vld [vmem:[%s939_s3 + $0x108] sm:$0xff]  ;;  %v126_v6 = vld [vmem:[%s939_s3 + $0x118] sm:$0xff] }
   0xd   :  { %466 = vmatprep.subr.bf16.mxu0 %v465_v30  ;;  %498 = vmatprep.subr.bf16.mxu1 %v497_v34  ;;  %v128_v5 = vld [vmem:[%s939_s3 + $0x128] sm:$0xff]  ;;  %v130_v8 = vld [vmem:[%s939_s3 + $0x138] sm:$0xff]  ;;  %v123_v9 = vld [vmem:[%s939_s3 + $0x100] sm:$0xff] }
   0xe   :  { %v473_v7 = vpack.c.bf16 %v128_v5, %v124_v4  ;;  %v127_v10 = vld [vmem:[%s939_s3 + $0x120] sm:$0xff]  ;;  %v505_v11 = vpack.c.bf16 %v130_v8, %v126_v6  ;;  %v125_v13 = vld [vmem:[%s939_s3 + $0x110] sm:$0xff]  ;;  %v132_v16 = vld [vmem:[%s939_s3 + $0x148] sm:$0xff] }
   0xf   :  { %v475_v12 = vpack.c.bf16 %v127_v10, %v123_v9  ;;  %v129_v14 = vld [vmem:[%s939_s3 + $0x130] sm:$0xff]  ;;  %v136_v17 = vld [vmem:[%s939_s3 + $0x168] sm:$0xff]  ;;  %v134_v18 = vld [vmem:[%s939_s3 + $0x158] sm:$0xff] }
  0x10   :  { %468 = vmatpush1.bf16.msra.mxu0 %v467_v38  ;;  %500 = vmatpush1.bf16.msra.mxu1 %v499_v39  ;;  %v507_v15 = vpack.c.bf16 %v129_v14, %v125_v13  ;;  %v477_v19 = vpack.c.bf16 %v136_v17, %v132_v16  ;;  %v138_v20 = vld [vmem:[%s939_s3 + $0x178] sm:$0xff]  ;;  %v131_v21 = vld [vmem:[%s939_s3 + $0x140] sm:$0xff]  ;;  %v133_v25 = vld [vmem:[%s939_s3 + $0x150] sm:$0xff] }
  0x11   :  { %470 = vmatprep.subr.bf16.mxu0 %v469_v59  ;;  %502 = vmatprep.subr.bf16.mxu1 %v501_v63  ;;  %v135_v22 = vld [vmem:[%s939_s3 + $0x160] sm:$0xff]  ;;  %v509_v23 = vpack.c.bf16 %v138_v20, %v134_v18  ;;  %v137_v26 = vld [vmem:[%s939_s3 + $0x170] sm:$0xff]  ;;  %v140_v28 = vld [vmem:[%s939_s3 + $0x188] sm:$0xff]  ;;  %v157_v20 = vlaneseq }
  0x12   :  { %v479_v24 = vpack.c.bf16 %v135_v22, %v131_v21  ;;  %v511_v27 = vpack.c.bf16 %v137_v26, %v133_v25  ;;  %v144_v29 = vld [vmem:[%s939_s3 + $0x1a8] sm:$0xff]  ;;  %v142_v30 = vld [vmem:[%s939_s3 + $0x198] sm:$0xff]  ;;  %v139_v33 = vld [vmem:[%s939_s3 + $0x180] sm:$0xff] }
  0x13   :  { %v481_v31 = vpack.c.bf16 %v144_v29, %v140_v28  ;;  %v146_v32 = vld [vmem:[%s939_s3 + $0x1b8] sm:$0xff]  ;;  %v143_v34 = vld [vmem:[%s939_s3 + $0x1a0] sm:$0xff]  ;;  %v141_v37 = vld [vmem:[%s939_s3 + $0x190] sm:$0xff]  ;;  %v158_v21 = vshrl.u32 %v157_v20, 7 }
  0x14   :  { %v513_v35 = vpack.c.bf16 %v146_v32, %v142_v30  ;;  %v483_v36 = vpack.c.bf16 %v143_v34, %v139_v33  ;;  %v145_v38 = vld [vmem:[%s939_s3 + $0x1b0] sm:$0xff]  ;;  %v148_v39 = vld [vmem:[%s939_s3 + $0x1c8] sm:$0xff]  ;;  %v455_v6 = vld [vmem:[%s940_s1] ss:$0 sm:$0xff] }
  0x15   :  { %v456_v8 = vld [vmem:[%s941_s2] ss:$0 sm:$0xff]  ;;  %v167_v22 = vsub.s32 2, %v158_v21  ;;  %v171_v25 = vsub.s32 3, %v158_v21 }
  0x8f   :  { %v25_v40 = vpop.xlane.xlu0 %24  ;;  %v29_v41 = vpop.xlane.xlu1 %28 }
  0x90   :  { %v33_v42 = vmul.f32 0.0078125, %v25_v40  ;;  %v35_v43 = vmul.f32 0.0078125, %v29_v41  ;;  %v562_v40 = vmov 0.0   ;;  %v515_v41 = vpack.c.bf16 %v145_v38, %v141_v37 }
  0x91   :  { %241 = vmatprep.mubr.f32.mxu0 %v562_v40  ;;  %330 = vmatprep.mubr.f32.mxu1 %v562_v40 }
  0x92   :  { %v683_v44 = vsub.f32 %v20_v0, %v33_v42  ;;  %v685_v45 = vsub.f32 %v22_v1, %v35_v43  ;;  %v471_v0 = vpack.c.bf16 %v119_v62, %v115_v61  ;;  %v117_v1 = vld [vmem:[%s939_s3 + $0xd0] sm:$0xff]  ;;  %v152_v42 = vld [vmem:[%s939_s3 + $0x1e8] sm:$0xff]  ;;  %v150_v43 = vld [vmem:[%s939_s3 + $0x1d8] sm:$0xff] }
  0x93   :  { %v27_v46 = vpop.xlane.xlu0 %26  ;;  %v31_v47 = vpop.xlane.xlu1 %30 }
  0x94   :  { %v34_v48 = vmul.f32 0.0078125, %v27_v46  ;;  %v41_v49 = vmul.f32 %v683_v44, %v683_v44  ;;  %v36_v50 = vmul.f32 0.0078125, %v31_v47  ;;  %v43_v53 = vmul.f32 %v685_v45, %v685_v45  ;;  %472 = vmatpush1.bf16.msra.mxu0 %v471_v0  ;;  %v154_v46 = vld [vmem:[%s939_s3 + $0x1f8] sm:$0xff] }
  0x95   :  { %474 = vmatprep.subr.bf16.mxu0 %v473_v7  ;;  %v485_v47 = vpack.c.bf16 %v152_v42, %v148_v39 }
  0x96   :  { %v690_v51 = vsub.f32 %v602_v2, %v34_v48  ;;  %45 = vadd.xlane.f32.xlu0 %v41_v49  ;;  %v693_v52 = vsub.f32 %v607_v3, %v36_v50  ;;  %v121_v2 = vld [vmem:[%s939_s3 + $0xf0] sm:$0xff]  ;;  %v517_v48 = vpack.c.bf16 %v154_v46, %v150_v43  ;;  %v147_v49 = vld [vmem:[%s939_s3 + $0x1c0] sm:$0xff] }
  0x97   :  { %v503_v3 = vpack.c.bf16 %v121_v2, %v117_v1  ;;  %v151_v50 = vld [vmem:[%s939_s3 + $0x1e0] sm:$0xff] }
  0x98   :  { %v42_v54 = vmul.f32 %v690_v51, %v690_v51  ;;  %v44_v55 = vmul.f32 %v693_v52, %v693_v52  ;;  %476 = vmatpush1.bf16.msra.mxu0 %v475_v12 }
  0x99   :  { %504 = vmatpush1.bf16.msra.mxu1 %v503_v3  ;;  %478 = vmatprep.subr.bf16.mxu0 %v477_v19 }
  0x9a   :  { %49 = vadd.xlane.f32.xlu0 %v43_v53  ;;  %47 = vadd.xlane.f32.xlu1 %v42_v54  ;;  %v149_v53 = vld [vmem:[%s939_s3 + $0x1d0] sm:$0xff]  ;;  %v487_v54 = vpack.c.bf16 %v151_v50, %v147_v49 }
  0x9b   :  { %506 = vmatprep.subr.bf16.mxu1 %v505_v11 }
  0x9c   :  { %480 = vmatpush1.bf16.msra.mxu0 %v479_v24  ;;  %v163_v24 = vsub.s32 1, %v158_v21 }
  0x9d   :  { %508 = vmatpush1.bf16.msra.mxu1 %v507_v15  ;;  %482 = vmatprep.subr.bf16.mxu0 %v481_v31 }
  0x9e   :  { %51 = vadd.xlane.f32.xlu1 %v44_v55  ;;  %510 = vmatprep.subr.bf16.mxu1 %v509_v23  ;;  %v153_v55 = vld [vmem:[%s939_s3 + $0x1f0] sm:$0xff]  ;;  %v155_v23 = vld [vmem:[%s942_s4] sm:$0xf] }
  0x9f   :  { %v519_v56 = vpack.c.bf16 %v153_v55, %v149_v53  ;;  %v164_v28 = vrot.slane %v155_v23, %v163_v24  ;;  %v172_v29 = vrot.slane %v155_v23, %v171_v25 }
  0xa0   :  { %484 = vmatpush1.bf16.msra.mxu0 %v483_v36 }
  0xa1   :  { %512 = vmatpush1.bf16.msra.mxu1 %v511_v27  ;;  %486 = vmatprep.subr.bf16.mxu0 %v485_v47  ;;  %v168_v27 = vrot.slane %v155_v23, %v167_v22 }
  0xa2   :  { %514 = vmatprep.subr.bf16.mxu1 %v513_v35 }
  0xa4   :  { %488 = vmatpush1.bf16.msra.mxu0 %v487_v54 }
  0xa5   :  { %516 = vmatpush1.bf16.msra.mxu1 %v515_v41 }
  0xa6   :  { %518 = vmatprep.subr.bf16.mxu1 %v517_v48 }
  0xa9   :  { %520 = vmatpush1.bf16.msra.mxu1 %v519_v56 }
 0x123   :  { %v46_v57 = vpop.xlane.xlu0 %45 }
 0x124   :  { %v53_v58 = vmul.f32 0.0078125, %v46_v57 }
 0x126   :  { %v57_v59 = vadd.f32 1e-05, %v53_v58 }
 0x127   :  { %v48_v60 = vpop.xlane.xlu1 %47  ;;  %v50_v61 = vpop.xlane.xlu0 %49 }
 0x128   :  { %522 = vrsqrt.f32 %v57_v59  ;;  %v54_v62 = vmul.f32 0.0078125, %v48_v60  ;;  %v55_v63 = vmul.f32 0.0078125, %v50_v61 }
 0x12a   :  { %v58_v0 = vadd.f32 1e-05, %v54_v62  ;;  %v59_v1 = vadd.f32 1e-05, %v55_v63 }
 0x12b   :  { %v52_v2 = vpop.xlane.xlu1 %51 }
 0x12c   :  { %524 = vrsqrt.f32 %v58_v0  ;;  %v56_v3 = vmul.f32 0.0078125, %v52_v2 }
 0x12d   :  { %526 = vrsqrt.f32 %v59_v1 }
 0x12e   :  { %v60_v4 = vadd.f32 1e-05, %v56_v3 }
 0x130   :  { %528 = vrsqrt.f32 %v60_v4 }
 0x132   :  { %v523_v5 = vpop.eup %522 }
 0x133   :  { %v65_v7 = vmul.f32 %v523_v5, %v683_v44 }
 0x135   :  { %v76_v9 = vmul.f32 %v455_v6, %v65_v7 }
 0x136   :  { %v525_v10 = vpop.eup %524 }
 0x137   :  { %v527_v11 = vpop.eup %526  ;;  %v87_v12 = vadd.f32 %v456_v8, %v76_v9  ;;  %v66_v13 = vmul.f32 %v525_v10, %v690_v51 }
 0x138   :  { %v67_v14 = vmul.f32 %v527_v11, %v685_v45 }
 0x139   :  { %242 = vmatmul.mubr.f32.vlgmr.msra.gmra.mrb[0].mxu0 %v87_v12  ;;  %331 = vmatmul.mubr.f32.vlgmr.msra.gmra.mrb[0].mxu1 %v87_v12  ;;  %v77_v15 = vmul.f32 %v455_v6, %v66_v13 }
 0x13a   :  { %v529_v16 = vpop.eup %528  ;;  %247 = vmatprep.mubr.f32.mxu0 %v562_v40  ;;  %336 = vmatprep.mubr.f32.mxu1 %v562_v40  ;;  %v78_v17 = vmul.f32 %v455_v6, %v67_v14 }
 0x13b   :  { %v88_v44 = vadd.f32 %v456_v8, %v77_v15  ;;  %v68_v18 = vmul.f32 %v529_v16, %v693_v52  ;;  %v159_v52 = vsub.s32 0, %v158_v21 }
 0x13c   :  { %v89_v51 = vadd.f32 %v456_v8, %v78_v17 }
 0x13d   :  { %248 = vmatmul.mubr.f32.gmra.mrb[2].mxu0 %v88_v44  ;;  %337 = vmatmul.mubr.f32.gmra.mrb[2].mxu1 %v88_v44  ;;  %v79_v45 = vmul.f32 %v455_v6, %v68_v18  ;;  %v160_v26 = vrot.slane %v155_v23, %v159_v52 }
 0x13e   :  { %253 = vmatprep.mubr.f32.mxu0 %v562_v40  ;;  %342 = vmatprep.mubr.f32.mxu1 %v562_v40 }
 0x13f   :  { %v90_v19 = vadd.f32 %v456_v8, %v79_v45 }
 0x141   :  { %254 = vmatmul.mubr.f32.gmra.mrb[4].mxu0 %v89_v51  ;;  %343 = vmatmul.mubr.f32.gmra.mrb[4].mxu1 %v89_v51 }
 0x142   :  { %259 = vmatprep.mubr.f32.mxu0 %v562_v40  ;;  %348 = vmatprep.mubr.f32.mxu1 %v562_v40 }
 0x145   :  { %260 = vmatmul.mubr.f32.gmra.mrb[6].mxu0 %v90_v19  ;;  %349 = vmatmul.mubr.f32.gmra.mrb[6].mxu1 %v90_v19 }
 0x20c   :  { %v243_v30 = vpop.f32.mrb[0].mxu0  ;;  %v332_v31 = vpop.f32.mrb[0].mxu1 }
 0x20d   :  { %v244_v32 = vadd.f32 %v243_v30, %v160_v26  ;;  %v333_v33 = vadd.f32 %v332_v31, %v168_v27  ;;  %v245_v34 = vpop.f32.mrb[1].mxu0  ;;  %v334_v35 = vpop.f32.mrb[1].mxu1 }
 0x20e   :  { %v246_v36 = vadd.f32 %v245_v34, %v164_v28  ;;  %v335_v37 = vadd.f32 %v334_v35, %v172_v29 }
 0x20f   :  { %v371_v38 = vmul.f32 0.70710677, %v244_v32  ;;  %v373_v39 = vmul.f32 0.70710677, %v333_v33  ;;  %v355_v8 = vmul.f32 0.5, %v244_v32  ;;  %v357_v13 = vmul.f32 0.5, %v333_v33 }
 0x210   :  { %v372_v40 = vmul.f32 0.70710677, %v246_v36  ;;  %v374_v41 = vmul.f32 0.70710677, %v335_v37  ;;  %v249_v42 = vpop.f32.mrb[2].mxu0  ;;  %v338_v43 = vpop.f32.mrb[2].mxu1 }
 0x211   :  { %530 = verf.f32 %v371_v38  ;;  %v842_v46 = vadd.f32 %v249_v42, %v160_v26  ;;  %v844_v47 = vadd.f32 %v338_v43, %v168_v27  ;;  %v251_v48 = vpop.f32.mrb[3].mxu0  ;;  %v340_v49 = vpop.f32.mrb[3].mxu1  ;;  %v356_v19 = vmul.f32 0.5, %v246_v36 }
 0x212   :  { %532 = verf.f32 %v373_v39  ;;  %v846_v50 = vadd.f32 %v251_v48, %v164_v28  ;;  %v848_v53 = vadd.f32 %v340_v49, %v172_v29  ;;  %v358_v23 = vmul.f32 0.5, %v335_v37 }
 0x213   :  { %534 = verf.f32 %v372_v40  ;;  %v375_v54 = vmul.f32 0.70710677, %v842_v46  ;;  %v377_v57 = vmul.f32 0.70710677, %v844_v47  ;;  %v359_v32 = vmul.f32 0.5, %v842_v46 }
 0x214   :  { %536 = verf.f32 %v374_v41  ;;  %v255_v55 = vpop.f32.mrb[4].mxu0  ;;  %v344_v56 = vpop.f32.mrb[4].mxu1  ;;  %v376_v58 = vmul.f32 0.70710677, %v846_v50  ;;  %v378_v59 = vmul.f32 0.70710677, %v848_v53 }
 0x215   :  { %538 = verf.f32 %v375_v54  ;;  %v854_v60 = vadd.f32 %v255_v55, %v160_v26  ;;  %v856_v61 = vadd.f32 %v344_v56, %v168_v27  ;;  %v257_v62 = vpop.f32.mrb[5].mxu0  ;;  %v346_v63 = vpop.f32.mrb[5].mxu1  ;;  %v361_v35 = vmul.f32 0.5, %v844_v47 }
 0x216   :  { %540 = verf.f32 %v377_v57  ;;  %v858_v0 = vadd.f32 %v257_v62, %v164_v28  ;;  %v860_v1 = vadd.f32 %v346_v63, %v172_v29  ;;  %v360_v39 = vmul.f32 0.5, %v846_v50 }
 0x217   :  { %542 = verf.f32 %v376_v58  ;;  %v379_v2 = vmul.f32 0.70710677, %v854_v60  ;;  %v381_v5 = vmul.f32 0.70710677, %v856_v61  ;;  %v362_v43 = vmul.f32 0.5, %v848_v53 }
 0x218   :  { %v261_v3 = vpop.f32.mrb[6].mxu0  ;;  %v350_v4 = vpop.f32.mrb[6].mxu1  ;;  %544 = verf.f32 %v378_v59  ;;  %v380_v6 = vmul.f32 0.70710677, %v858_v0  ;;  %v382_v9 = vmul.f32 0.70710677, %v860_v1 }
 0x219   :  { %v263_v7 = vpop.f32.mrb[7].mxu0  ;;  %546 = verf.f32 %v379_v2  ;;  %v866_v10 = vadd.f32 %v261_v3, %v160_v26  ;;  %v352_v11 = vpop.f32.mrb[7].mxu1  ;;  %v868_v14 = vadd.f32 %v350_v4, %v168_v27  ;;  %v363_v49 = vmul.f32 0.5, %v854_v60 }
 0x21a   :  { %548 = verf.f32 %v381_v5  ;;  %v870_v15 = vadd.f32 %v263_v7, %v164_v28  ;;  %v873_v18 = vadd.f32 %v352_v11, %v172_v29  ;;  %v365_v56 = vmul.f32 0.5, %v856_v61 }
 0x21b   :  { %v531_v12 = vpop.eup %530  ;;  %550 = verf.f32 %v380_v6  ;;  %v383_v17 = vmul.f32 0.70710677, %v866_v10  ;;  %v385_v20 = vmul.f32 0.70710677, %v868_v14  ;;  %v364_v59 = vmul.f32 0.5, %v858_v0 }
 0x21c   :  { %v533_v16 = vpop.eup %532  ;;  %v403_v44 = vadd.f32 1.0, %v531_v12  ;;  %552 = verf.f32 %v382_v9  ;;  %v384_v26 = vmul.f32 0.70710677, %v870_v15  ;;  %v386_v29 = vmul.f32 0.70710677, %v873_v18 }
 0x21d   :  { %v535_v51 = vpop.eup %534  ;;  %v405_v45 = vadd.f32 1.0, %v533_v16  ;;  %554 = verf.f32 %v383_v17  ;;  %v366_v2 = vmul.f32 0.5, %v860_v1  ;;  %v367_v5 = vmul.f32 0.5, %v866_v10 }
 0x21e   :  { %v537_v21 = vpop.eup %536  ;;  %v419_v52 = vmul.f32 %v403_v44, %v355_v8  ;;  %v404_v22 = vadd.f32 1.0, %v535_v51  ;;  %556 = verf.f32 %v385_v20  ;;  %v369_v7 = vmul.f32 0.5, %v868_v14 }
 0x21f   :  { %v421_v24 = vmul.f32 %v405_v45, %v357_v13  ;;  %v406_v25 = vadd.f32 1.0, %v537_v21  ;;  %v539_v27 = vpop.eup %538  ;;  %558 = verf.f32 %v384_v26  ;;  %v368_v12 = vmul.f32 0.5, %v870_v15 }
 0x220   :  { %435 = vst [vmem:[%s943_s5] sm:$0xff] %v419_v52  ;;  %v420_v28 = vmul.f32 %v404_v22, %v356_v19  ;;  %v541_v30 = vpop.eup %540  ;;  %v407_v33 = vadd.f32 1.0, %v539_v27  ;;  %560 = verf.f32 %v386_v29  ;;  %v370_v14 = vmul.f32 0.5, %v873_v18 }
 0x221   :  { %437 = vst [vmem:[%s943_s5 + $0x10] sm:$0xff] %v421_v24  ;;  %v422_v31 = vmul.f32 %v406_v25, %v358_v23  ;;  %v543_v34 = vpop.eup %542  ;;  %v409_v36 = vadd.f32 1.0, %v541_v30 }
 0x222   :  { %436 = vst [vmem:[%s943_s5 + $0x8] sm:$0xff] %v420_v28  ;;  %v545_v37 = vpop.eup %544  ;;  %v423_v38 = vmul.f32 %v407_v33, %v359_v32  ;;  %v408_v40 = vadd.f32 1.0, %v543_v34 }
 0x223   :  { %438 = vst [vmem:[%s943_s5 + $0x18] sm:$0xff] %v422_v31  ;;  %v547_v41 = vpop.eup %546  ;;  %v425_v42 = vmul.f32 %v409_v36, %v361_v35  ;;  %v410_v46 = vadd.f32 1.0, %v545_v37 }
 0x224   :  { %v549_v48 = vpop.eup %548  ;;  %439 = vst [vmem:[%s943_s5 + $0x20] sm:$0xff] %v423_v38  ;;  %v424_v47 = vmul.f32 %v408_v40, %v360_v39  ;;  %v411_v54 = vadd.f32 1.0, %v547_v41 }
 0x225   :  { %v551_v55 = vpop.eup %550  ;;  %441 = vst [vmem:[%s943_s5 + $0x30] sm:$0xff] %v425_v42  ;;  %v426_v50 = vmul.f32 %v410_v46, %v362_v43  ;;  %v413_v57 = vadd.f32 1.0, %v549_v48 }
 0x226   :  { %v553_v53 = vpop.eup %552  ;;  %440 = vst [vmem:[%s943_s5 + $0x28] sm:$0xff] %v424_v47  ;;  %v427_v58 = vmul.f32 %v411_v54, %v363_v49  ;;  %v412_v62 = vadd.f32 1.0, %v551_v55 }
 0x227   :  { %v555_v60 = vpop.eup %554  ;;  %442 = vst [vmem:[%s943_s5 + $0x38] sm:$0xff] %v426_v50  ;;  %v429_v63 = vmul.f32 %v413_v57, %v365_v56  ;;  %v414_v3 = vadd.f32 1.0, %v553_v53 }
 0x228   :  { %v557_v61 = vpop.eup %556  ;;  %443 = vst [vmem:[%s943_s5 + $0x40] sm:$0xff] %v427_v58  ;;  %v428_v4 = vmul.f32 %v412_v62, %v364_v59  ;;  %v415_v6 = vadd.f32 1.0, %v555_v60 }
 0x229   :  { %445 = vst [vmem:[%s943_s5 + $0x50] sm:$0xff] %v429_v63  ;;  %v430_v0 = vmul.f32 %v414_v3, %v366_v2  ;;  %v417_v8 = vadd.f32 1.0, %v557_v61  ;;  %v559_v9 = vpop.eup %558 }
 0x22a   :  { %444 = vst [vmem:[%s943_s5 + $0x48] sm:$0xff] %v428_v4  ;;  %v431_v1 = vmul.f32 %v415_v6, %v367_v5  ;;  %v561_v11 = vpop.eup %560  ;;  %v416_v13 = vadd.f32 1.0, %v559_v9 }
 0x22b   :  { %446 = vst [vmem:[%s943_s5 + $0x58] sm:$0xff] %v430_v0  ;;  %v433_v10 = vmul.f32 %v417_v8, %v369_v7  ;;  %v418_v16 = vadd.f32 1.0, %v561_v11 }
 0x22c   :  { %447 = vst [vmem:[%s943_s5 + $0x60] sm:$0xff] %v431_v1  ;;  %v432_v44 = vmul.f32 %v416_v13, %v368_v12 }
 0x22d   :  { %449 = vst [vmem:[%s943_s5 + $0x70] sm:$0xff] %v433_v10  ;;  %v434_v17 = vmul.f32 %v418_v16, %v370_v14 }
 0x22e   :  { %448 = vst [vmem:[%s943_s5 + $0x68] sm:$0xff] %v432_v44 }
 0x22f   :  { %450 = vst [vmem:[%s943_s5 + $0x78] sm:$0xff] %v434_v17 }

// kernel: soft_text_decoder_forward.37
= control target key start
LH: loop header
LB: loop body
LE: loop exit
PB: predicated region body
PF: predicated region fallthrough
CT: control target
= control target key end

     0   :  { %9 = vsyncpa [#allocation4], 0  ;;  %s1137_s0 = inlined_call_operand.vmem [shape: f32[32,128], index: 0, kind: input, shape index: {}]   ;;  %s1138_s1 = inlined_call_operand.vmem [shape: f32[1,128], index: 1, kind: input, shape index: {}]   ;;  %s1139_s2 = inlined_call_operand.vmem [shape: f32[1,128], index: 2, kind: input, shape index: {}]   ;;  %s1140_s3 = inlined_call_operand.vmem [shape: f32[128,512], index: 3, kind: input, shape index: {}]   ;;  %s1141_s4 = inlined_call_operand.hbm [shape: f32[32,512], index: 4, kind: output, shape index: {}]  }
   0x1   :  { %11 = vsyncpa [#allocation4 + $0x1], 0  ;;  %s873_s15 = smov 0   ;;  %s875_s16 = smov 0  }
   0x2   :  { %s877_s17 = smov 0   ;;  %s879_s18 = smov 0  }
   0x3   :  { %s881_s19 = smov 0   ;;  %s883_s20 = smov 0  }
   0x4 LB: > { %s628_s21 = sadd.s32 4294967295, %s841_s20   ;;  %s629_s22 = sadd.s32 4294967294, %s841_s20   ;;  %s841_s20 = sphi %s883_s20, %s17_s20   ;;  %s837_s19 = sphi %s881_s19, %s1148_s19   ;;  %s833_s18 = sphi %s879_s18, %s1147_s18   ;;  %s829_s17 = sphi %s877_s17, %s1146_s17   ;;  %s825_s16 = sphi %s875_s16, %s1145_s16   ;;  %s821_s15 = sphi %s873_s15, %s1144_s15  }
   0x5   : > { %s26_s23 = sadd.s32 1, %s837_s19  ;;  %s104_s24 = sadd.s32 1, %s829_s17 }
   0x6   : > { %p27_p0 = scmp.ge.s32.totalorder %s26_s23, 2  ;;  %p111_p1 = scmp.ne.s32.totalorder %s829_s17, %s825_s16 }
   0x7   : > { %p112_p2 = scmp.eq.s32.totalorder %s841_s20, 0  ;;  %p143_p3 = scmp.eq.s32.totalorder %s628_s21, 1 }
   0x8   : > { %s1150_s23 = smov (%p27_p0, %s26_s23), 0  ;;  %p148_p6 = scmp.ne.s32.totalorder %s825_s16, %s821_s15 }
   0x9   : > { %p113_p4 = por %p112_p2, %p111_p1  ;;  %p912_p5 = por %p143_p3, %p111_p1 }
   0xa   : > { %s101_s26 = ssub.s32 %s837_s19, %s1150_s23  ;;  %p149_p8 = scmp.eq.s32.totalorder %s629_s22, 1 }
   0xb   : > { %p102_p7 = scmp.eq.s32.totalorder %s101_s26, 0  ;;  %p632_p10 = scmp.ge.s32.totalorder %s841_s20, 2 }
   0xc   : > { %p923_p9 = por %p149_p8, %p148_p6 }
   0xd   : > { %s921_s27 = scalar_select %p102_p7, %s829_s17, %s104_s24  }
   0xe   : > { %180 = sbr.rel (%p632_p10) target bundleno = 41 (0x29), region = 28 }
  0x15   : > { %183 = sbr.rel (!%p113_p4) target bundleno = 41 (0x29), region = 32  ;;  %s185_s29 = sand.u32 (%p113_p4), 1, %s829_s17  }
  0x16   : > { %s646_s30 = sshll.u32 (%p113_p4), %s837_s19, 4  ;;  %s633_s5 = sshll.u32 (%p113_p4), %s185_s29, 8 }
  0x17   : > { %s935_s8 = scalar_lea.vmem (%p113_p4), %s1140_s3, %s646_s30  ;;  %s940_s9 = scalar_lea.vmem (%p113_p4), [#allocation2], %s633_s5 }
  0x18   : > { %v203_v0 = vld [vmem:[%s935_s8] sm:$0xff] (%p113_p4)  ;;  %v205_v1 = vld [vmem:[%s935_s8 + $0x8] sm:$0xff] (%p113_p4) }
  0x19   : > { %v207_v2 = vld [vmem:[%s935_s8 + $0x20] sm:$0xff] (%p113_p4)  ;;  %204 = vst [vmem:[%s940_s9] sm:$0xff] (%p113_p4), %v203_v0  ;;  %206 = vst [vmem:[%s940_s9 + $0x8] sm:$0xff] (%p113_p4), %v205_v1  ;;  %v209_v3 = vld [vmem:[%s935_s8 + $0x28] sm:$0xff] (%p113_p4) }
  0x1a   : > { %208 = vst [vmem:[%s940_s9 + $0x10] sm:$0xff] (%p113_p4), %v207_v2  ;;  %v211_v4 = vld [vmem:[%s935_s8 + $0x40] sm:$0xff] (%p113_p4)  ;;  %v213_v5 = vld [vmem:[%s935_s8 + $0x48] sm:$0xff] (%p113_p4)  ;;  %210 = vst [vmem:[%s940_s9 + $0x18] sm:$0xff] (%p113_p4), %v209_v3 }
  0x1b   : > { %212 = vst [vmem:[%s940_s9 + $0x20] sm:$0xff] (%p113_p4), %v211_v4  ;;  %214 = vst [vmem:[%s940_s9 + $0x28] sm:$0xff] (%p113_p4), %v213_v5  ;;  %v215_v6 = vld [vmem:[%s935_s8 + $0x60] sm:$0xff] (%p113_p4)  ;;  %v217_v7 = vld [vmem:[%s935_s8 + $0x68] sm:$0xff] (%p113_p4) }
  0x1c   : > { %v219_v8 = vld [vmem:[%s935_s8 + $0x80] sm:$0xff]  ;;  %216 = vst [vmem:[%s940_s9 + $0x30] sm:$0xff] %v215_v6  ;;  %218 = vst [vmem:[%s940_s9 + $0x38] sm:$0xff] %v217_v7  ;;  %v221_v9 = vld [vmem:[%s935_s8 + $0x88] sm:$0xff] }
  0x1d   : > { %220 = vst [vmem:[%s940_s9 + $0x40] sm:$0xff] %v219_v8  ;;  %v223_v10 = vld [vmem:[%s935_s8 + $0xa0] sm:$0xff]  ;;  %v225_v11 = vld [vmem:[%s935_s8 + $0xa8] sm:$0xff]  ;;  %222 = vst [vmem:[%s940_s9 + $0x48] sm:$0xff] %v221_v9 }
  0x1e   : > { %224 = vst [vmem:[%s940_s9 + $0x50] sm:$0xff] %v223_v10  ;;  %226 = vst [vmem:[%s940_s9 + $0x58] sm:$0xff] %v225_v11  ;;  %v227_v12 = vld [vmem:[%s935_s8 + $0xc0] sm:$0xff]  ;;  %v229_v13 = vld [vmem:[%s935_s8 + $0xc8] sm:$0xff] }
  0x1f   : > { %v231_v14 = vld [vmem:[%s935_s8 + $0xe0] sm:$0xff]  ;;  %228 = vst [vmem:[%s940_s9 + $0x60] sm:$0xff] %v227_v12  ;;  %230 = vst [vmem:[%s940_s9 + $0x68] sm:$0xff] %v229_v13  ;;  %v233_v15 = vld [vmem:[%s935_s8 + $0xe8] sm:$0xff] }
  0x20   : > { %232 = vst [vmem:[%s940_s9 + $0x70] sm:$0xff] %v231_v14  ;;  %v235_v16 = vld [vmem:[%s935_s8 + $0x100] sm:$0xff]  ;;  %v237_v17 = vld [vmem:[%s935_s8 + $0x108] sm:$0xff]  ;;  %234 = vst [vmem:[%s940_s9 + $0x78] sm:$0xff] %v233_v15 }
  0x21   : > { %236 = vst [vmem:[%s940_s9 + $0x80] sm:$0xff] %v235_v16  ;;  %238 = vst [vmem:[%s940_s9 + $0x88] sm:$0xff] %v237_v17  ;;  %v239_v18 = vld [vmem:[%s935_s8 + $0x120] sm:$0xff]  ;;  %v241_v19 = vld [vmem:[%s935_s8 + $0x128] sm:$0xff] }
  0x22   : > { %v243_v20 = vld [vmem:[%s935_s8 + $0x140] sm:$0xff]  ;;  %240 = vst [vmem:[%s940_s9 + $0x90] sm:$0xff] %v239_v18  ;;  %242 = vst [vmem:[%s940_s9 + $0x98] sm:$0xff] %v241_v19  ;;  %v245_v21 = vld [vmem:[%s935_s8 + $0x148] sm:$0xff] }
  0x23   : > { %244 = vst [vmem:[%s940_s9 + $0xa0] sm:$0xff] %v243_v20  ;;  %v247_v22 = vld [vmem:[%s935_s8 + $0x160] sm:$0xff]  ;;  %v249_v23 = vld [vmem:[%s935_s8 + $0x168] sm:$0xff]  ;;  %246 = vst [vmem:[%s940_s9 + $0xa8] sm:$0xff] %v245_v21 }
  0x24   : > { %248 = vst [vmem:[%s940_s9 + $0xb0] sm:$0xff] %v247_v22  ;;  %250 = vst [vmem:[%s940_s9 + $0xb8] sm:$0xff] %v249_v23  ;;  %v251_v24 = vld [vmem:[%s935_s8 + $0x180] sm:$0xff]  ;;  %v253_v25 = vld [vmem:[%s935_s8 + $0x188] sm:$0xff] }
  0x25   : > { %v255_v26 = vld [vmem:[%s935_s8 + $0x1a0] sm:$0xff]  ;;  %252 = vst [vmem:[%s940_s9 + $0xc0] sm:$0xff] %v251_v24  ;;  %254 = vst [vmem:[%s940_s9 + $0xc8] sm:$0xff] %v253_v25  ;;  %v257_v27 = vld [vmem:[%s935_s8 + $0x1a8] sm:$0xff] }
  0x26   : > { %256 = vst [vmem:[%s940_s9 + $0xd0] sm:$0xff] %v255_v26  ;;  %v259_v28 = vld [vmem:[%s935_s8 + $0x1c0] sm:$0xff]  ;;  %v261_v29 = vld [vmem:[%s935_s8 + $0x1c8] sm:$0xff]  ;;  %258 = vst [vmem:[%s940_s9 + $0xd8] sm:$0xff] %v257_v27 }
  0x27   : > { %260 = vst [vmem:[%s940_s9 + $0xe0] sm:$0xff] %v259_v28  ;;  %262 = vst [vmem:[%s940_s9 + $0xe8] sm:$0xff] %v261_v29  ;;  %v263_v30 = vld [vmem:[%s935_s8 + $0x1e0] sm:$0xff]  ;;  %v265_v31 = vld [vmem:[%s935_s8 + $0x1e8] sm:$0xff] }
  0x28   : > { %264 = vst [vmem:[%s940_s9 + $0xf0] sm:$0xff] %v263_v30  ;;  %266 = vst [vmem:[%s940_s9 + $0xf8] sm:$0xff] %v265_v31 }
  0x29 PF: > { %p636_p11 = scmp.ge.s32.totalorder %s841_s20, 1  ;;  %p271_p12 = scmp.lt.s32.totalorder %s841_s20, 3 }
  0x2b   : > { %p272_p13 = pnand %p636_p11, %p271_p12 }
  0x2c   : > { %v317_v32 = vld [vmem:[%s1137_s0] sm:$0xff] (!%p272_p13)  ;;  %v318_v33 = vld [vmem:[%s1137_s0 + $0x8] sm:$0xff] (!%p272_p13)  ;;  %v319_v34 = vld [vmem:[%s1137_s0 + $0x10] sm:$0xff] (!%p272_p13)  ;;  %s1018_s26 = sand.u32 (!%p272_p13), 1, %s825_s16   ;;  %s647_s12 = sshll.u32 (!%p272_p13), %s833_s18, 8 }
  0x2d   : > { %275 = sbr.rel (%p272_p13) target bundleno = 593 (0x251), region = 55  ;;  %321 = vadd.xlane.f32.xlu0 (!%p272_p13), %v317_v32  ;;  %323 = vadd.xlane.f32.xlu1 (!%p272_p13), %v318_v33  ;;  %v320_v35 = vld [vmem:[%s1137_s0 + $0x18] sm:$0xff] (!%p272_p13)  ;;  %s637_s29 = sshll.u32 (!%p272_p13), %s1018_s26, 8 }
  0x2e   : > { %s1021_s30 = scalar_lea.vmem (!%p272_p13), [#allocation2], %s637_s29  ;;  %s638_s9 = sshll.u32 (!%p272_p13), %s1018_s26, 6 }
  0x2f   : > { %v389_v36 = vld [vmem:[%s1021_s30 + $0x8] sm:$0xff] (!%p272_p13)  ;;  %v391_v37 = vld [vmem:[%s1021_s30 + $0x18] sm:$0xff] (!%p272_p13)  ;;  %v388_v38 = vld [vmem:[%s1021_s30] sm:$0xff] (!%p272_p13)  ;;  %s307_s10 = scalar_lea.vmem (!%p272_p13), [#allocation3], %s638_s9  ;;  %s1088_s21 = scalar_lea.hbm (!%p272_p13), %s1141_s4, %s647_s12 }
  0x30   : > { %v648_v39 = vpack.c.bf16 (!%p272_p13), %v391_v37, %v389_v36  ;;  %v390_v40 = vld [vmem:[%s1021_s30 + $0x10] sm:$0xff] (!%p272_p13)  ;;  %v393_v41 = vld [vmem:[%s1021_s30 + $0x28] sm:$0xff] (!%p272_p13)  ;;  %v395_v42 = vld [vmem:[%s1021_s30 + $0x38] sm:$0xff] (!%p272_p13)  ;;  %s534_s11 = sshll.u32 (!%p272_p13), %s307_s10, 4  ;;  %s518_s18 = scalar_lea.sflag (!%p272_p13), [#allocation4], %s1018_s26  ;;  %s1083_s11 = int_to_ptr.vmem [resolvable:$true] %s534_s11 }
  0x31   : > { %325 = vadd.xlane.f32.xlu0 (!%p272_p13), %v319_v34  ;;  %327 = vadd.xlane.f32.xlu1 (!%p272_p13), %v320_v35  ;;  %v650_v43 = vpack.c.bf16 (!%p272_p13), %v390_v40, %v388_v38  ;;  %v652_v44 = vpack.c.bf16 (!%p272_p13), %v395_v42, %v393_v41  ;;  %v392_v45 = vld [vmem:[%s1021_s30 + $0x20] sm:$0xff] (!%p272_p13)  ;;  %v394_v46 = vld [vmem:[%s1021_s30 + $0x30] sm:$0xff] (!%p272_p13)  ;;  %v397_v47 = vld [vmem:[%s1021_s30 + $0x48] sm:$0xff] (!%p272_p13)  ;;  %s763_s22 = scalar_lea.vmem (!%p272_p13), %s1083_s11, 1024  ;;  %s844_s24 = smov (!%p272_p13), [#allocation3]  }
  0x32   : > { %649 = vmatprep.subr.bf16.mxu0 (!%p272_p13), %v648_v39  ;;  %680 = vmatprep.subr.bf16.mxu1 (!%p272_p13), %v648_v39  ;;  %v399_v48 = vld [vmem:[%s1021_s30 + $0x58] sm:$0xff] (!%p272_p13)  ;;  %v654_v49 = vpack.c.bf16 (!%p272_p13), %v394_v46, %v392_v45  ;;  %v396_v51 = vld [vmem:[%s1021_s30 + $0x40] sm:$0xff] (!%p272_p13)  ;;  %v398_v52 = vld [vmem:[%s1021_s30 + $0x50] sm:$0xff] (!%p272_p13)  ;;  %p764_p0 = scmp.ne.s32.totalorder (!%p272_p13), %s1083_s11, %s763_s22  ;;  %s767_s29 = sshll.u32 (!%p272_p13), %s844_s24, 4  ;;  %s768_s29 = int_to_ptr.vmem [resolvable:$false] %s767_s29 }
  0x33   : > { %651 = vmatpush1.bf16.msra.mxu0 (!%p272_p13), %v650_v43  ;;  %688 = vmatpush1.bf16.msra.mxu1 (!%p272_p13), %v650_v43  ;;  %v656_v50 = vpack.c.bf16 (!%p272_p13), %v399_v48, %v397_v47  ;;  %v658_v53 = vpack.c.bf16 (!%p272_p13), %v398_v52, %v396_v51  ;;  %v401_v6 = vld [vmem:[%s1021_s30 + $0x68] sm:$0xff] (!%p272_p13)  ;;  %v403_v7 = vld [vmem:[%s1021_s30 + $0x78] sm:$0xff] (!%p272_p13)  ;;  %v400_v9 = vld [vmem:[%s1021_s30 + $0x60] sm:$0xff] (!%p272_p13)  ;;  %p770_p3 = scmp.lt.s32.totalorder (!%p272_p13), %s1083_s11, %s768_s29 }
  0x34   : > { %653 = vmatprep.subr.bf16.mxu0 %v652_v44  ;;  %681 = vmatprep.subr.bf16.mxu1 %v652_v44  ;;  %v660_v8 = vpack.c.bf16 %v403_v7, %v401_v6  ;;  %v402_v10 = vld [vmem:[%s1021_s30 + $0x70] sm:$0xff]  ;;  %v405_v12 = vld [vmem:[%s1021_s30 + $0x88] sm:$0xff]  ;;  %v407_v13 = vld [vmem:[%s1021_s30 + $0x98] sm:$0xff]  ;;  %p765_p1 = pnand %p764_p0, %p912_p5 }
  0x35   : > { %v662_v11 = vpack.c.bf16 %v402_v10, %v400_v9  ;;  %v664_v14 = vpack.c.bf16 %v407_v13, %v405_v12  ;;  %v404_v15 = vld [vmem:[%s1021_s30 + $0x80] sm:$0xff]  ;;  %v406_v16 = vld [vmem:[%s1021_s30 + $0x90] sm:$0xff]  ;;  %v409_v18 = vld [vmem:[%s1021_s30 + $0xa8] sm:$0xff] }
  0x36   : > { %v666_v17 = vpack.c.bf16 %v406_v16, %v404_v15  ;;  %v411_v19 = vld [vmem:[%s1021_s30 + $0xb8] sm:$0xff]  ;;  %v408_v21 = vld [vmem:[%s1021_s30 + $0xa0] sm:$0xff]  ;;  %v410_v22 = vld [vmem:[%s1021_s30 + $0xb0] sm:$0xff]  ;;  %p766_p2 = pneg %p765_p1 }
  0x37   : > { %655 = vmatpush1.bf16.msra.mxu0 %v654_v49  ;;  %689 = vmatpush1.bf16.msra.mxu1 %v654_v49  ;;  %v668_v20 = vpack.c.bf16 %v411_v19, %v409_v18  ;;  %v670_v23 = vpack.c.bf16 %v410_v22, %v408_v21  ;;  %v413_v24 = vld [vmem:[%s1021_s30 + $0xc8] sm:$0xff]  ;;  %v415_v25 = vld [vmem:[%s1021_s30 + $0xd8] sm:$0xff]  ;;  %v412_v27 = vld [vmem:[%s1021_s30 + $0xc0] sm:$0xff] }
  0x38   : > { %657 = vmatprep.subr.bf16.mxu0 %v656_v50  ;;  %682 = vmatprep.subr.bf16.mxu1 %v656_v50  ;;  %v672_v26 = vpack.c.bf16 %v415_v25, %v413_v24  ;;  %v414_v28 = vld [vmem:[%s1021_s30 + $0xd0] sm:$0xff]  ;;  %v417_v29 = vld [vmem:[%s1021_s30 + $0xe8] sm:$0xff]  ;;  %v419_v31 = vld [vmem:[%s1021_s30 + $0xf8] sm:$0xff] }
  0x39   : > { %v674_v30 = vpack.c.bf16 %v414_v28, %v412_v27  ;;  %v639_v50 = vld [vmem:[%s1138_s1] ss:$0 sm:$0xff] }
  0x3a   : > { %v640_v52 = vld [vmem:[%s1139_s2] ss:$0 sm:$0xff] }
  0x3b   : > { %659 = vmatpush1.bf16.msra.mxu0 %v658_v53  ;;  %690 = vmatpush1.bf16.msra.mxu1 %v658_v53 }
  0x3c   : > { %661 = vmatprep.subr.bf16.mxu0 %v660_v8  ;;  %683 = vmatprep.subr.bf16.mxu1 %v660_v8 }
  0x3f   : > { %663 = vmatpush1.bf16.msra.mxu0 %v662_v11  ;;  %691 = vmatpush1.bf16.msra.mxu1 %v662_v11 }
  0x40   : > { %665 = vmatprep.subr.bf16.mxu0 %v664_v14  ;;  %684 = vmatprep.subr.bf16.mxu1 %v664_v14 }
  0x43   : > { %667 = vmatpush1.bf16.msra.mxu0 %v666_v17  ;;  %692 = vmatpush1.bf16.msra.mxu1 %v666_v17 }
  0x44   : > { %669 = vmatprep.subr.bf16.mxu0 %v668_v20  ;;  %685 = vmatprep.subr.bf16.mxu1 %v668_v20 }
  0x47   : > { %671 = vmatpush1.bf16.msra.mxu0 %v670_v23  ;;  %693 = vmatpush1.bf16.msra.mxu1 %v670_v23 }
  0x48   : > { %673 = vmatprep.subr.bf16.mxu0 %v672_v26  ;;  %686 = vmatprep.subr.bf16.mxu1 %v672_v26 }
  0x4b   : > { %675 = vmatpush1.bf16.msra.mxu0 %v674_v30  ;;  %694 = vmatpush1.bf16.msra.mxu1 %v674_v30 }
  0xba   : > { %v322_v54 = vpop.xlane.xlu0 %321  ;;  %v324_v55 = vpop.xlane.xlu1 %323 }
  0xbb   : > { %v330_v56 = vmul.f32 0.0078125, %v322_v54  ;;  %v331_v57 = vmul.f32 0.0078125, %v324_v55 }
  0xbd   : > { %v1035_v58 = vsub.f32 %v317_v32, %v330_v56  ;;  %v1037_v59 = vsub.f32 %v318_v33, %v331_v57  ;;  %v416_v32 = vld [vmem:[%s1021_s30 + $0xe0] sm:$0xff]  ;;  %v418_v33 = vld [vmem:[%s1021_s30 + $0xf0] sm:$0xff]  ;;  %s769_s30 = scalar_lea.vmem %s768_s29, 2048 }
  0xbe   : > { %v326_v60 = vpop.xlane.xlu0 %325  ;;  %v328_v61 = vpop.xlane.xlu1 %327  ;;  %v678_v36 = vpack.c.bf16 %v418_v33, %v416_v32  ;;  %p771_p4 = scmp.lt.s32.totalorder %s769_s30, %s763_s22 }
  0xbf   : > { %v332_v62 = vmul.f32 0.0078125, %v326_v60  ;;  %v338_v63 = vmul.f32 %v1035_v58, %v1035_v58  ;;  %v333_v0 = vmul.f32 0.0078125, %v328_v61  ;;  %v339_v3 = vmul.f32 %v1037_v59, %v1037_v59 }
  0xc0   : > { %p772_p6 = por %p771_p4, %p770_p3 }
  0xc1   : > { %v1041_v1 = vsub.f32 %v319_v34, %v332_v62  ;;  %342 = vadd.xlane.f32.xlu0 %v338_v63  ;;  %v1043_v2 = vsub.f32 %v320_v35, %v333_v0  ;;  %v843_v34 = vmov 0.0   ;;  %v676_v35 = vpack.c.bf16 %v419_v31, %v417_v29 }
  0xc2   : > { %484 = vmatprep.mubr.f32.mxu0 %v843_v34  ;;  %496 = vmatprep.mubr.f32.mxu1 %v843_v34  ;;  %p773_p7 = pnand %p772_p6, %p766_p2 }
  0xc3   : > { %v340_v4 = vmul.f32 %v1041_v1, %v1041_v1  ;;  %v341_v5 = vmul.f32 %v1043_v2, %v1043_v2  ;;  %677 = vmatprep.subr.bf16.mxu0 %v676_v35  ;;  %687 = vmatprep.subr.bf16.mxu1 %v676_v35 }
  0xc4   : > { %679 = vmatpush1.bf16.msra.mxu0 %v678_v36  ;;  %695 = vmatpush1.bf16.msra.mxu1 %v678_v36 }
  0xc5   : > { %344 = vadd.xlane.f32.xlu0 %v339_v3  ;;  %346 = vadd.xlane.f32.xlu1 %v340_v4 }
  0xc9   : > { %348 = vadd.xlane.f32.xlu1 %v341_v5 }
 0x14e   : > { %v343_v37 = vpop.xlane.xlu0 %342 }
 0x14f   : > { %v350_v38 = vmul.f32 0.0078125, %v343_v37 }
 0x151   : > { %v354_v39 = vadd.f32 1e-05, %v350_v38 }
 0x152   : > { %v347_v40 = vpop.xlane.xlu1 %346  ;;  %v345_v41 = vpop.xlane.xlu0 %344 }
 0x153   : > { %755 = vrsqrt.f32 %v354_v39  ;;  %v352_v42 = vmul.f32 0.0078125, %v347_v40  ;;  %v351_v43 = vmul.f32 0.0078125, %v345_v41 }
 0x155   : > { %v356_v44 = vadd.f32 1e-05, %v352_v42  ;;  %v355_v45 = vadd.f32 1e-05, %v351_v43 }
 0x156   : > { %v349_v46 = vpop.xlane.xlu1 %348 }
 0x157   : > { %757 = vrsqrt.f32 %v356_v44  ;;  %v353_v47 = vmul.f32 0.0078125, %v349_v46 }
 0x158   : > { %759 = vrsqrt.f32 %v355_v45 }
 0x159   : > { %v357_v48 = vadd.f32 1e-05, %v353_v47 }
 0x15b   : > { %761 = vrsqrt.f32 %v357_v48 }
 0x15d   : > { %v756_v49 = vpop.eup %755 }
 0x15e   : > { %v362_v51 = vmul.f32 %v756_v49, %v1035_v58 }
 0x160   : > { %v373_v53 = vmul.f32 %v639_v50, %v362_v51 }
 0x161   : > { %v758_v54 = vpop.eup %757 }
 0x162   : > { %v760_v55 = vpop.eup %759  ;;  %v384_v56 = vadd.f32 %v640_v52, %v373_v53  ;;  %v364_v57 = vmul.f32 %v758_v54, %v1041_v1 }
 0x163   : > { %v363_v60 = vmul.f32 %v760_v55, %v1037_v59 }
 0x164   : > { %485 = vmatmul.mubr.f32.vlgmr.msra.gmra.mrb[0].mxu0 %v384_v56  ;;  %v375_v61 = vmul.f32 %v639_v50, %v364_v57 }
 0x165   : > { %v762_v62 = vpop.eup %761  ;;  %490 = vmatprep.mubr.f32.mxu0 %v843_v34  ;;  %v374_v63 = vmul.f32 %v639_v50, %v363_v60 }
 0x166   : > { %v386_v0 = vadd.f32 %v640_v52, %v375_v61  ;;  %v365_v58 = vmul.f32 %v762_v62, %v1043_v2 }
 0x167   : > { %v385_v3 = vadd.f32 %v640_v52, %v374_v63 }
 0x168   : > { %497 = vmatmul.mubr.f32.vlgmr.msra.gmra.mrb[0].mxu1 %v386_v0  ;;  %v376_v4 = vmul.f32 %v639_v50, %v365_v58 }
 0x169   : > { %491 = vmatmul.mubr.f32.gmra.mrb[2].mxu0 %v385_v3  ;;  %502 = vmatprep.mubr.f32.mxu1 %v843_v34 }
 0x16a   : > { %v387_v5 = vadd.f32 %v640_v52, %v376_v4 }
 0x16c   : > { %503 = vmatmul.mubr.f32.gmra.mrb[2].mxu1 %v387_v5 }
 0x237   : > { %v486_v1 = vpop.f32.mrb[0].mxu0 }
 0x238   : > { %509 = vst [vmem:[%s307_s10] sm:$0xff] %v486_v1  ;;  %v488_v59 = vpop.f32.mrb[1].mxu0 }
 0x239   : > { %510 = vst [vmem:[%s307_s10 + $0x8] sm:$0xff] %v488_v59 }
 0x23b   : > { %v498_v6 = vpop.f32.mrb[0].mxu1 }
 0x23c   : > { %v492_v7 = vpop.f32.mrb[2].mxu0  ;;  %513 = vst [vmem:[%s307_s10 + $0x20] sm:$0xff] %v498_v6  ;;  %v500_v2 = vpop.f32.mrb[1].mxu1 }
 0x23d   : > { %511 = vst [vmem:[%s307_s10 + $0x10] sm:$0xff] %v492_v7  ;;  %v494_v8 = vpop.f32.mrb[3].mxu0  ;;  %514 = vst [vmem:[%s307_s10 + $0x28] sm:$0xff] %v500_v2 }
 0x23e   : > { %512 = vst [vmem:[%s307_s10 + $0x18] sm:$0xff] %v494_v8 }
 0x23f   : > { %v504_v9 = vpop.f32.mrb[2].mxu1 }
 0x240   : > { %515 = vst [vmem:[%s307_s10 + $0x30] sm:$0xff] %v504_v9  ;;  %v506_v10 = vpop.f32.mrb[3].mxu1 }
 0x241   : > { %516 = vst [vmem:[%s307_s10 + $0x38] sm:$0xff] %v506_v10 }
 0x242   : > { %776 = shalt.err (!%p773_p7)
}
 0x243   : > { %s777_s5 = scalar_lea.hbm %s1088_s21, 1024  ;;  %s781_s8 = scalar_lea.hbm %s1141_s4, 2048 }
 0x244   : > { %p778_p8 = scmp.ne.s32.totalorder %s1088_s21, %s777_s5  ;;  %p782_p13 = scmp.lt.u32.totalorder %s1088_s21, %s1141_s4 }
 0x245   : > { %p783_p0 = scmp.lt.u32.totalorder %s781_s8, %s777_s5  ;;  %p785_p2 = scmp.lt.u32.totalorder %s777_s5, %s1088_s21 }
 0x246   : > { %p779_p11 = pnand %p778_p8, %p912_p5 }
 0x247   : > { %p784_p1 = por %p783_p0, %p782_p13 }
 0x248   : > { %p780_p12 = pneg %p779_p11 }
 0x249   : > { %p786_p3 = por %p785_p2, %p784_p1 }
 0x24b   : > { %p787_p4 = pnand %p786_p3, %p780_p12 }
 0x24d   : > { %790 = shalt.err (!%p787_p4)
}
 0x24e   : > { %s845_s12 = smov 256   ;;  %s846_s13 = smov 512  }
 0x24f   : > { %s847_s14 = smov 16  }
 0x250   : > { %696 = dma.vmem_to_hbm [thread:$0]  (%p912_p5), %s1083_s11, 1024, %s1088_s21, %s518_s18, %s845_s12, %s846_s13, %s847_s14  }
 0x251 PF: > { %s549_s22 = sand.u32 1, %s821_s15   ;;  %p699_p6 = pnand %p632_p10, %p923_p9 }
 0x252   : > { %s550_s24 = scalar_lea.sflag [#allocation4], %s549_s22 }
 0x253   : > { %816 = dma.done.wait (!%p699_p6), %s550_s24, 1024  }
 0x254   : > { %818 = vsyncadd (!%p699_p6), %s550_s24, 4294966272  ;;  %s17_s20 = sadd.s32 1, %s841_s20   ;;  %s1144_s15 = smov %s825_s16 }
 0x255   : > { %p14_p7 = scmp.ge.s32.totalorder %s17_s20, 4   ;;  %s1145_s16 = smov %s829_s17 }
 0x256   : > { %s1146_s17 = smov %s921_s27  ;;  %s1147_s18 = smov %s837_s19 }
 0x257   : > { %s1148_s19 = smov %s1150_s23  ;;  %16 = sbr.rel (!%p14_p7) target bundleno = 4 (0x4), region = 102 }
 0x25e   :  { %555 = vsyncpa [#allocation4], 1 }
 0x25f   :  { %557 = vsyncpa [#allocation4 + $0x1], 1 }

</bundles_post_ra>
